<compile_context>
chip_gen: v6e
topology: v6e:2x2x1
jax: 0.10.0
libtpu: 0.0.40
codegen_flags: <defaults>
</compile_context>

<pallas_src>
import jax
import jax.numpy as jnp
import numpy as np
from jax.experimental import pallas as pl
from jax.experimental.pallas import tpu as pltpu  # noqa: F401  (TPU backend assumed)

LRELU_SLOPE = 0.2
BN_EPS = 1e-5
CP = 128  # lane-width padding for channel / contraction dims


# ----------------------------- Pallas kernel ------------------------------

def _full_spec(shape):
    nd = len(shape)
    return pl.BlockSpec(tuple(shape), lambda *_: (0,) * nd)


def _make_disc_kernel(n_mid):
    """Fused forward: [conv+LReLU] + n_mid x [conv+BN+LReLU] + [conv+Sigmoid].

    Middle / classifier convs are computed as a sum over kernel taps
        Y = sum_t (G_t @ X) @ W_t
    where G_t is a 0/1 row-selection ("implicit im2col") matrix and W_t is the
    (Cin_pad, Cout_pad) weight slice of tap t.  Everything is lane-dense
    (last dim = 128) and stays resident in VMEM for the whole forward.
    """

    def kernel(*refs):
        p0_ref, w0_ref = refs[0], refs[1]

        # ---- initial conv (input patches pre-im2col'd outside) + LeakyReLU ----
        y = jnp.dot(p0_ref[...], w0_ref[...], preferred_element_type=jnp.float32)
        a = jnp.where(y > 0, y, LRELU_SLOPE * y)
        a_bf = a.astype(jnp.bfloat16)

        idx = 2
        for _ in range(n_mid):
            g_ref, w_ref, gam_ref, bet_ref = refs[idx:idx + 4]
            idx += 4
            taps, mo = g_ref.shape[0], g_ref.shape[1]
            acc = jnp.zeros((mo, CP), jnp.float32)
            for t in range(taps):
                # selection (exact 0/1 gather) then weight matmul, both on the MXU
                p_t = jnp.dot(g_ref[t], a_bf,
                              preferred_element_type=jnp.float32).astype(jnp.bfloat16)
                acc = acc + jnp.dot(p_t, w_ref[t],
                                    preferred_element_type=jnp.float32)
            # BatchNorm (train-mode batch statistics, biased one-pass variance)
            mean = jnp.mean(acc, axis=0, keepdims=True)
            var = jnp.maximum(jnp.mean(acc * acc, axis=0, keepdims=True) - mean * mean, 0.0)
            z = (acc - mean) * jax.lax.rsqrt(var + BN_EPS)
            z = z * gam_ref[...] + bet_ref[...]
            a = jnp.where(z > 0, z, LRELU_SLOPE * z)
            a_bf = a.astype(jnp.bfloat16)

        gc_ref, wc_ref = refs[idx], refs[idx + 1]
        feat_ref, cls_ref = refs[idx + 2], refs[idx + 3]

        feat_ref[...] = a  # f32 features, lane-dense (padded channels are 0)

        taps, mo = gc_ref.shape[0], gc_ref.shape[1]
        acc = jnp.zeros((mo, CP), jnp.float32)
        for t in range(taps):
            p_t = jnp.dot(gc_ref[t], a_bf,
                          preferred_element_type=jnp.float32).astype(jnp.bfloat16)
            acc = acc + jnp.dot(p_t, wc_ref[t], preferred_element_type=jnp.float32)
        # Sigmoid: exp on the EUP, approx reciprocal keeps the divide off the VALU
        cls_ref[...] = pl.reciprocal(1.0 + jnp.exp(-acc), approx=True)

    return kernel


# ----------------------- constant / parameter prep ------------------------

def _pad2d(a, rows, cols, dtype):
    r, c = a.shape
    return jnp.pad(a, ((0, rows - r), (0, cols - c))).astype(dtype)


def _tap_weights(w):
    # w: (Cout, Cin, kH, kW) -> (k*k, CP, CP) bf16; tap order (kh, kw);
    # each tap stored as (Cin, Cout) so patch-rows @ W_t matches PyTorch conv.
    co, ci, k, _ = w.shape
    taps = []
    for kh in range(k):
        for kw in range(k):
            taps.append(_pad2d(w[:, :, kh, kw].T, CP, CP, jnp.bfloat16))
    return jnp.stack(taps, axis=0)


def _selection(N, Hi, Wi, k, stride, pad, rows_pad=None):
    # 0/1 gather matrices G[t]: (Mo, Mi) with (G_t @ X)[m] = X[src row of tap t] (or 0).
    # Row order everywhere is (n, h, w); channels live on the 128-lane axis.
    Ho = (Hi + 2 * pad - k) // stride + 1
    Wo = (Wi + 2 * pad - k) // stride + 1
    Mo, Mi = N * Ho * Wo, N * Hi * Wi
    Mo_pad = Mo if rows_pad is None else max(rows_pad, Mo)
    G = np.zeros((k * k, Mo_pad, Mi), np.float32)
    for kh in range(k):
        for kw in range(k):
            t = kh * k + kw
            for n in range(N):
                for ho in range(Ho):
                    for wo in range(Wo):
                        hi = ho * stride - pad + kh
                        wi = wo * stride - pad + kw
                        if 0 <= hi < Hi and 0 <= wi < Wi:
                            G[t, n * Ho * Wo + ho * Wo + wo,
                              n * Hi * Wi + hi * Wi + wi] = 1.0
    return jnp.asarray(G, jnp.bfloat16), Ho


def build_discriminator_params(key, isize, nc, ngf, n_extra_layers, batch):
    """Mirrors GANEncoder(isize, nz=1, nc, ngf, ngpu, extralayers) layer-by-layer.
    Weights ~ N(0, 0.02) (DCGAN init), BN gamma=1, beta=0 (PyTorch defaults).
    All kernel-side constants are prebuilt in their final padded layouts."""
    assert isize % 16 == 0, "isize has to be a multiple of 16"
    keys = iter(jax.random.split(key, 64))
    raw = {"mid": []}

    # initial conv: nc -> ngf, 4x4, s2, p1, no bias (+ LeakyReLU)
    w0 = 0.02 * jax.random.normal(next(keys), (ngf, nc, 4, 4), jnp.float32)
    raw["w0"] = w0
    csize, cndf = isize // 2, ngf

    mid = []
    # extra layers: cndf -> cndf, 3x3, s1, p1 (+ BN + LeakyReLU)
    for _ in range(n_extra_layers):
        w = 0.02 * jax.random.normal(next(keys), (cndf, cndf, 3, 3), jnp.float32)
        raw["mid"].append(dict(w=w, stride=1, pad=1))
        G, _ = _selection(batch, csize, csize, 3, 1, 1)
        mid.append(dict(
            G=G, W=_tap_weights(w),
            gamma=_pad2d(jnp.ones((1, cndf), jnp.float32), 1, CP, jnp.float32),
            beta=_pad2d(jnp.zeros((1, cndf), jnp.float32), 1, CP, jnp.float32)))

    # pyramid: cndf -> 2*cndf, 4x4, s2, p1 (+ BN + LeakyReLU) until spatial == 4
    while csize > 4:
        w = 0.02 * jax.random.normal(next(keys), (2 * cndf, cndf, 4, 4), jnp.float32)
        raw["mid"].append(dict(w=w, stride=2, pad=1))
        G, _ = _selection(batch, csize, csize, 4, 2, 1)
        mid.append(dict(
            G=G, W=_tap_weights(w),
            gamma=_pad2d(jnp.ones((1, 2 * cndf), jnp.float32), 1, CP, jnp.float32),
            beta=_pad2d(jnp.zeros((1, 2 * cndf), jnp.float32), 1, CP, jnp.float32)))
        cndf *= 2
        csize //= 2

    # classifier: cndf -> 1, 4x4, s1, p0 (+ Sigmoid in forward)
    wc = 0.02 * jax.random.normal(next(keys), (1, cndf, 4, 4), jnp.float32)
    raw["wc"] = wc
    Gc, _ = _selection(batch, csize, csize, 4, 1, 0, rows_pad=8)

    return dict(
        w0=_pad2d(w0.reshape(ngf, nc * 4 * 4).T, CP, CP, jnp.bfloat16),
        mid=mid, Gc=Gc, Wc=_tap_weights(wc),
        n_mid=len(mid), batch=batch, cndf=cndf, feat_hw=csize, raw=raw)


# -------------------------------- forward ---------------------------------

def _im2col(x, k, stride, pad):
    # NCHW -> (N*Ho*Wo, C*k*k), patch column order (ci, kh, kw). Boundary-only.
    N, C, H, W = x.shape
    xp = jnp.pad(x, ((0, 0), (0, 0), (pad, pad), (pad, pad)))
    Ho = (H + 2 * pad - k) // stride + 1
    Wo = (W + 2 * pad - k) // stride + 1
    cols = []
    for kh in range(k):
        for kw in range(k):
            cols.append(xp[:, :, kh:kh + Ho * stride:stride, kw:kw + Wo * stride:stride])
    cols = jnp.stack(cols, axis=0).reshape(k, k, N, C, Ho, Wo)
    cols = cols.transpose(2, 4, 5, 3, 0, 1)          # (N, Ho, Wo, C, kh, kw)
    return cols.reshape(N * Ho * Wo, C * k * k)


def discriminator_forward(x, params):
    N = x.shape[0]
    assert N == params["batch"]
    cndf, hw = params["cndf"], params["feat_hw"]

    # boundary-only layout work: im2col the external input, pad K 48 -> 128, bf16
    p0 = _im2col(x, 4, 2, 1)
    p0 = jnp.pad(p0, ((0, 0), (0, CP - p0.shape[1]))).astype(jnp.bfloat16)

    args = [p0, params["w0"]]
    for layer in params["mid"]:
        args += [layer["G"], layer["W"], layer["gamma"], layer["beta"]]
    args += [params["Gc"], params["Wc"]]

    m_feat = N * hw * hw
    m_cls = params["Gc"].shape[1]
    out_shape = (jax.ShapeDtypeStruct((m_feat, CP), jnp.float32),
                 jax.ShapeDtypeStruct((m_cls, CP), jnp.float32))

    feat_mat, cls_mat = pl.pallas_call(
        _make_disc_kernel(params["n_mid"]),
        out_shape=out_shape,
        in_specs=[_full_spec(a.shape) for a in args],
        out_specs=(_full_spec((m_feat, CP)), _full_spec((m_cls, CP))),
    )(*args)

    # module-boundary layout: back to NCHW features, scalar classifier per sample
    features = feat_mat[:, :cndf].reshape(N, hw, hw, cndf).transpose(0, 3, 1, 2)
    classifier = cls_mat[:N, 0]
    return classifier, features


# ------------------------- pure-JAX f32 reference --------------------------

def _conv_ref(x, w, stride, pad):
    return jax.lax.conv_general_dilated(
        x, w, window_strides=(stride, stride),
        padding=((pad, pad), (pad, pad)),
        dimension_numbers=("NCHW", "OIHW", "NCHW"))


def _reference_forward(x, params):
    raw = params["raw"]
    h = _conv_ref(x, raw["w0"], 2, 1)
    h = jnp.where(h > 0, h, LRELU_SLOPE * h)
    for layer in raw["mid"]:
        h = _conv_ref(h, layer["w"], layer["stride"], layer["pad"])
        mean = jnp.mean(h, axis=(0, 2, 3), keepdims=True)
        var = jnp.mean((h - mean) ** 2, axis=(0, 2, 3), keepdims=True)
        h = (h - mean) * jax.lax.rsqrt(var + BN_EPS)   # gamma=1, beta=0
        h = jnp.where(h > 0, h, LRELU_SLOPE * h)
    feat = h
    cls = jax.nn.sigmoid(_conv_ref(feat, raw["wc"], 1, 0)).reshape(-1)
    return cls, feat


# ---------------------------------- main -----------------------------------

if __name__ == "__main__":
    # opt: isize=16, nc=3, ngf=8, ngpu=1, extralayers=1, batch=2
    isize, nc, ngf, n_extra = 16, 3, 8, 1
    batch = 2

    key = jax.random.PRNGKey(0)
    k_param, k_x = jax.random.split(key)
    params = build_discriminator_params(k_param, isize, nc, ngf, n_extra, batch)

    x = jax.random.normal(k_x, (batch, nc, isize, isize), jnp.float32)  # NCHW like PyTorch

    fwd = jax.jit(lambda inp: discriminator_forward(inp, params))
    classifier, features = fwd(x)
    classifier = jax.block_until_ready(classifier)
    features = jax.block_until_ready(features)

    assert classifier.shape == (batch,)
    assert features.shape == (batch, 2 * ngf, 4, 4)

    # correctness vs pure-JAX f32 reference (bf16 MXU inputs => loose tolerances)
    ref_cls, ref_feat = _reference_forward(x, params)
    feat_err = jnp.abs(features - ref_feat)
    cls_err = jnp.abs(classifier - ref_cls)
    assert float(jnp.max(feat_err)) < 0.25 and float(jnp.mean(feat_err)) < 0.05
    assert float(jnp.max(cls_err)) < 0.05
    assert bool(jnp.all((classifier >= -1e-3) & (classifier <= 1.0 + 1e-3)))

    print("KERNEL_OK")
</pallas_src>

<mosaic_0001>
module attributes {stable_mosaic.version = 11 : i64} {
  func.func @kernel(%arg0: memref<128x128xbf16, #tpu.memory_space<vmem>>, %arg1: memref<128x128xbf16, #tpu.memory_space<vmem>>, %arg2: memref<9x128x128xbf16, #tpu.memory_space<vmem>>, %arg3: memref<9x128x128xbf16, #tpu.memory_space<vmem>>, %arg4: memref<1x128xf32, #tpu.memory_space<vmem>>, %arg5: memref<1x128xf32, #tpu.memory_space<vmem>>, %arg6: memref<16x32x128xbf16, #tpu.memory_space<vmem>>, %arg7: memref<16x128x128xbf16, #tpu.memory_space<vmem>>, %arg8: memref<1x128xf32, #tpu.memory_space<vmem>>, %arg9: memref<1x128xf32, #tpu.memory_space<vmem>>, %arg10: memref<16x8x32xbf16, #tpu.memory_space<vmem>>, %arg11: memref<16x128x128xbf16, #tpu.memory_space<vmem>>, %arg12: memref<32x128xf32, #tpu.memory_space<vmem>>, %arg13: memref<8x128xf32, #tpu.memory_space<vmem>>) attributes {dimension_semantics = [], scalar_prefetch = 0 : i64, scratch_operands = 0 : i64, tpu.core_type = #tpu.core_type<tc>} {
    %c0 = arith.constant 0 : index
    %c0_0 = arith.constant 0 : index
    %0 = vector.load %arg0[%c0, %c0_0] : memref<128x128xbf16, #tpu.memory_space<vmem>>, vector<128x128xbf16>
    %c0_1 = arith.constant 0 : index
    %c0_2 = arith.constant 0 : index
    %1 = vector.load %arg1[%c0_1, %c0_2] : memref<128x128xbf16, #tpu.memory_space<vmem>>, vector<128x128xbf16>
    %cst = arith.constant dense<0.000000e+00> : vector<128x128xf32>
    %2 = tpu.matmul %0, %1, %cst {dimension_numbers = #tpu.dot_dimension_numbers<[1], [0], [0], [1], [0, 0, 1, 1], [], []>} : vector<128x128xbf16>, vector<128x128xbf16>, vector<128x128xf32> -> vector<128x128xf32>
    %cst_3 = arith.constant 0.000000e+00 : f32
    %3 = vector.broadcast %cst_3 : f32 to vector<128x128xf32>
    %4 = arith.cmpf ogt, %2, %3 : vector<128x128xf32>
    %cst_4 = arith.constant 2.000000e-01 : f32
    %5 = vector.broadcast %cst_4 : f32 to vector<128x128xf32>
    %6 = arith.mulf %5, %2 : vector<128x128xf32>
    %7 = arith.select %4, %2, %6 : vector<128x128xi1>, vector<128x128xf32>
    %8 = arith.truncf %7 : vector<128x128xf32> to vector<128x128xbf16>
    %cst_5 = arith.constant 0.000000e+00 : f32
    %9 = vector.broadcast %cst_5 : f32 to vector<128x128xf32>
    %c0_6 = arith.constant 0 : index
    %c0_7 = arith.constant 0 : index
    %c0_8 = arith.constant 0 : index
    %10 = vector.load %arg2[%c0_6, %c0_7, %c0_8] : memref<9x128x128xbf16, #tpu.memory_space<vmem>>, vector<1x128x128xbf16>
    %11 = vector.shape_cast %10 : vector<1x128x128xbf16> to vector<128x128xbf16>
    %cst_9 = arith.constant dense<0.000000e+00> : vector<128x128xf32>
    %12 = tpu.matmul %11, %8, %cst_9 {dimension_numbers = #tpu.dot_dimension_numbers<[1], [0], [0], [1], [0, 0, 1, 1], [], []>} : vector<128x128xbf16>, vector<128x128xbf16>, vector<128x128xf32> -> vector<128x128xf32>
    %13 = arith.truncf %12 : vector<128x128xf32> to vector<128x128xbf16>
    %c0_10 = arith.constant 0 : index
    %c0_11 = arith.constant 0 : index
    %c0_12 = arith.constant 0 : index
    %14 = vector.load %arg3[%c0_10, %c0_11, %c0_12] : memref<9x128x128xbf16, #tpu.memory_space<vmem>>, vector<1x128x128xbf16>
    %15 = vector.shape_cast %14 : vector<1x128x128xbf16> to vector<128x128xbf16>
    %cst_13 = arith.constant dense<0.000000e+00> : vector<128x128xf32>
    %16 = tpu.matmul %13, %15, %cst_13 {dimension_numbers = #tpu.dot_dimension_numbers<[1], [0], [0], [1], [0, 0, 1, 1], [], []>} : vector<128x128xbf16>, vector<128x128xbf16>, vector<128x128xf32> -> vector<128x128xf32>
    %17 = arith.addf %9, %16 : vector<128x128xf32>
    %c1 = arith.constant 1 : index
    %c0_14 = arith.constant 0 : index
    %c0_15 = arith.constant 0 : index
    %18 = vector.load %arg2[%c1, %c0_14, %c0_15] : memref<9x128x128xbf16, #tpu.memory_space<vmem>>, vector<1x128x128xbf16>
    %19 = vector.shape_cast %18 : vector<1x128x128xbf16> to vector<128x128xbf16>
    %cst_16 = arith.constant dense<0.000000e+00> : vector<128x128xf32>
    %20 = tpu.matmul %19, %8, %cst_16 {dimension_numbers = #tpu.dot_dimension_numbers<[1], [0], [0], [1], [0, 0, 1, 1], [], []>} : vector<128x128xbf16>, vector<128x128xbf16>, vector<128x128xf32> -> vector<128x128xf32>
    %21 = arith.truncf %20 : vector<128x128xf32> to vector<128x128xbf16>
    %c1_17 = arith.constant 1 : index
    %c0_18 = arith.constant 0 : index
    %c0_19 = arith.constant 0 : index
    %22 = vector.load %arg3[%c1_17, %c0_18, %c0_19] : memref<9x128x128xbf16, #tpu.memory_space<vmem>>, vector<1x128x128xbf16>
    %23 = vector.shape_cast %22 : vector<1x128x128xbf16> to vector<128x128xbf16>
    %cst_20 = arith.constant dense<0.000000e+00> : vector<128x128xf32>
    %24 = tpu.matmul %21, %23, %cst_20 {dimension_numbers = #tpu.dot_dimension_numbers<[1], [0], [0], [1], [0, 0, 1, 1], [], []>} : vector<128x128xbf16>, vector<128x128xbf16>, vector<128x128xf32> -> vector<128x128xf32>
    %25 = arith.addf %17, %24 : vector<128x128xf32>
    %c2 = arith.constant 2 : index
    %c0_21 = arith.constant 0 : index
    %c0_22 = arith.constant 0 : index
    %26 = vector.load %arg2[%c2, %c0_21, %c0_22] : memref<9x128x128xbf16, #tpu.memory_space<vmem>>, vector<1x128x128xbf16>
    %27 = vector.shape_cast %26 : vector<1x128x128xbf16> to vector<128x128xbf16>
    %cst_23 = arith.constant dense<0.000000e+00> : vector<128x128xf32>
    %28 = tpu.matmul %27, %8, %cst_23 {dimension_numbers = #tpu.dot_dimension_numbers<[1], [0], [0], [1], [0, 0, 1, 1], [], []>} : vector<128x128xbf16>, vector<128x128xbf16>, vector<128x128xf32> -> vector<128x128xf32>
    %29 = arith.truncf %28 : vector<128x128xf32> to vector<128x128xbf16>
    %c2_24 = arith.constant 2 : index
    %c0_25 = arith.constant 0 : index
    %c0_26 = arith.constant 0 : index
    %30 = vector.load %arg3[%c2_24, %c0_25, %c0_26] : memref<9x128x128xbf16, #tpu.memory_space<vmem>>, vector<1x128x128xbf16>
    %31 = vector.shape_cast %30 : vector<1x128x128xbf16> to vector<128x128xbf16>
    %cst_27 = arith.constant dense<0.000000e+00> : vector<128x128xf32>
    %32 = tpu.matmul %29, %31, %cst_27 {dimension_numbers = #tpu.dot_dimension_numbers<[1], [0], [0], [1], [0, 0, 1, 1], [], []>} : vector<128x128xbf16>, vector<128x128xbf16>, vector<128x128xf32> -> vector<128x128xf32>
    %33 = arith.addf %25, %32 : vector<128x128xf32>
    %c3 = arith.constant 3 : index
    %c0_28 = arith.constant 0 : index
    %c0_29 = arith.constant 0 : index
    %34 = vector.load %arg2[%c3, %c0_28, %c0_29] : memref<9x128x128xbf16, #tpu.memory_space<vmem>>, vector<1x128x128xbf16>
    %35 = vector.shape_cast %34 : vector<1x128x128xbf16> to vector<128x128xbf16>
    %cst_30 = arith.constant dense<0.000000e+00> : vector<128x128xf32>
    %36 = tpu.matmul %35, %8, %cst_30 {dimension_numbers = #tpu.dot_dimension_numbers<[1], [0], [0], [1], [0, 0, 1, 1], [], []>} : vector<128x128xbf16>, vector<128x128xbf16>, vector<128x128xf32> -> vector<128x128xf32>
    %37 = arith.truncf %36 : vector<128x128xf32> to vector<128x128xbf16>
    %c3_31 = arith.constant 3 : index
    %c0_32 = arith.constant 0 : index
    %c0_33 = arith.constant 0 : index
    %38 = vector.load %arg3[%c3_31, %c0_32, %c0_33] : memref<9x128x128xbf16, #tpu.memory_space<vmem>>, vector<1x128x128xbf16>
    %39 = vector.shape_cast %38 : vector<1x128x128xbf16> to vector<128x128xbf16>
    %cst_34 = arith.constant dense<0.000000e+00> : vector<128x128xf32>
    %40 = tpu.matmul %37, %39, %cst_34 {dimension_numbers = #tpu.dot_dimension_numbers<[1], [0], [0], [1], [0, 0, 1, 1], [], []>} : vector<128x128xbf16>, vector<128x128xbf16>, vector<128x128xf32> -> vector<128x128xf32>
    %41 = arith.addf %33, %40 : vector<128x128xf32>
    %c4 = arith.constant 4 : index
    %c0_35 = arith.constant 0 : index
    %c0_36 = arith.constant 0 : index
    %42 = vector.load %arg2[%c4, %c0_35, %c0_36] : memref<9x128x128xbf16, #tpu.memory_space<vmem>>, vector<1x128x128xbf16>
    %43 = vector.shape_cast %42 : vector<1x128x128xbf16> to vector<128x128xbf16>
    %cst_37 = arith.constant dense<0.000000e+00> : vector<128x128xf32>
    %44 = tpu.matmul %43, %8, %cst_37 {dimension_numbers = #tpu.dot_dimension_numbers<[1], [0], [0], [1], [0, 0, 1, 1], [], []>} : vector<128x128xbf16>, vector<128x128xbf16>, vector<128x128xf32> -> vector<128x128xf32>
    %45 = arith.truncf %44 : vector<128x128xf32> to vector<128x128xbf16>
    %c4_38 = arith.constant 4 : index
    %c0_39 = arith.constant 0 : index
    %c0_40 = arith.constant 0 : index
    %46 = vector.load %arg3[%c4_38, %c0_39, %c0_40] : memref<9x128x128xbf16, #tpu.memory_space<vmem>>, vector<1x128x128xbf16>
    %47 = vector.shape_cast %46 : vector<1x128x128xbf16> to vector<128x128xbf16>
    %cst_41 = arith.constant dense<0.000000e+00> : vector<128x128xf32>
    %48 = tpu.matmul %45, %47, %cst_41 {dimension_numbers = #tpu.dot_dimension_numbers<[1], [0], [0], [1], [0, 0, 1, 1], [], []>} : vector<128x128xbf16>, vector<128x128xbf16>, vector<128x128xf32> -> vector<128x128xf32>
    %49 = arith.addf %41, %48 : vector<128x128xf32>
    %c5 = arith.constant 5 : index
    %c0_42 = arith.constant 0 : index
    %c0_43 = arith.constant 0 : index
    %50 = vector.load %arg2[%c5, %c0_42, %c0_43] : memref<9x128x128xbf16, #tpu.memory_space<vmem>>, vector<1x128x128xbf16>
    %51 = vector.shape_cast %50 : vector<1x128x128xbf16> to vector<128x128xbf16>
    %cst_44 = arith.constant dense<0.000000e+00> : vector<128x128xf32>
    %52 = tpu.matmul %51, %8, %cst_44 {dimension_numbers = #tpu.dot_dimension_numbers<[1], [0], [0], [1], [0, 0, 1, 1], [], []>} : vector<128x128xbf16>, vector<128x128xbf16>, vector<128x128xf32> -> vector<128x128xf32>
    %53 = arith.truncf %52 : vector<128x128xf32> to vector<128x128xbf16>
    %c5_45 = arith.constant 5 : index
    %c0_46 = arith.constant 0 : index
    %c0_47 = arith.constant 0 : index
    %54 = vector.load %arg3[%c5_45, %c0_46, %c0_47] : memref<9x128x128xbf16, #tpu.memory_space<vmem>>, vector<1x128x128xbf16>
    %55 = vector.shape_cast %54 : vector<1x128x128xbf16> to vector<128x128xbf16>
    %cst_48 = arith.constant dense<0.000000e+00> : vector<128x128xf32>
    %56 = tpu.matmul %53, %55, %cst_48 {dimension_numbers = #tpu.dot_dimension_numbers<[1], [0], [0], [1], [0, 0, 1, 1], [], []>} : vector<128x128xbf16>, vector<128x128xbf16>, vector<128x128xf32> -> vector<128x128xf32>
    %57 = arith.addf %49, %56 : vector<128x128xf32>
    %c6 = arith.constant 6 : index
    %c0_49 = arith.constant 0 : index
    %c0_50 = arith.constant 0 : index
    %58 = vector.load %arg2[%c6, %c0_49, %c0_50] : memref<9x128x128xbf16, #tpu.memory_space<vmem>>, vector<1x128x128xbf16>
    %59 = vector.shape_cast %58 : vector<1x128x128xbf16> to vector<128x128xbf16>
    %cst_51 = arith.constant dense<0.000000e+00> : vector<128x128xf32>
    %60 = tpu.matmul %59, %8, %cst_51 {dimension_numbers = #tpu.dot_dimension_numbers<[1], [0], [0], [1], [0, 0, 1, 1], [], []>} : vector<128x128xbf16>, vector<128x128xbf16>, vector<128x128xf32> -> vector<128x128xf32>
    %61 = arith.truncf %60 : vector<128x128xf32> to vector<128x128xbf16>
    %c6_52 = arith.constant 6 : index
    %c0_53 = arith.constant 0 : index
    %c0_54 = arith.constant 0 : index
    %62 = vector.load %arg3[%c6_52, %c0_53, %c0_54] : memref<9x128x128xbf16, #tpu.memory_space<vmem>>, vector<1x128x128xbf16>
    %63 = vector.shape_cast %62 : vector<1x128x128xbf16> to vector<128x128xbf16>
    %cst_55 = arith.constant dense<0.000000e+00> : vector<128x128xf32>
    %64 = tpu.matmul %61, %63, %cst_55 {dimension_numbers = #tpu.dot_dimension_numbers<[1], [0], [0], [1], [0, 0, 1, 1], [], []>} : vector<128x128xbf16>, vector<128x128xbf16>, vector<128x128xf32> -> vector<128x128xf32>
    %65 = arith.addf %57, %64 : vector<128x128xf32>
    %c7 = arith.constant 7 : index
    %c0_56 = arith.constant 0 : index
    %c0_57 = arith.constant 0 : index
    %66 = vector.load %arg2[%c7, %c0_56, %c0_57] : memref<9x128x128xbf16, #tpu.memory_space<vmem>>, vector<1x128x128xbf16>
    %67 = vector.shape_cast %66 : vector<1x128x128xbf16> to vector<128x128xbf16>
    %cst_58 = arith.constant dense<0.000000e+00> : vector<128x128xf32>
    %68 = tpu.matmul %67, %8, %cst_58 {dimension_numbers = #tpu.dot_dimension_numbers<[1], [0], [0], [1], [0, 0, 1, 1], [], []>} : vector<128x128xbf16>, vector<128x128xbf16>, vector<128x128xf32> -> vector<128x128xf32>
    %69 = arith.truncf %68 : vector<128x128xf32> to vector<128x128xbf16>
    %c7_59 = arith.constant 7 : index
    %c0_60 = arith.constant 0 : index
    %c0_61 = arith.constant 0 : index
    %70 = vector.load %arg3[%c7_59, %c0_60, %c0_61] : memref<9x128x128xbf16, #tpu.memory_space<vmem>>, vector<1x128x128xbf16>
    %71 = vector.shape_cast %70 : vector<1x128x128xbf16> to vector<128x128xbf16>
    %cst_62 = arith.constant dense<0.000000e+00> : vector<128x128xf32>
    %72 = tpu.matmul %69, %71, %cst_62 {dimension_numbers = #tpu.dot_dimension_numbers<[1], [0], [0], [1], [0, 0, 1, 1], [], []>} : vector<128x128xbf16>, vector<128x128xbf16>, vector<128x128xf32> -> vector<128x128xf32>
    %73 = arith.addf %65, %72 : vector<128x128xf32>
    %c8 = arith.constant 8 : index
    %c0_63 = arith.constant 0 : index
    %c0_64 = arith.constant 0 : index
    %74 = vector.load %arg2[%c8, %c0_63, %c0_64] : memref<9x128x128xbf16, #tpu.memory_space<vmem>>, vector<1x128x128xbf16>
    %75 = vector.shape_cast %74 : vector<1x128x128xbf16> to vector<128x128xbf16>
    %cst_65 = arith.constant dense<0.000000e+00> : vector<128x128xf32>
    %76 = tpu.matmul %75, %8, %cst_65 {dimension_numbers = #tpu.dot_dimension_numbers<[1], [0], [0], [1], [0, 0, 1, 1], [], []>} : vector<128x128xbf16>, vector<128x128xbf16>, vector<128x128xf32> -> vector<128x128xf32>
    %77 = arith.truncf %76 : vector<128x128xf32> to vector<128x128xbf16>
    %c8_66 = arith.constant 8 : index
    %c0_67 = arith.constant 0 : index
    %c0_68 = arith.constant 0 : index
    %78 = vector.load %arg3[%c8_66, %c0_67, %c0_68] : memref<9x128x128xbf16, #tpu.memory_space<vmem>>, vector<1x128x128xbf16>
    %79 = vector.shape_cast %78 : vector<1x128x128xbf16> to vector<128x128xbf16>
    %cst_69 = arith.constant dense<0.000000e+00> : vector<128x128xf32>
    %80 = tpu.matmul %77, %79, %cst_69 {dimension_numbers = #tpu.dot_dimension_numbers<[1], [0], [0], [1], [0, 0, 1, 1], [], []>} : vector<128x128xbf16>, vector<128x128xbf16>, vector<128x128xf32> -> vector<128x128xf32>
    %81 = arith.addf %73, %80 : vector<128x128xf32>
    %cst_70 = arith.constant dense<0.000000e+00> : vector<128xf32>
    %82 = vector.multi_reduction <add>, %81, %cst_70 [0] : vector<128x128xf32> to vector<128xf32>
    %83 = vector.shape_cast %82 : vector<128xf32> to vector<1x128xf32>
    %cst_71 = arith.constant 1.280000e+02 : f32
    %84 = vector.broadcast %cst_71 : f32 to vector<1x128xf32>
    %85 = arith.divf %83, %84 : vector<1x128xf32>
    %86 = arith.mulf %81, %81 : vector<128x128xf32>
    %cst_72 = arith.constant dense<0.000000e+00> : vector<128xf32>
    %87 = vector.multi_reduction <add>, %86, %cst_72 [0] : vector<128x128xf32> to vector<128xf32>
    %88 = vector.shape_cast %87 : vector<128xf32> to vector<1x128xf32>
    %cst_73 = arith.constant 1.280000e+02 : f32
    %89 = vector.broadcast %cst_73 : f32 to vector<1x128xf32>
    %90 = arith.divf %88, %89 : vector<1x128xf32>
    %91 = arith.mulf %85, %85 : vector<1x128xf32>
    %92 = arith.subf %90, %91 : vector<1x128xf32>
    %cst_74 = arith.constant 0.000000e+00 : f32
    %93 = vector.broadcast %cst_74 : f32 to vector<1x128xf32>
    %94 = arith.maximumf %92, %93 : vector<1x128xf32>
    %95 = vector.broadcast %85 : vector<1x128xf32> to vector<128x128xf32>
    %96 = arith.subf %81, %95 : vector<128x128xf32>
    %cst_75 = arith.constant 9.99999974E-6 : f32
    %97 = vector.broadcast %cst_75 : f32 to vector<1x128xf32>
    %98 = arith.addf %94, %97 : vector<1x128xf32>
    %99 = math.rsqrt %98 : vector<1x128xf32>
    %100 = vector.broadcast %99 : vector<1x128xf32> to vector<128x128xf32>
    %101 = arith.mulf %96, %100 : vector<128x128xf32>
    %c0_76 = arith.constant 0 : index
    %c0_77 = arith.constant 0 : index
    %102 = vector.load %arg4[%c0_76, %c0_77] : memref<1x128xf32, #tpu.memory_space<vmem>>, vector<1x128xf32>
    %103 = vector.broadcast %102 : vector<1x128xf32> to vector<128x128xf32>
    %104 = arith.mulf %101, %103 : vector<128x128xf32>
    %c0_78 = arith.constant 0 : index
    %c0_79 = arith.constant 0 : index
    %105 = vector.load %arg5[%c0_78, %c0_79] : memref<1x128xf32, #tpu.memory_space<vmem>>, vector<1x128xf32>
    %106 = vector.broadcast %105 : vector<1x128xf32> to vector<128x128xf32>
    %107 = arith.addf %104, %106 : vector<128x128xf32>
    %cst_80 = arith.constant 0.000000e+00 : f32
    %108 = vector.broadcast %cst_80 : f32 to vector<128x128xf32>
    %109 = arith.cmpf ogt, %107, %108 : vector<128x128xf32>
    %cst_81 = arith.constant 2.000000e-01 : f32
    %110 = vector.broadcast %cst_81 : f32 to vector<128x128xf32>
    %111 = arith.mulf %110, %107 : vector<128x128xf32>
    %112 = arith.select %109, %107, %111 : vector<128x128xi1>, vector<128x128xf32>
    %113 = arith.truncf %112 : vector<128x128xf32> to vector<128x128xbf16>
    %cst_82 = arith.constant 0.000000e+00 : f32
    %114 = vector.broadcast %cst_82 : f32 to vector<32x128xf32>
    %c0_83 = arith.constant 0 : index
    %c0_84 = arith.constant 0 : index
    %c0_85 = arith.constant 0 : index
    %115 = vector.load %arg6[%c0_83, %c0_84, %c0_85] : memref<16x32x128xbf16, #tpu.memory_space<vmem>>, vector<1x32x128xbf16>
    %116 = vector.shape_cast %115 : vector<1x32x128xbf16> to vector<32x128xbf16>
    %cst_86 = arith.constant dense<0.000000e+00> : vector<32x128xf32>
    %117 = tpu.matmul %116, %113, %cst_86 {dimension_numbers = #tpu.dot_dimension_numbers<[1], [0], [0], [1], [0, 0, 1, 1], [], []>} : vector<32x128xbf16>, vector<128x128xbf16>, vector<32x128xf32> -> vector<32x128xf32>
    %118 = arith.truncf %117 : vector<32x128xf32> to vector<32x128xbf16>
    %c0_87 = arith.constant 0 : index
    %c0_88 = arith.constant 0 : index
    %c0_89 = arith.constant 0 : index
    %119 = vector.load %arg7[%c0_87, %c0_88, %c0_89] : memref<16x128x128xbf16, #tpu.memory_space<vmem>>, vector<1x128x128xbf16>
    %120 = vector.shape_cast %119 : vector<1x128x128xbf16> to vector<128x128xbf16>
    %cst_90 = arith.constant dense<0.000000e+00> : vector<32x128xf32>
    %121 = tpu.matmul %118, %120, %cst_90 {dimension_numbers = #tpu.dot_dimension_numbers<[1], [0], [0], [1], [0, 0, 1, 1], [], []>} : vector<32x128xbf16>, vector<128x128xbf16>, vector<32x128xf32> -> vector<32x128xf32>
    %122 = arith.addf %114, %121 : vector<32x128xf32>
    %c1_91 = arith.constant 1 : index
    %c0_92 = arith.constant 0 : index
    %c0_93 = arith.constant 0 : index
    %123 = vector.load %arg6[%c1_91, %c0_92, %c0_93] : memref<16x32x128xbf16, #tpu.memory_space<vmem>>, vector<1x32x128xbf16>
    %124 = vector.shape_cast %123 : vector<1x32x128xbf16> to vector<32x128xbf16>
    %cst_94 = arith.constant dense<0.000000e+00> : vector<32x128xf32>
    %125 = tpu.matmul %124, %113, %cst_94 {dimension_numbers = #tpu.dot_dimension_numbers<[1], [0], [0], [1], [0, 0, 1, 1], [], []>} : vector<32x128xbf16>, vector<128x128xbf16>, vector<32x128xf32> -> vector<32x128xf32>
    %126 = arith.truncf %125 : vector<32x128xf32> to vector<32x128xbf16>
    %c1_95 = arith.constant 1 : index
    %c0_96 = arith.constant 0 : index
    %c0_97 = arith.constant 0 : index
    %127 = vector.load %arg7[%c1_95, %c0_96, %c0_97] : memref<16x128x128xbf16, #tpu.memory_space<vmem>>, vector<1x128x128xbf16>
    %128 = vector.shape_cast %127 : vector<1x128x128xbf16> to vector<128x128xbf16>
    %cst_98 = arith.constant dense<0.000000e+00> : vector<32x128xf32>
    %129 = tpu.matmul %126, %128, %cst_98 {dimension_numbers = #tpu.dot_dimension_numbers<[1], [0], [0], [1], [0, 0, 1, 1], [], []>} : vector<32x128xbf16>, vector<128x128xbf16>, vector<32x128xf32> -> vector<32x128xf32>
    %130 = arith.addf %122, %129 : vector<32x128xf32>
    %c2_99 = arith.constant 2 : index
    %c0_100 = arith.constant 0 : index
    %c0_101 = arith.constant 0 : index
    %131 = vector.load %arg6[%c2_99, %c0_100, %c0_101] : memref<16x32x128xbf16, #tpu.memory_space<vmem>>, vector<1x32x128xbf16>
    %132 = vector.shape_cast %131 : vector<1x32x128xbf16> to vector<32x128xbf16>
    %cst_102 = arith.constant dense<0.000000e+00> : vector<32x128xf32>
    %133 = tpu.matmul %132, %113, %cst_102 {dimension_numbers = #tpu.dot_dimension_numbers<[1], [0], [0], [1], [0, 0, 1, 1], [], []>} : vector<32x128xbf16>, vector<128x128xbf16>, vector<32x128xf32> -> vector<32x128xf32>
    %134 = arith.truncf %133 : vector<32x128xf32> to vector<32x128xbf16>
    %c2_103 = arith.constant 2 : index
    %c0_104 = arith.constant 0 : index
    %c0_105 = arith.constant 0 : index
    %135 = vector.load %arg7[%c2_103, %c0_104, %c0_105] : memref<16x128x128xbf16, #tpu.memory_space<vmem>>, vector<1x128x128xbf16>
    %136 = vector.shape_cast %135 : vector<1x128x128xbf16> to vector<128x128xbf16>
    %cst_106 = arith.constant dense<0.000000e+00> : vector<32x128xf32>
    %137 = tpu.matmul %134, %136, %cst_106 {dimension_numbers = #tpu.dot_dimension_numbers<[1], [0], [0], [1], [0, 0, 1, 1], [], []>} : vector<32x128xbf16>, vector<128x128xbf16>, vector<32x128xf32> -> vector<32x128xf32>
    %138 = arith.addf %130, %137 : vector<32x128xf32>
    %c3_107 = arith.constant 3 : index
    %c0_108 = arith.constant 0 : index
    %c0_109 = arith.constant 0 : index
    %139 = vector.load %arg6[%c3_107, %c0_108, %c0_109] : memref<16x32x128xbf16, #tpu.memory_space<vmem>>, vector<1x32x128xbf16>
    %140 = vector.shape_cast %139 : vector<1x32x128xbf16> to vector<32x128xbf16>
    %cst_110 = arith.constant dense<0.000000e+00> : vector<32x128xf32>
    %141 = tpu.matmul %140, %113, %cst_110 {dimension_numbers = #tpu.dot_dimension_numbers<[1], [0], [0], [1], [0, 0, 1, 1], [], []>} : vector<32x128xbf16>, vector<128x128xbf16>, vector<32x128xf32> -> vector<32x128xf32>
    %142 = arith.truncf %141 : vector<32x128xf32> to vector<32x128xbf16>
    %c3_111 = arith.constant 3 : index
    %c0_112 = arith.constant 0 : index
    %c0_113 = arith.constant 0 : index
    %143 = vector.load %arg7[%c3_111, %c0_112, %c0_113] : memref<16x128x128xbf16, #tpu.memory_space<vmem>>, vector<1x128x128xbf16>
    %144 = vector.shape_cast %143 : vector<1x128x128xbf16> to vector<128x128xbf16>
    %cst_114 = arith.constant dense<0.000000e+00> : vector<32x128xf32>
    %145 = tpu.matmul %142, %144, %cst_114 {dimension_numbers = #tpu.dot_dimension_numbers<[1], [0], [0], [1], [0, 0, 1, 1], [], []>} : vector<32x128xbf16>, vector<128x128xbf16>, vector<32x128xf32> -> vector<32x128xf32>
    %146 = arith.addf %138, %145 : vector<32x128xf32>
    %c4_115 = arith.constant 4 : index
    %c0_116 = arith.constant 0 : index
    %c0_117 = arith.constant 0 : index
    %147 = vector.load %arg6[%c4_115, %c0_116, %c0_117] : memref<16x32x128xbf16, #tpu.memory_space<vmem>>, vector<1x32x128xbf16>
    %148 = vector.shape_cast %147 : vector<1x32x128xbf16> to vector<32x128xbf16>
    %cst_118 = arith.constant dense<0.000000e+00> : vector<32x128xf32>
    %149 = tpu.matmul %148, %113, %cst_118 {dimension_numbers = #tpu.dot_dimension_numbers<[1], [0], [0], [1], [0, 0, 1, 1], [], []>} : vector<32x128xbf16>, vector<128x128xbf16>, vector<32x128xf32> -> vector<32x128xf32>
    %150 = arith.truncf %149 : vector<32x128xf32> to vector<32x128xbf16>
    %c4_119 = arith.constant 4 : index
    %c0_120 = arith.constant 0 : index
    %c0_121 = arith.constant 0 : index
    %151 = vector.load %arg7[%c4_119, %c0_120, %c0_121] : memref<16x128x128xbf16, #tpu.memory_space<vmem>>, vector<1x128x128xbf16>
    %152 = vector.shape_cast %151 : vector<1x128x128xbf16> to vector<128x128xbf16>
    %cst_122 = arith.constant dense<0.000000e+00> : vector<32x128xf32>
    %153 = tpu.matmul %150, %152, %cst_122 {dimension_numbers = #tpu.dot_dimension_numbers<[1], [0], [0], [1], [0, 0, 1, 1], [], []>} : vector<32x128xbf16>, vector<128x128xbf16>, vector<32x128xf32> -> vector<32x128xf32>
    %154 = arith.addf %146, %153 : vector<32x128xf32>
    %c5_123 = arith.constant 5 : index
    %c0_124 = arith.constant 0 : index
    %c0_125 = arith.constant 0 : index
    %155 = vector.load %arg6[%c5_123, %c0_124, %c0_125] : memref<16x32x128xbf16, #tpu.memory_space<vmem>>, vector<1x32x128xbf16>
    %156 = vector.shape_cast %155 : vector<1x32x128xbf16> to vector<32x128xbf16>
    %cst_126 = arith.constant dense<0.000000e+00> : vector<32x128xf32>
    %157 = tpu.matmul %156, %113, %cst_126 {dimension_numbers = #tpu.dot_dimension_numbers<[1], [0], [0], [1], [0, 0, 1, 1], [], []>} : vector<32x128xbf16>, vector<128x128xbf16>, vector<32x128xf32> -> vector<32x128xf32>
    %158 = arith.truncf %157 : vector<32x128xf32> to vector<32x128xbf16>
    %c5_127 = arith.constant 5 : index
    %c0_128 = arith.constant 0 : index
    %c0_129 = arith.constant 0 : index
    %159 = vector.load %arg7[%c5_127, %c0_128, %c0_129] : memref<16x128x128xbf16, #tpu.memory_space<vmem>>, vector<1x128x128xbf16>
    %160 = vector.shape_cast %159 : vector<1x128x128xbf16> to vector<128x128xbf16>
    %cst_130 = arith.constant dense<0.000000e+00> : vector<32x128xf32>
    %161 = tpu.matmul %158, %160, %cst_130 {dimension_numbers = #tpu.dot_dimension_numbers<[1], [0], [0], [1], [0, 0, 1, 1], [], []>} : vector<32x128xbf16>, vector<128x128xbf16>, vector<32x128xf32> -> vector<32x128xf32>
    %162 = arith.addf %154, %161 : vector<32x128xf32>
    %c6_131 = arith.constant 6 : index
    %c0_132 = arith.constant 0 : index
    %c0_133 = arith.constant 0 : index
    %163 = vector.load %arg6[%c6_131, %c0_132, %c0_133] : memref<16x32x128xbf16, #tpu.memory_space<vmem>>, vector<1x32x128xbf16>
    %164 = vector.shape_cast %163 : vector<1x32x128xbf16> to vector<32x128xbf16>
    %cst_134 = arith.constant dense<0.000000e+00> : vector<32x128xf32>
    %165 = tpu.matmul %164, %113, %cst_134 {dimension_numbers = #tpu.dot_dimension_numbers<[1], [0], [0], [1], [0, 0, 1, 1], [], []>} : vector<32x128xbf16>, vector<128x128xbf16>, vector<32x128xf32> -> vector<32x128xf32>
    %166 = arith.truncf %165 : vector<32x128xf32> to vector<32x128xbf16>
    %c6_135 = arith.constant 6 : index
    %c0_136 = arith.constant 0 : index
    %c0_137 = arith.constant 0 : index
    %167 = vector.load %arg7[%c6_135, %c0_136, %c0_137] : memref<16x128x128xbf16, #tpu.memory_space<vmem>>, vector<1x128x128xbf16>
    %168 = vector.shape_cast %167 : vector<1x128x128xbf16> to vector<128x128xbf16>
    %cst_138 = arith.constant dense<0.000000e+00> : vector<32x128xf32>
    %169 = tpu.matmul %166, %168, %cst_138 {dimension_numbers = #tpu.dot_dimension_numbers<[1], [0], [0], [1], [0, 0, 1, 1], [], []>} : vector<32x128xbf16>, vector<128x128xbf16>, vector<32x128xf32> -> vector<32x128xf32>
    %170 = arith.addf %162, %169 : vector<32x128xf32>
    %c7_139 = arith.constant 7 : index
    %c0_140 = arith.constant 0 : index
    %c0_141 = arith.constant 0 : index
    %171 = vector.load %arg6[%c7_139, %c0_140, %c0_141] : memref<16x32x128xbf16, #tpu.memory_space<vmem>>, vector<1x32x128xbf16>
    %172 = vector.shape_cast %171 : vector<1x32x128xbf16> to vector<32x128xbf16>
    %cst_142 = arith.constant dense<0.000000e+00> : vector<32x128xf32>
    %173 = tpu.matmul %172, %113, %cst_142 {dimension_numbers = #tpu.dot_dimension_numbers<[1], [0], [0], [1], [0, 0, 1, 1], [], []>} : vector<32x128xbf16>, vector<128x128xbf16>, vector<32x128xf32> -> vector<32x128xf32>
    %174 = arith.truncf %173 : vector<32x128xf32> to vector<32x128xbf16>
    %c7_143 = arith.constant 7 : index
    %c0_144 = arith.constant 0 : index
    %c0_145 = arith.constant 0 : index
    %175 = vector.load %arg7[%c7_143, %c0_144, %c0_145] : memref<16x128x128xbf16, #tpu.memory_space<vmem>>, vector<1x128x128xbf16>
    %176 = vector.shape_cast %175 : vector<1x128x128xbf16> to vector<128x128xbf16>
    %cst_146 = arith.constant dense<0.000000e+00> : vector<32x128xf32>
    %177 = tpu.matmul %174, %176, %cst_146 {dimension_numbers = #tpu.dot_dimension_numbers<[1], [0], [0], [1], [0, 0, 1, 1], [], []>} : vector<32x128xbf16>, vector<128x128xbf16>, vector<32x128xf32> -> vector<32x128xf32>
    %178 = arith.addf %170, %177 : vector<32x128xf32>
    %c8_147 = arith.constant 8 : index
    %c0_148 = arith.constant 0 : index
    %c0_149 = arith.constant 0 : index
    %179 = vector.load %arg6[%c8_147, %c0_148, %c0_149] : memref<16x32x128xbf16, #tpu.memory_space<vmem>>, vector<1x32x128xbf16>
    %180 = vector.shape_cast %179 : vector<1x32x128xbf16> to vector<32x128xbf16>
    %cst_150 = arith.constant dense<0.000000e+00> : vector<32x128xf32>
    %181 = tpu.matmul %180, %113, %cst_150 {dimension_numbers = #tpu.dot_dimension_numbers<[1], [0], [0], [1], [0, 0, 1, 1], [], []>} : vector<32x128xbf16>, vector<128x128xbf16>, vector<32x128xf32> -> vector<32x128xf32>
    %182 = arith.truncf %181 : vector<32x128xf32> to vector<32x128xbf16>
    %c8_151 = arith.constant 8 : index
    %c0_152 = arith.constant 0 : index
    %c0_153 = arith.constant 0 : index
    %183 = vector.load %arg7[%c8_151, %c0_152, %c0_153] : memref<16x128x128xbf16, #tpu.memory_space<vmem>>, vector<1x128x128xbf16>
    %184 = vector.shape_cast %183 : vector<1x128x128xbf16> to vector<128x128xbf16>
    %cst_154 = arith.constant dense<0.000000e+00> : vector<32x128xf32>
    %185 = tpu.matmul %182, %184, %cst_154 {dimension_numbers = #tpu.dot_dimension_numbers<[1], [0], [0], [1], [0, 0, 1, 1], [], []>} : vector<32x128xbf16>, vector<128x128xbf16>, vector<32x128xf32> -> vector<32x128xf32>
    %186 = arith.addf %178, %185 : vector<32x128xf32>
    %c9 = arith.constant 9 : index
    %c0_155 = arith.constant 0 : index
    %c0_156 = arith.constant 0 : index
    %187 = vector.load %arg6[%c9, %c0_155, %c0_156] : memref<16x32x128xbf16, #tpu.memory_space<vmem>>, vector<1x32x128xbf16>
    %188 = vector.shape_cast %187 : vector<1x32x128xbf16> to vector<32x128xbf16>
    %cst_157 = arith.constant dense<0.000000e+00> : vector<32x128xf32>
    %189 = tpu.matmul %188, %113, %cst_157 {dimension_numbers = #tpu.dot_dimension_numbers<[1], [0], [0], [1], [0, 0, 1, 1], [], []>} : vector<32x128xbf16>, vector<128x128xbf16>, vector<32x128xf32> -> vector<32x128xf32>
    %190 = arith.truncf %189 : vector<32x128xf32> to vector<32x128xbf16>
    %c9_158 = arith.constant 9 : index
    %c0_159 = arith.constant 0 : index
    %c0_160 = arith.constant 0 : index
    %191 = vector.load %arg7[%c9_158, %c0_159, %c0_160] : memref<16x128x128xbf16, #tpu.memory_space<vmem>>, vector<1x128x128xbf16>
    %192 = vector.shape_cast %191 : vector<1x128x128xbf16> to vector<128x128xbf16>
    %cst_161 = arith.constant dense<0.000000e+00> : vector<32x128xf32>
    %193 = tpu.matmul %190, %192, %cst_161 {dimension_numbers = #tpu.dot_dimension_numbers<[1], [0], [0], [1], [0, 0, 1, 1], [], []>} : vector<32x128xbf16>, vector<128x128xbf16>, vector<32x128xf32> -> vector<32x128xf32>
    %194 = arith.addf %186, %193 : vector<32x128xf32>
    %c10 = arith.constant 10 : index
    %c0_162 = arith.constant 0 : index
    %c0_163 = arith.constant 0 : index
    %195 = vector.load %arg6[%c10, %c0_162, %c0_163] : memref<16x32x128xbf16, #tpu.memory_space<vmem>>, vector<1x32x128xbf16>
    %196 = vector.shape_cast %195 : vector<1x32x128xbf16> to vector<32x128xbf16>
    %cst_164 = arith.constant dense<0.000000e+00> : vector<32x128xf32>
    %197 = tpu.matmul %196, %113, %cst_164 {dimension_numbers = #tpu.dot_dimension_numbers<[1], [0], [0], [1], [0, 0, 1, 1], [], []>} : vector<32x128xbf16>, vector<128x128xbf16>, vector<32x128xf32> -> vector<32x128xf32>
    %198 = arith.truncf %197 : vector<32x128xf32> to vector<32x128xbf16>
    %c10_165 = arith.constant 10 : index
    %c0_166 = arith.constant 0 : index
    %c0_167 = arith.constant 0 : index
    %199 = vector.load %arg7[%c10_165, %c0_166, %c0_167] : memref<16x128x128xbf16, #tpu.memory_space<vmem>>, vector<1x128x128xbf16>
    %200 = vector.shape_cast %199 : vector<1x128x128xbf16> to vector<128x128xbf16>
    %cst_168 = arith.constant dense<0.000000e+00> : vector<32x128xf32>
    %201 = tpu.matmul %198, %200, %cst_168 {dimension_numbers = #tpu.dot_dimension_numbers<[1], [0], [0], [1], [0, 0, 1, 1], [], []>} : vector<32x128xbf16>, vector<128x128xbf16>, vector<32x128xf32> -> vector<32x128xf32>
    %202 = arith.addf %194, %201 : vector<32x128xf32>
    %c11 = arith.constant 11 : index
    %c0_169 = arith.constant 0 : index
    %c0_170 = arith.constant 0 : index
    %203 = vector.load %arg6[%c11, %c0_169, %c0_170] : memref<16x32x128xbf16, #tpu.memory_space<vmem>>, vector<1x32x128xbf16>
    %204 = vector.shape_cast %203 : vector<1x32x128xbf16> to vector<32x128xbf16>
    %cst_171 = arith.constant dense<0.000000e+00> : vector<32x128xf32>
    %205 = tpu.matmul %204, %113, %cst_171 {dimension_numbers = #tpu.dot_dimension_numbers<[1], [0], [0], [1], [0, 0, 1, 1], [], []>} : vector<32x128xbf16>, vector<128x128xbf16>, vector<32x128xf32> -> vector<32x128xf32>
    %206 = arith.truncf %205 : vector<32x128xf32> to vector<32x128xbf16>
    %c11_172 = arith.constant 11 : index
    %c0_173 = arith.constant 0 : index
    %c0_174 = arith.constant 0 : index
    %207 = vector.load %arg7[%c11_172, %c0_173, %c0_174] : memref<16x128x128xbf16, #tpu.memory_space<vmem>>, vector<1x128x128xbf16>
    %208 = vector.shape_cast %207 : vector<1x128x128xbf16> to vector<128x128xbf16>
    %cst_175 = arith.constant dense<0.000000e+00> : vector<32x128xf32>
    %209 = tpu.matmul %206, %208, %cst_175 {dimension_numbers = #tpu.dot_dimension_numbers<[1], [0], [0], [1], [0, 0, 1, 1], [], []>} : vector<32x128xbf16>, vector<128x128xbf16>, vector<32x128xf32> -> vector<32x128xf32>
    %210 = arith.addf %202, %209 : vector<32x128xf32>
    %c12 = arith.constant 12 : index
    %c0_176 = arith.constant 0 : index
    %c0_177 = arith.constant 0 : index
    %211 = vector.load %arg6[%c12, %c0_176, %c0_177] : memref<16x32x128xbf16, #tpu.memory_space<vmem>>, vector<1x32x128xbf16>
    %212 = vector.shape_cast %211 : vector<1x32x128xbf16> to vector<32x128xbf16>
    %cst_178 = arith.constant dense<0.000000e+00> : vector<32x128xf32>
    %213 = tpu.matmul %212, %113, %cst_178 {dimension_numbers = #tpu.dot_dimension_numbers<[1], [0], [0], [1], [0, 0, 1, 1], [], []>} : vector<32x128xbf16>, vector<128x128xbf16>, vector<32x128xf32> -> vector<32x128xf32>
    %214 = arith.truncf %213 : vector<32x128xf32> to vector<32x128xbf16>
    %c12_179 = arith.constant 12 : index
    %c0_180 = arith.constant 0 : index
    %c0_181 = arith.constant 0 : index
    %215 = vector.load %arg7[%c12_179, %c0_180, %c0_181] : memref<16x128x128xbf16, #tpu.memory_space<vmem>>, vector<1x128x128xbf16>
    %216 = vector.shape_cast %215 : vector<1x128x128xbf16> to vector<128x128xbf16>
    %cst_182 = arith.constant dense<0.000000e+00> : vector<32x128xf32>
    %217 = tpu.matmul %214, %216, %cst_182 {dimension_numbers = #tpu.dot_dimension_numbers<[1], [0], [0], [1], [0, 0, 1, 1], [], []>} : vector<32x128xbf16>, vector<128x128xbf16>, vector<32x128xf32> -> vector<32x128xf32>
    %218 = arith.addf %210, %217 : vector<32x128xf32>
    %c13 = arith.constant 13 : index
    %c0_183 = arith.constant 0 : index
    %c0_184 = arith.constant 0 : index
    %219 = vector.load %arg6[%c13, %c0_183, %c0_184] : memref<16x32x128xbf16, #tpu.memory_space<vmem>>, vector<1x32x128xbf16>
    %220 = vector.shape_cast %219 : vector<1x32x128xbf16> to vector<32x128xbf16>
    %cst_185 = arith.constant dense<0.000000e+00> : vector<32x128xf32>
    %221 = tpu.matmul %220, %113, %cst_185 {dimension_numbers = #tpu.dot_dimension_numbers<[1], [0], [0], [1], [0, 0, 1, 1], [], []>} : vector<32x128xbf16>, vector<128x128xbf16>, vector<32x128xf32> -> vector<32x128xf32>
    %222 = arith.truncf %221 : vector<32x128xf32> to vector<32x128xbf16>
    %c13_186 = arith.constant 13 : index
    %c0_187 = arith.constant 0 : index
    %c0_188 = arith.constant 0 : index
    %223 = vector.load %arg7[%c13_186, %c0_187, %c0_188] : memref<16x128x128xbf16, #tpu.memory_space<vmem>>, vector<1x128x128xbf16>
    %224 = vector.shape_cast %223 : vector<1x128x128xbf16> to vector<128x128xbf16>
    %cst_189 = arith.constant dense<0.000000e+00> : vector<32x128xf32>
    %225 = tpu.matmul %222, %224, %cst_189 {dimension_numbers = #tpu.dot_dimension_numbers<[1], [0], [0], [1], [0, 0, 1, 1], [], []>} : vector<32x128xbf16>, vector<128x128xbf16>, vector<32x128xf32> -> vector<32x128xf32>
    %226 = arith.addf %218, %225 : vector<32x128xf32>
    %c14 = arith.constant 14 : index
    %c0_190 = arith.constant 0 : index
    %c0_191 = arith.constant 0 : index
    %227 = vector.load %arg6[%c14, %c0_190, %c0_191] : memref<16x32x128xbf16, #tpu.memory_space<vmem>>, vector<1x32x128xbf16>
    %228 = vector.shape_cast %227 : vector<1x32x128xbf16> to vector<32x128xbf16>
    %cst_192 = arith.constant dense<0.000000e+00> : vector<32x128xf32>
    %229 = tpu.matmul %228, %113, %cst_192 {dimension_numbers = #tpu.dot_dimension_numbers<[1], [0], [0], [1], [0, 0, 1, 1], [], []>} : vector<32x128xbf16>, vector<128x128xbf16>, vector<32x128xf32> -> vector<32x128xf32>
    %230 = arith.truncf %229 : vector<32x128xf32> to vector<32x128xbf16>
    %c14_193 = arith.constant 14 : index
    %c0_194 = arith.constant 0 : index
    %c0_195 = arith.constant 0 : index
    %231 = vector.load %arg7[%c14_193, %c0_194, %c0_195] : memref<16x128x128xbf16, #tpu.memory_space<vmem>>, vector<1x128x128xbf16>
    %232 = vector.shape_cast %231 : vector<1x128x128xbf16> to vector<128x128xbf16>
    %cst_196 = arith.constant dense<0.000000e+00> : vector<32x128xf32>
    %233 = tpu.matmul %230, %232, %cst_196 {dimension_numbers = #tpu.dot_dimension_numbers<[1], [0], [0], [1], [0, 0, 1, 1], [], []>} : vector<32x128xbf16>, vector<128x128xbf16>, vector<32x128xf32> -> vector<32x128xf32>
    %234 = arith.addf %226, %233 : vector<32x128xf32>
    %c15 = arith.constant 15 : index
    %c0_197 = arith.constant 0 : index
    %c0_198 = arith.constant 0 : index
    %235 = vector.load %arg6[%c15, %c0_197, %c0_198] : memref<16x32x128xbf16, #tpu.memory_space<vmem>>, vector<1x32x128xbf16>
    %236 = vector.shape_cast %235 : vector<1x32x128xbf16> to vector<32x128xbf16>
    %cst_199 = arith.constant dense<0.000000e+00> : vector<32x128xf32>
    %237 = tpu.matmul %236, %113, %cst_199 {dimension_numbers = #tpu.dot_dimension_numbers<[1], [0], [0], [1], [0, 0, 1, 1], [], []>} : vector<32x128xbf16>, vector<128x128xbf16>, vector<32x128xf32> -> vector<32x128xf32>
    %238 = arith.truncf %237 : vector<32x128xf32> to vector<32x128xbf16>
    %c15_200 = arith.constant 15 : index
    %c0_201 = arith.constant 0 : index
    %c0_202 = arith.constant 0 : index
    %239 = vector.load %arg7[%c15_200, %c0_201, %c0_202] : memref<16x128x128xbf16, #tpu.memory_space<vmem>>, vector<1x128x128xbf16>
    %240 = vector.shape_cast %239 : vector<1x128x128xbf16> to vector<128x128xbf16>
    %cst_203 = arith.constant dense<0.000000e+00> : vector<32x128xf32>
    %241 = tpu.matmul %238, %240, %cst_203 {dimension_numbers = #tpu.dot_dimension_numbers<[1], [0], [0], [1], [0, 0, 1, 1], [], []>} : vector<32x128xbf16>, vector<128x128xbf16>, vector<32x128xf32> -> vector<32x128xf32>
    %242 = arith.addf %234, %241 : vector<32x128xf32>
    %cst_204 = arith.constant dense<0.000000e+00> : vector<128xf32>
    %243 = vector.multi_reduction <add>, %242, %cst_204 [0] : vector<32x128xf32> to vector<128xf32>
    %244 = vector.shape_cast %243 : vector<128xf32> to vector<1x128xf32>
    %cst_205 = arith.constant 3.200000e+01 : f32
    %245 = vector.broadcast %cst_205 : f32 to vector<1x128xf32>
    %246 = arith.divf %244, %245 : vector<1x128xf32>
    %247 = arith.mulf %242, %242 : vector<32x128xf32>
    %cst_206 = arith.constant dense<0.000000e+00> : vector<128xf32>
    %248 = vector.multi_reduction <add>, %247, %cst_206 [0] : vector<32x128xf32> to vector<128xf32>
    %249 = vector.shape_cast %248 : vector<128xf32> to vector<1x128xf32>
    %cst_207 = arith.constant 3.200000e+01 : f32
    %250 = vector.broadcast %cst_207 : f32 to vector<1x128xf32>
    %251 = arith.divf %249, %250 : vector<1x128xf32>
    %252 = arith.mulf %246, %246 : vector<1x128xf32>
    %253 = arith.subf %251, %252 : vector<1x128xf32>
    %cst_208 = arith.constant 0.000000e+00 : f32
    %254 = vector.broadcast %cst_208 : f32 to vector<1x128xf32>
    %255 = arith.maximumf %253, %254 : vector<1x128xf32>
    %256 = vector.broadcast %246 : vector<1x128xf32> to vector<32x128xf32>
    %257 = arith.subf %242, %256 : vector<32x128xf32>
    %cst_209 = arith.constant 9.99999974E-6 : f32
    %258 = vector.broadcast %cst_209 : f32 to vector<1x128xf32>
    %259 = arith.addf %255, %258 : vector<1x128xf32>
    %260 = math.rsqrt %259 : vector<1x128xf32>
    %261 = vector.broadcast %260 : vector<1x128xf32> to vector<32x128xf32>
    %262 = arith.mulf %257, %261 : vector<32x128xf32>
    %c0_210 = arith.constant 0 : index
    %c0_211 = arith.constant 0 : index
    %263 = vector.load %arg8[%c0_210, %c0_211] : memref<1x128xf32, #tpu.memory_space<vmem>>, vector<1x128xf32>
    %264 = vector.broadcast %263 : vector<1x128xf32> to vector<32x128xf32>
    %265 = arith.mulf %262, %264 : vector<32x128xf32>
    %c0_212 = arith.constant 0 : index
    %c0_213 = arith.constant 0 : index
    %266 = vector.load %arg9[%c0_212, %c0_213] : memref<1x128xf32, #tpu.memory_space<vmem>>, vector<1x128xf32>
    %267 = vector.broadcast %266 : vector<1x128xf32> to vector<32x128xf32>
    %268 = arith.addf %265, %267 : vector<32x128xf32>
    %cst_214 = arith.constant 0.000000e+00 : f32
    %269 = vector.broadcast %cst_214 : f32 to vector<32x128xf32>
    %270 = arith.cmpf ogt, %268, %269 : vector<32x128xf32>
    %cst_215 = arith.constant 2.000000e-01 : f32
    %271 = vector.broadcast %cst_215 : f32 to vector<32x128xf32>
    %272 = arith.mulf %271, %268 : vector<32x128xf32>
    %273 = arith.select %270, %268, %272 : vector<32x128xi1>, vector<32x128xf32>
    %274 = arith.truncf %273 : vector<32x128xf32> to vector<32x128xbf16>
    %c0_216 = arith.constant 0 : index
    %c0_217 = arith.constant 0 : index
    %275 = vector.load %arg12[%c0_216, %c0_217] : memref<32x128xf32, #tpu.memory_space<vmem>>, vector<32x128xf32>
    tpu.vector_store %arg12[%c0_216, %c0_217], %273 {strides = array<i32>} : memref<32x128xf32, #tpu.memory_space<vmem>>, vector<32x128xf32>,
    %cst_218 = arith.constant 0.000000e+00 : f32
    %276 = vector.broadcast %cst_218 : f32 to vector<8x128xf32>
    %c0_219 = arith.constant 0 : index
    %c0_220 = arith.constant 0 : index
    %c0_221 = arith.constant 0 : index
    %277 = vector.load %arg10[%c0_219, %c0_220, %c0_221] : memref<16x8x32xbf16, #tpu.memory_space<vmem>>, vector<1x8x32xbf16>
    %278 = vector.shape_cast %277 : vector<1x8x32xbf16> to vector<8x32xbf16>
    %cst_222 = arith.constant dense<0.000000e+00> : vector<8x128xf32>
    %279 = tpu.matmul %278, %274, %cst_222 {dimension_numbers = #tpu.dot_dimension_numbers<[1], [0], [0], [1], [0, 0, 1, 1], [], []>} : vector<8x32xbf16>, vector<32x128xbf16>, vector<8x128xf32> -> vector<8x128xf32>
    %280 = arith.truncf %279 : vector<8x128xf32> to vector<8x128xbf16>
    %c0_223 = arith.constant 0 : index
    %c0_224 = arith.constant 0 : index
    %c0_225 = arith.constant 0 : index
    %281 = vector.load %arg11[%c0_223, %c0_224, %c0_225] : memref<16x128x128xbf16, #tpu.memory_space<vmem>>, vector<1x128x128xbf16>
    %282 = vector.shape_cast %281 : vector<1x128x128xbf16> to vector<128x128xbf16>
    %cst_226 = arith.constant dense<0.000000e+00> : vector<8x128xf32>
    %283 = tpu.matmul %280, %282, %cst_226 {dimension_numbers = #tpu.dot_dimension_numbers<[1], [0], [0], [1], [0, 0, 1, 1], [], []>} : vector<8x128xbf16>, vector<128x128xbf16>, vector<8x128xf32> -> vector<8x128xf32>
    %284 = arith.addf %276, %283 : vector<8x128xf32>
    %c1_227 = arith.constant 1 : index
    %c0_228 = arith.constant 0 : index
    %c0_229 = arith.constant 0 : index
    %285 = vector.load %arg10[%c1_227, %c0_228, %c0_229] : memref<16x8x32xbf16, #tpu.memory_space<vmem>>, vector<1x8x32xbf16>
    %286 = vector.shape_cast %285 : vector<1x8x32xbf16> to vector<8x32xbf16>
    %cst_230 = arith.constant dense<0.000000e+00> : vector<8x128xf32>
    %287 = tpu.matmul %286, %274, %cst_230 {dimension_numbers = #tpu.dot_dimension_numbers<[1], [0], [0], [1], [0, 0, 1, 1], [], []>} : vector<8x32xbf16>, vector<32x128xbf16>, vector<8x128xf32> -> vector<8x128xf32>
    %288 = arith.truncf %287 : vector<8x128xf32> to vector<8x128xbf16>
    %c1_231 = arith.constant 1 : index
    %c0_232 = arith.constant 0 : index
    %c0_233 = arith.constant 0 : index
    %289 = vector.load %arg11[%c1_231, %c0_232, %c0_233] : memref<16x128x128xbf16, #tpu.memory_space<vmem>>, vector<1x128x128xbf16>
    %290 = vector.shape_cast %289 : vector<1x128x128xbf16> to vector<128x128xbf16>
    %cst_234 = arith.constant dense<0.000000e+00> : vector<8x128xf32>
    %291 = tpu.matmul %288, %290, %cst_234 {dimension_numbers = #tpu.dot_dimension_numbers<[1], [0], [0], [1], [0, 0, 1, 1], [], []>} : vector<8x128xbf16>, vector<128x128xbf16>, vector<8x128xf32> -> vector<8x128xf32>
    %292 = arith.addf %284, %291 : vector<8x128xf32>
    %c2_235 = arith.constant 2 : index
    %c0_236 = arith.constant 0 : index
    %c0_237 = arith.constant 0 : index
    %293 = vector.load %arg10[%c2_235, %c0_236, %c0_237] : memref<16x8x32xbf16, #tpu.memory_space<vmem>>, vector<1x8x32xbf16>
    %294 = vector.shape_cast %293 : vector<1x8x32xbf16> to vector<8x32xbf16>
    %cst_238 = arith.constant dense<0.000000e+00> : vector<8x128xf32>
    %295 = tpu.matmul %294, %274, %cst_238 {dimension_numbers = #tpu.dot_dimension_numbers<[1], [0], [0], [1], [0, 0, 1, 1], [], []>} : vector<8x32xbf16>, vector<32x128xbf16>, vector<8x128xf32> -> vector<8x128xf32>
    %296 = arith.truncf %295 : vector<8x128xf32> to vector<8x128xbf16>
    %c2_239 = arith.constant 2 : index
    %c0_240 = arith.constant 0 : index
    %c0_241 = arith.constant 0 : index
    %297 = vector.load %arg11[%c2_239, %c0_240, %c0_241] : memref<16x128x128xbf16, #tpu.memory_space<vmem>>, vector<1x128x128xbf16>
    %298 = vector.shape_cast %297 : vector<1x128x128xbf16> to vector<128x128xbf16>
    %cst_242 = arith.constant dense<0.000000e+00> : vector<8x128xf32>
    %299 = tpu.matmul %296, %298, %cst_242 {dimension_numbers = #tpu.dot_dimension_numbers<[1], [0], [0], [1], [0, 0, 1, 1], [], []>} : vector<8x128xbf16>, vector<128x128xbf16>, vector<8x128xf32> -> vector<8x128xf32>
    %300 = arith.addf %292, %299 : vector<8x128xf32>
    %c3_243 = arith.constant 3 : index
    %c0_244 = arith.constant 0 : index
    %c0_245 = arith.constant 0 : index
    %301 = vector.load %arg10[%c3_243, %c0_244, %c0_245] : memref<16x8x32xbf16, #tpu.memory_space<vmem>>, vector<1x8x32xbf16>
    %302 = vector.shape_cast %301 : vector<1x8x32xbf16> to vector<8x32xbf16>
    %cst_246 = arith.constant dense<0.000000e+00> : vector<8x128xf32>
    %303 = tpu.matmul %302, %274, %cst_246 {dimension_numbers = #tpu.dot_dimension_numbers<[1], [0], [0], [1], [0, 0, 1, 1], [], []>} : vector<8x32xbf16>, vector<32x128xbf16>, vector<8x128xf32> -> vector<8x128xf32>
    %304 = arith.truncf %303 : vector<8x128xf32> to vector<8x128xbf16>
    %c3_247 = arith.constant 3 : index
    %c0_248 = arith.constant 0 : index
    %c0_249 = arith.constant 0 : index
    %305 = vector.load %arg11[%c3_247, %c0_248, %c0_249] : memref<16x128x128xbf16, #tpu.memory_space<vmem>>, vector<1x128x128xbf16>
    %306 = vector.shape_cast %305 : vector<1x128x128xbf16> to vector<128x128xbf16>
    %cst_250 = arith.constant dense<0.000000e+00> : vector<8x128xf32>
    %307 = tpu.matmul %304, %306, %cst_250 {dimension_numbers = #tpu.dot_dimension_numbers<[1], [0], [0], [1], [0, 0, 1, 1], [], []>} : vector<8x128xbf16>, vector<128x128xbf16>, vector<8x128xf32> -> vector<8x128xf32>
    %308 = arith.addf %300, %307 : vector<8x128xf32>
    %c4_251 = arith.constant 4 : index
    %c0_252 = arith.constant 0 : index
    %c0_253 = arith.constant 0 : index
    %309 = vector.load %arg10[%c4_251, %c0_252, %c0_253] : memref<16x8x32xbf16, #tpu.memory_space<vmem>>, vector<1x8x32xbf16>
    %310 = vector.shape_cast %309 : vector<1x8x32xbf16> to vector<8x32xbf16>
    %cst_254 = arith.constant dense<0.000000e+00> : vector<8x128xf32>
    %311 = tpu.matmul %310, %274, %cst_254 {dimension_numbers = #tpu.dot_dimension_numbers<[1], [0], [0], [1], [0, 0, 1, 1], [], []>} : vector<8x32xbf16>, vector<32x128xbf16>, vector<8x128xf32> -> vector<8x128xf32>
    %312 = arith.truncf %311 : vector<8x128xf32> to vector<8x128xbf16>
    %c4_255 = arith.constant 4 : index
    %c0_256 = arith.constant 0 : index
    %c0_257 = arith.constant 0 : index
    %313 = vector.load %arg11[%c4_255, %c0_256, %c0_257] : memref<16x128x128xbf16, #tpu.memory_space<vmem>>, vector<1x128x128xbf16>
    %314 = vector.shape_cast %313 : vector<1x128x128xbf16> to vector<128x128xbf16>
    %cst_258 = arith.constant dense<0.000000e+00> : vector<8x128xf32>
    %315 = tpu.matmul %312, %314, %cst_258 {dimension_numbers = #tpu.dot_dimension_numbers<[1], [0], [0], [1], [0, 0, 1, 1], [], []>} : vector<8x128xbf16>, vector<128x128xbf16>, vector<8x128xf32> -> vector<8x128xf32>
    %316 = arith.addf %308, %315 : vector<8x128xf32>
    %c5_259 = arith.constant 5 : index
    %c0_260 = arith.constant 0 : index
    %c0_261 = arith.constant 0 : index
    %317 = vector.load %arg10[%c5_259, %c0_260, %c0_261] : memref<16x8x32xbf16, #tpu.memory_space<vmem>>, vector<1x8x32xbf16>
    %318 = vector.shape_cast %317 : vector<1x8x32xbf16> to vector<8x32xbf16>
    %cst_262 = arith.constant dense<0.000000e+00> : vector<8x128xf32>
    %319 = tpu.matmul %318, %274, %cst_262 {dimension_numbers = #tpu.dot_dimension_numbers<[1], [0], [0], [1], [0, 0, 1, 1], [], []>} : vector<8x32xbf16>, vector<32x128xbf16>, vector<8x128xf32> -> vector<8x128xf32>
    %320 = arith.truncf %319 : vector<8x128xf32> to vector<8x128xbf16>
    %c5_263 = arith.constant 5 : index
    %c0_264 = arith.constant 0 : index
    %c0_265 = arith.constant 0 : index
    %321 = vector.load %arg11[%c5_263, %c0_264, %c0_265] : memref<16x128x128xbf16, #tpu.memory_space<vmem>>, vector<1x128x128xbf16>
    %322 = vector.shape_cast %321 : vector<1x128x128xbf16> to vector<128x128xbf16>
    %cst_266 = arith.constant dense<0.000000e+00> : vector<8x128xf32>
    %323 = tpu.matmul %320, %322, %cst_266 {dimension_numbers = #tpu.dot_dimension_numbers<[1], [0], [0], [1], [0, 0, 1, 1], [], []>} : vector<8x128xbf16>, vector<128x128xbf16>, vector<8x128xf32> -> vector<8x128xf32>
    %324 = arith.addf %316, %323 : vector<8x128xf32>
    %c6_267 = arith.constant 6 : index
    %c0_268 = arith.constant 0 : index
    %c0_269 = arith.constant 0 : index
    %325 = vector.load %arg10[%c6_267, %c0_268, %c0_269] : memref<16x8x32xbf16, #tpu.memory_space<vmem>>, vector<1x8x32xbf16>
    %326 = vector.shape_cast %325 : vector<1x8x32xbf16> to vector<8x32xbf16>
    %cst_270 = arith.constant dense<0.000000e+00> : vector<8x128xf32>
    %327 = tpu.matmul %326, %274, %cst_270 {dimension_numbers = #tpu.dot_dimension_numbers<[1], [0], [0], [1], [0, 0, 1, 1], [], []>} : vector<8x32xbf16>, vector<32x128xbf16>, vector<8x128xf32> -> vector<8x128xf32>
    %328 = arith.truncf %327 : vector<8x128xf32> to vector<8x128xbf16>
    %c6_271 = arith.constant 6 : index
    %c0_272 = arith.constant 0 : index
    %c0_273 = arith.constant 0 : index
    %329 = vector.load %arg11[%c6_271, %c0_272, %c0_273] : memref<16x128x128xbf16, #tpu.memory_space<vmem>>, vector<1x128x128xbf16>
    %330 = vector.shape_cast %329 : vector<1x128x128xbf16> to vector<128x128xbf16>
    %cst_274 = arith.constant dense<0.000000e+00> : vector<8x128xf32>
    %331 = tpu.matmul %328, %330, %cst_274 {dimension_numbers = #tpu.dot_dimension_numbers<[1], [0], [0], [1], [0, 0, 1, 1], [], []>} : vector<8x128xbf16>, vector<128x128xbf16>, vector<8x128xf32> -> vector<8x128xf32>
    %332 = arith.addf %324, %331 : vector<8x128xf32>
    %c7_275 = arith.constant 7 : index
    %c0_276 = arith.constant 0 : index
    %c0_277 = arith.constant 0 : index
    %333 = vector.load %arg10[%c7_275, %c0_276, %c0_277] : memref<16x8x32xbf16, #tpu.memory_space<vmem>>, vector<1x8x32xbf16>
    %334 = vector.shape_cast %333 : vector<1x8x32xbf16> to vector<8x32xbf16>
    %cst_278 = arith.constant dense<0.000000e+00> : vector<8x128xf32>
    %335 = tpu.matmul %334, %274, %cst_278 {dimension_numbers = #tpu.dot_dimension_numbers<[1], [0], [0], [1], [0, 0, 1, 1], [], []>} : vector<8x32xbf16>, vector<32x128xbf16>, vector<8x128xf32> -> vector<8x128xf32>
    %336 = arith.truncf %335 : vector<8x128xf32> to vector<8x128xbf16>
    %c7_279 = arith.constant 7 : index
    %c0_280 = arith.constant 0 : index
    %c0_281 = arith.constant 0 : index
    %337 = vector.load %arg11[%c7_279, %c0_280, %c0_281] : memref<16x128x128xbf16, #tpu.memory_space<vmem>>, vector<1x128x128xbf16>
    %338 = vector.shape_cast %337 : vector<1x128x128xbf16> to vector<128x128xbf16>
    %cst_282 = arith.constant dense<0.000000e+00> : vector<8x128xf32>
    %339 = tpu.matmul %336, %338, %cst_282 {dimension_numbers = #tpu.dot_dimension_numbers<[1], [0], [0], [1], [0, 0, 1, 1], [], []>} : vector<8x128xbf16>, vector<128x128xbf16>, vector<8x128xf32> -> vector<8x128xf32>
    %340 = arith.addf %332, %339 : vector<8x128xf32>
    %c8_283 = arith.constant 8 : index
    %c0_284 = arith.constant 0 : index
    %c0_285 = arith.constant 0 : index
    %341 = vector.load %arg10[%c8_283, %c0_284, %c0_285] : memref<16x8x32xbf16, #tpu.memory_space<vmem>>, vector<1x8x32xbf16>
    %342 = vector.shape_cast %341 : vector<1x8x32xbf16> to vector<8x32xbf16>
    %cst_286 = arith.constant dense<0.000000e+00> : vector<8x128xf32>
    %343 = tpu.matmul %342, %274, %cst_286 {dimension_numbers = #tpu.dot_dimension_numbers<[1], [0], [0], [1], [0, 0, 1, 1], [], []>} : vector<8x32xbf16>, vector<32x128xbf16>, vector<8x128xf32> -> vector<8x128xf32>
    %344 = arith.truncf %343 : vector<8x128xf32> to vector<8x128xbf16>
    %c8_287 = arith.constant 8 : index
    %c0_288 = arith.constant 0 : index
    %c0_289 = arith.constant 0 : index
    %345 = vector.load %arg11[%c8_287, %c0_288, %c0_289] : memref<16x128x128xbf16, #tpu.memory_space<vmem>>, vector<1x128x128xbf16>
    %346 = vector.shape_cast %345 : vector<1x128x128xbf16> to vector<128x128xbf16>
    %cst_290 = arith.constant dense<0.000000e+00> : vector<8x128xf32>
    %347 = tpu.matmul %344, %346, %cst_290 {dimension_numbers = #tpu.dot_dimension_numbers<[1], [0], [0], [1], [0, 0, 1, 1], [], []>} : vector<8x128xbf16>, vector<128x128xbf16>, vector<8x128xf32> -> vector<8x128xf32>
    %348 = arith.addf %340, %347 : vector<8x128xf32>
    %c9_291 = arith.constant 9 : index
    %c0_292 = arith.constant 0 : index
    %c0_293 = arith.constant 0 : index
    %349 = vector.load %arg10[%c9_291, %c0_292, %c0_293] : memref<16x8x32xbf16, #tpu.memory_space<vmem>>, vector<1x8x32xbf16>
    %350 = vector.shape_cast %349 : vector<1x8x32xbf16> to vector<8x32xbf16>
    %cst_294 = arith.constant dense<0.000000e+00> : vector<8x128xf32>
    %351 = tpu.matmul %350, %274, %cst_294 {dimension_numbers = #tpu.dot_dimension_numbers<[1], [0], [0], [1], [0, 0, 1, 1], [], []>} : vector<8x32xbf16>, vector<32x128xbf16>, vector<8x128xf32> -> vector<8x128xf32>
    %352 = arith.truncf %351 : vector<8x128xf32> to vector<8x128xbf16>
    %c9_295 = arith.constant 9 : index
    %c0_296 = arith.constant 0 : index
    %c0_297 = arith.constant 0 : index
    %353 = vector.load %arg11[%c9_295, %c0_296, %c0_297] : memref<16x128x128xbf16, #tpu.memory_space<vmem>>, vector<1x128x128xbf16>
    %354 = vector.shape_cast %353 : vector<1x128x128xbf16> to vector<128x128xbf16>
    %cst_298 = arith.constant dense<0.000000e+00> : vector<8x128xf32>
    %355 = tpu.matmul %352, %354, %cst_298 {dimension_numbers = #tpu.dot_dimension_numbers<[1], [0], [0], [1], [0, 0, 1, 1], [], []>} : vector<8x128xbf16>, vector<128x128xbf16>, vector<8x128xf32> -> vector<8x128xf32>
    %356 = arith.addf %348, %355 : vector<8x128xf32>
    %c10_299 = arith.constant 10 : index
    %c0_300 = arith.constant 0 : index
    %c0_301 = arith.constant 0 : index
    %357 = vector.load %arg10[%c10_299, %c0_300, %c0_301] : memref<16x8x32xbf16, #tpu.memory_space<vmem>>, vector<1x8x32xbf16>
    %358 = vector.shape_cast %357 : vector<1x8x32xbf16> to vector<8x32xbf16>
    %cst_302 = arith.constant dense<0.000000e+00> : vector<8x128xf32>
    %359 = tpu.matmul %358, %274, %cst_302 {dimension_numbers = #tpu.dot_dimension_numbers<[1], [0], [0], [1], [0, 0, 1, 1], [], []>} : vector<8x32xbf16>, vector<32x128xbf16>, vector<8x128xf32> -> vector<8x128xf32>
    %360 = arith.truncf %359 : vector<8x128xf32> to vector<8x128xbf16>
    %c10_303 = arith.constant 10 : index
    %c0_304 = arith.constant 0 : index
    %c0_305 = arith.constant 0 : index
    %361 = vector.load %arg11[%c10_303, %c0_304, %c0_305] : memref<16x128x128xbf16, #tpu.memory_space<vmem>>, vector<1x128x128xbf16>
    %362 = vector.shape_cast %361 : vector<1x128x128xbf16> to vector<128x128xbf16>
    %cst_306 = arith.constant dense<0.000000e+00> : vector<8x128xf32>
    %363 = tpu.matmul %360, %362, %cst_306 {dimension_numbers = #tpu.dot_dimension_numbers<[1], [0], [0], [1], [0, 0, 1, 1], [], []>} : vector<8x128xbf16>, vector<128x128xbf16>, vector<8x128xf32> -> vector<8x128xf32>
    %364 = arith.addf %356, %363 : vector<8x128xf32>
    %c11_307 = arith.constant 11 : index
    %c0_308 = arith.constant 0 : index
    %c0_309 = arith.constant 0 : index
    %365 = vector.load %arg10[%c11_307, %c0_308, %c0_309] : memref<16x8x32xbf16, #tpu.memory_space<vmem>>, vector<1x8x32xbf16>
    %366 = vector.shape_cast %365 : vector<1x8x32xbf16> to vector<8x32xbf16>
    %cst_310 = arith.constant dense<0.000000e+00> : vector<8x128xf32>
    %367 = tpu.matmul %366, %274, %cst_310 {dimension_numbers = #tpu.dot_dimension_numbers<[1], [0], [0], [1], [0, 0, 1, 1], [], []>} : vector<8x32xbf16>, vector<32x128xbf16>, vector<8x128xf32> -> vector<8x128xf32>
    %368 = arith.truncf %367 : vector<8x128xf32> to vector<8x128xbf16>
    %c11_311 = arith.constant 11 : index
    %c0_312 = arith.constant 0 : index
    %c0_313 = arith.constant 0 : index
    %369 = vector.load %arg11[%c11_311, %c0_312, %c0_313] : memref<16x128x128xbf16, #tpu.memory_space<vmem>>, vector<1x128x128xbf16>
    %370 = vector.shape_cast %369 : vector<1x128x128xbf16> to vector<128x128xbf16>
    %cst_314 = arith.constant dense<0.000000e+00> : vector<8x128xf32>
    %371 = tpu.matmul %368, %370, %cst_314 {dimension_numbers = #tpu.dot_dimension_numbers<[1], [0], [0], [1], [0, 0, 1, 1], [], []>} : vector<8x128xbf16>, vector<128x128xbf16>, vector<8x128xf32> -> vector<8x128xf32>
    %372 = arith.addf %364, %371 : vector<8x128xf32>
    %c12_315 = arith.constant 12 : index
    %c0_316 = arith.constant 0 : index
    %c0_317 = arith.constant 0 : index
    %373 = vector.load %arg10[%c12_315, %c0_316, %c0_317] : memref<16x8x32xbf16, #tpu.memory_space<vmem>>, vector<1x8x32xbf16>
    %374 = vector.shape_cast %373 : vector<1x8x32xbf16> to vector<8x32xbf16>
    %cst_318 = arith.constant dense<0.000000e+00> : vector<8x128xf32>
    %375 = tpu.matmul %374, %274, %cst_318 {dimension_numbers = #tpu.dot_dimension_numbers<[1], [0], [0], [1], [0, 0, 1, 1], [], []>} : vector<8x32xbf16>, vector<32x128xbf16>, vector<8x128xf32> -> vector<8x128xf32>
    %376 = arith.truncf %375 : vector<8x128xf32> to vector<8x128xbf16>
    %c12_319 = arith.constant 12 : index
    %c0_320 = arith.constant 0 : index
    %c0_321 = arith.constant 0 : index
    %377 = vector.load %arg11[%c12_319, %c0_320, %c0_321] : memref<16x128x128xbf16, #tpu.memory_space<vmem>>, vector<1x128x128xbf16>
    %378 = vector.shape_cast %377 : vector<1x128x128xbf16> to vector<128x128xbf16>
    %cst_322 = arith.constant dense<0.000000e+00> : vector<8x128xf32>
    %379 = tpu.matmul %376, %378, %cst_322 {dimension_numbers = #tpu.dot_dimension_numbers<[1], [0], [0], [1], [0, 0, 1, 1], [], []>} : vector<8x128xbf16>, vector<128x128xbf16>, vector<8x128xf32> -> vector<8x128xf32>
    %380 = arith.addf %372, %379 : vector<8x128xf32>
    %c13_323 = arith.constant 13 : index
    %c0_324 = arith.constant 0 : index
    %c0_325 = arith.constant 0 : index
    %381 = vector.load %arg10[%c13_323, %c0_324, %c0_325] : memref<16x8x32xbf16, #tpu.memory_space<vmem>>, vector<1x8x32xbf16>
    %382 = vector.shape_cast %381 : vector<1x8x32xbf16> to vector<8x32xbf16>
    %cst_326 = arith.constant dense<0.000000e+00> : vector<8x128xf32>
    %383 = tpu.matmul %382, %274, %cst_326 {dimension_numbers = #tpu.dot_dimension_numbers<[1], [0], [0], [1], [0, 0, 1, 1], [], []>} : vector<8x32xbf16>, vector<32x128xbf16>, vector<8x128xf32> -> vector<8x128xf32>
    %384 = arith.truncf %383 : vector<8x128xf32> to vector<8x128xbf16>
    %c13_327 = arith.constant 13 : index
    %c0_328 = arith.constant 0 : index
    %c0_329 = arith.constant 0 : index
    %385 = vector.load %arg11[%c13_327, %c0_328, %c0_329] : memref<16x128x128xbf16, #tpu.memory_space<vmem>>, vector<1x128x128xbf16>
    %386 = vector.shape_cast %385 : vector<1x128x128xbf16> to vector<128x128xbf16>
    %cst_330 = arith.constant dense<0.000000e+00> : vector<8x128xf32>
    %387 = tpu.matmul %384, %386, %cst_330 {dimension_numbers = #tpu.dot_dimension_numbers<[1], [0], [0], [1], [0, 0, 1, 1], [], []>} : vector<8x128xbf16>, vector<128x128xbf16>, vector<8x128xf32> -> vector<8x128xf32>
    %388 = arith.addf %380, %387 : vector<8x128xf32>
    %c14_331 = arith.constant 14 : index
    %c0_332 = arith.constant 0 : index
    %c0_333 = arith.constant 0 : index
    %389 = vector.load %arg10[%c14_331, %c0_332, %c0_333] : memref<16x8x32xbf16, #tpu.memory_space<vmem>>, vector<1x8x32xbf16>
    %390 = vector.shape_cast %389 : vector<1x8x32xbf16> to vector<8x32xbf16>
    %cst_334 = arith.constant dense<0.000000e+00> : vector<8x128xf32>
    %391 = tpu.matmul %390, %274, %cst_334 {dimension_numbers = #tpu.dot_dimension_numbers<[1], [0], [0], [1], [0, 0, 1, 1], [], []>} : vector<8x32xbf16>, vector<32x128xbf16>, vector<8x128xf32> -> vector<8x128xf32>
    %392 = arith.truncf %391 : vector<8x128xf32> to vector<8x128xbf16>
    %c14_335 = arith.constant 14 : index
    %c0_336 = arith.constant 0 : index
    %c0_337 = arith.constant 0 : index
    %393 = vector.load %arg11[%c14_335, %c0_336, %c0_337] : memref<16x128x128xbf16, #tpu.memory_space<vmem>>, vector<1x128x128xbf16>
    %394 = vector.shape_cast %393 : vector<1x128x128xbf16> to vector<128x128xbf16>
    %cst_338 = arith.constant dense<0.000000e+00> : vector<8x128xf32>
    %395 = tpu.matmul %392, %394, %cst_338 {dimension_numbers = #tpu.dot_dimension_numbers<[1], [0], [0], [1], [0, 0, 1, 1], [], []>} : vector<8x128xbf16>, vector<128x128xbf16>, vector<8x128xf32> -> vector<8x128xf32>
    %396 = arith.addf %388, %395 : vector<8x128xf32>
    %c15_339 = arith.constant 15 : index
    %c0_340 = arith.constant 0 : index
    %c0_341 = arith.constant 0 : index
    %397 = vector.load %arg10[%c15_339, %c0_340, %c0_341] : memref<16x8x32xbf16, #tpu.memory_space<vmem>>, vector<1x8x32xbf16>
    %398 = vector.shape_cast %397 : vector<1x8x32xbf16> to vector<8x32xbf16>
    %cst_342 = arith.constant dense<0.000000e+00> : vector<8x128xf32>
    %399 = tpu.matmul %398, %274, %cst_342 {dimension_numbers = #tpu.dot_dimension_numbers<[1], [0], [0], [1], [0, 0, 1, 1], [], []>} : vector<8x32xbf16>, vector<32x128xbf16>, vector<8x128xf32> -> vector<8x128xf32>
    %400 = arith.truncf %399 : vector<8x128xf32> to vector<8x128xbf16>
    %c15_343 = arith.constant 15 : index
    %c0_344 = arith.constant 0 : index
    %c0_345 = arith.constant 0 : index
    %401 = vector.load %arg11[%c15_343, %c0_344, %c0_345] : memref<16x128x128xbf16, #tpu.memory_space<vmem>>, vector<1x128x128xbf16>
    %402 = vector.shape_cast %401 : vector<1x128x128xbf16> to vector<128x128xbf16>
    %cst_346 = arith.constant dense<0.000000e+00> : vector<8x128xf32>
    %403 = tpu.matmul %400, %402, %cst_346 {dimension_numbers = #tpu.dot_dimension_numbers<[1], [0], [0], [1], [0, 0, 1, 1], [], []>} : vector<8x128xbf16>, vector<128x128xbf16>, vector<8x128xf32> -> vector<8x128xf32>
    %404 = arith.addf %396, %403 : vector<8x128xf32>
    %cst_347 = arith.constant 0.000000e+00 : f32
    %405 = vector.broadcast %cst_347 : f32 to vector<8x128xf32>
    %406 = arith.subf %405, %404 : vector<8x128xf32>
    %407 = math.exp %406 : vector<8x128xf32>
    %cst_348 = arith.constant 1.000000e+00 : f32
    %408 = vector.broadcast %cst_348 : f32 to vector<8x128xf32>
    %409 = arith.addf %408, %407 : vector<8x128xf32>
    %410 = tpu.reciprocal %409 {approx = true} : vector<8x128xf32> -> vector<8x128xf32>
    %c0_349 = arith.constant 0 : index
    %c0_350 = arith.constant 0 : index
    %411 = vector.load %arg13[%c0_349, %c0_350] : memref<8x128xf32, #tpu.memory_space<vmem>>, vector<8x128xf32>
    tpu.vector_store %arg13[%c0_349, %c0_350], %410 {strides = array<i32>} : memref<8x128xf32, #tpu.memory_space<vmem>>, vector<8x128xf32>,
    return
  }
}

</mosaic_0001>

<bundles_post_ra>
// kernel: _lambda_.1
= control target key start
LH: loop header
LB: loop body
LE: loop exit
PB: predicated region body
PF: predicated region fallthrough
CT: control target
= control target key end

     0   :  { %19 = vsyncpa [#allocation3], 0  ;;  %s15730_s0 = inlined_call_operand.vmem [shape: bf16[128,128], index: 0, kind: input, shape index: {}]   ;;  %s15731_s1 = inlined_call_operand.vmem [shape: bf16[128,128], index: 1, kind: input, shape index: {}]   ;;  %s15732_s2 = inlined_call_operand.vmem [shape: bf16[9,128,128], index: 2, kind: input, shape index: {}]   ;;  %s15733_s3 = inlined_call_operand.hbm [shape: bf16[9,128,128], index: 3, kind: input, shape index: {}]   ;;  %s15734_s4 = inlined_call_operand.vmem [shape: f32[1,128], index: 4, kind: input, shape index: {}]   ;;  %s15735_s5 = inlined_call_operand.vmem [shape: f32[1,128], index: 5, kind: input, shape index: {}, may-alias: {5,9}]   ;;  %s15736_s6 = inlined_call_operand.vmem [shape: bf16[16,32,128], index: 6, kind: input, shape index: {}]   ;;  %s15737_s7 = inlined_call_operand.vmem [shape: bf16[16,128,128], index: 7, kind: input, shape index: {}]   ;;  %s15738_s8 = inlined_call_operand.vmem [shape: f32[1,128], index: 8, kind: input, shape index: {}]   ;;  %s15739_s9 = inlined_call_operand.vmem [shape: f32[1,128], index: 9, kind: input, shape index: {}, may-alias: {5,9}]   ;;  %s15740_s10 = inlined_call_operand.vmem [shape: bf16[16,8,32], index: 10, kind: input, shape index: {}]   ;;  %s15741_s11 = inlined_call_operand.vmem [shape: bf16[16,128,128], index: 11, kind: input, shape index: {}]   ;;  %s15742_s12 = inlined_call_operand.hbm [shape: f32[32,128], index: 12, kind: output, shape index: {0}]   ;;  %s15743_s13 = inlined_call_operand.vmem [shape: f32[8,128], index: 13, kind: output, shape index: {1}]  }
   0x1   :  { %20 = vsyncpa [#allocation4], 0  ;;  %s13309_s25 = smov [#allocation2]  }
   0x2   :  { %s32_s26 = sshll.u32 %s13309_s25, 4  ;;  %s33_s26 = int_to_ptr.vmem [resolvable:$true] %s32_s26 }
   0x3   :  { %s13273_s27 = scalar_lea.vmem %s33_s26, 9216  ;;  %p13278_p1 = scmp.lt.s32.totalorder %s33_s26, %s33_s26 }
   0x4   :  { %p13274_p0 = scmp.ne.s32.totalorder %s33_s26, %s13273_s27  ;;  %p13279_p2 = scmp.lt.s32.totalorder %s13273_s27, %s13273_s27 }
   0x6   :  { %p13280_p3 = por %p13279_p2, %p13278_p1 }
   0x8   :  { %p13281_p4 = pnand %p13280_p3, %p13274_p0 }
   0xa   :  { %13284 = shalt.err (!%p13281_p4)
}
   0xb   :  { %s13310_s28 = smov 64   ;;  %s13311_s29 = smov 4  }
   0xc   :  { %38 = dma.hbm_to_vmem [thread:$0]  %s15733_s3, 9216, %s33_s26, [#allocation3], %s13310_s28, %s13310_s28, %s13311_s29  }
   0xd   :  { %13305 = dma.done.wait [#allocation3], 9216  }
   0xe   :  { %13306 = vsyncadd [#allocation3], 4294958080  ;;  %v12809_v0 = vld [vmem:[%s15731_s1 + $0x38] sm:$0xff]   ;;  %v12810_v1 = vld [vmem:[%s15731_s1 + $0x30] sm:$0xff]   ;;  %s13314_s23 = smov [#allocation5]  }
   0xf   :  { %11105 = vmatprep.subr.bf16.mxu0 %v12809_v0  ;;  %v12811_v2 = vld [vmem:[%s15731_s1 + $0x28] sm:$0xff]   ;;  %v12812_v3 = vld [vmem:[%s15731_s1 + $0x20] sm:$0xff]   ;;  %v12813_v5 = vld [vmem:[%s15731_s1 + $0x18] sm:$0xff]   ;;  %s9122_s24 = sshll.u32 %s13314_s23, 4  ;;  %s9123_s24 = int_to_ptr.vmem [resolvable:$true] %s9122_s24 }
  0x10   :  { %11106 = vmatpush3.bf16.msra.mxu0 %v12809_v0  ;;  %v12817_v4 = vld [vmem:[%s15730_s0] sm:$0xff]   ;;  %v12814_v6 = vld [vmem:[%s15731_s1 + $0x10] sm:$0xff]   ;;  %v12815_v7 = vld [vmem:[%s15731_s1 + $0x8] sm:$0xff]   ;;  %p13290_p6 = scmp.lt.s32.totalorder %s9123_s24, %s9123_s24 }
  0x11   :  { %11107 = vmatprep.subr.bf16.mxu0 %v12810_v1  ;;  %11121 = vmatprep.mubr.bf16.mxu0 %v12817_v4  ;;  %v12816_v8 = vld [vmem:[%s15731_s1] sm:$0xff]   ;;  %v12818_v9 = vld [vmem:[%s15730_s0 + $0x8] sm:$0xff]   ;;  %v12819_v10 = vld [vmem:[%s15730_s0 + $0x10] sm:$0xff]  }
  0x12   :  { %v12820_v11 = vld [vmem:[%s15730_s0 + $0x18] sm:$0xff]   ;;  %v12821_v12 = vld [vmem:[%s15730_s0 + $0x20] sm:$0xff]   ;;  %v12822_v13 = vld [vmem:[%s15730_s0 + $0x28] sm:$0xff]  }
  0x13   :  { %v12823_v14 = vld [vmem:[%s15730_s0 + $0x30] sm:$0xff]   ;;  %v12824_v15 = vld [vmem:[%s15730_s0 + $0x38] sm:$0xff]   ;;  %v12825_v16 = vld [vmem:[%s15732_s2] sm:$0xff]  }
  0x14   :  { %11108 = vmatpush3.bf16.msra.mxu0 %v12810_v1  ;;  %v12826_v17 = vld [vmem:[%s15732_s2 + $0x40] sm:$0xff]   ;;  %11153 = vmatprep.mubr.bf16.mxu1 %v12825_v16  ;;  %v12832_v16 = vld [vmem:[%s15732_s2 + $0x50] sm:$0xff]  }
  0x15   :  { %11109 = vmatprep.subr.bf16.mxu0 %v12811_v2 }
  0x18   :  { %11110 = vmatpush3.bf16.msra.mxu0 %v12811_v2 }
  0x19   :  { %11111 = vmatprep.subr.bf16.mxu0 %v12812_v3 }
  0x1c   :  { %11112 = vmatpush3.bf16.msra.mxu0 %v12812_v3 }
  0x1d   :  { %11113 = vmatprep.subr.bf16.mxu0 %v12813_v5 }
  0x20   :  { %11114 = vmatpush3.bf16.msra.mxu0 %v12813_v5 }
  0x21   :  { %11115 = vmatprep.subr.bf16.mxu0 %v12814_v6 }
  0x24   :  { %11116 = vmatpush3.bf16.msra.mxu0 %v12814_v6 }
  0x25   :  { %11117 = vmatprep.subr.bf16.mxu0 %v12815_v7 }
  0x28   :  { %11118 = vmatpush3.bf16.msra.mxu0 %v12815_v7 }
  0x29   :  { %11119 = vmatprep.subr.bf16.mxu0 %v12816_v8 }
  0x2c   :  { %11120 = vmatpush3.bf16.msra.mxu0 %v12816_v8 }
  0x2f   :  { %11122 = vmatmul.mubr.bf16.vlgmr.msra.gmra.mxu0 %v12818_v9 }
  0x30   :  { %11125 = vmatprep.mubr.bf16.mxu0 %v12819_v10  ;;  %v12829_v10 = vld [vmem:[#allocation2 + $0x78] sm:$0xff]  }
  0x37   :  { %11126 = vmatmul.mubr.bf16.gmra.mxu0 %v12820_v11  ;;  %v12849_v11 = vld [vmem:[#allocation2 + $0x38] sm:$0xff]  }
  0x38   :  { %11129 = vmatprep.mubr.bf16.mxu0 %v12821_v12  ;;  %v12827_v12 = vld [vmem:[%s15732_s2 + $0x8] sm:$0xff]  }
  0x3f   :  { %11130 = vmatmul.mubr.bf16.gmra.mxu0 %v12822_v13  ;;  %v12828_v13 = vld [vmem:[%s15732_s2 + $0x48] sm:$0xff]  }
  0x40   :  { %11133 = vmatprep.mubr.bf16.mxu0 %v12823_v14  ;;  %v12831_v14 = vld [vmem:[%s15732_s2 + $0x10] sm:$0xff]  }
  0x47   :  { %11134 = vmatmul.mubr.bf16.gmra.mxu0 %v12824_v15  ;;  %v12830_v15 = vld [vmem:[#allocation2 + $0x70] sm:$0xff]  }
  0x48   :  { %11185 = vmatprep.mubr.bf16.mxu0 %v12826_v17  ;;  %v12850_v17 = vld [vmem:[#allocation2 + $0x30] sm:$0xff]  }
  0xef   :  { %v13444_v18 = vpop.f32.mrf.mxu0 }
  0xf0   :  { %v13459_v25 = vmul.f32 0.2, %v13444_v18  ;;  %vm286_vm13 = vcmp.gt.f32.partialorder %v13444_v18, 0.0 }
  0xf1   :  { %v13446_v19 = vpop.f32.mrf.mxu0 }
  0xf2   :  { %v13464_v27 = vmul.f32 0.2, %v13446_v19  ;;  %vm284_vm15 = vcmp.gt.f32.partialorder %v13446_v19, 0.0  ;;  %v318_v5 = vsel %vm286_vm13, %v13444_v18, %v13459_v25  ;;  %v12835_v18 = vld [vmem:[#allocation2 + $0x68] sm:$0xff]   ;;  %v12852_v25 = vld [vmem:[#allocation2 + $0x20] sm:$0xff]  }
  0xf3   :  { %v13448_v20 = vpop.f32.mrf.mxu0 }
  0xf4   :  { %v13467_v28 = vmul.f32 0.2, %v13448_v20  ;;  %vm287_vm12 = vcmp.gt.f32.partialorder %v13448_v20, 0.0  ;;  %v316_v8 = vsel %vm284_vm15, %v13446_v19, %v13464_v27  ;;  %v12833_v19 = vld [vmem:[%s15732_s2 + $0x18] sm:$0xff]   ;;  %v12839_v27 = vld [vmem:[%s15732_s2 + $0x28] sm:$0xff]  }
  0xf5   :  { %v13450_v21 = vpop.f32.mrf.mxu0 }
  0xf6   :  { %v13470_v30 = vmul.f32 0.2, %v13450_v21  ;;  %vm285_vm14 = vcmp.gt.f32.partialorder %v13450_v21, 0.0  ;;  %v319_v4 = vsel %vm287_vm12, %v13448_v20, %v13467_v28  ;;  %v12834_v20 = vld [vmem:[%s15732_s2 + $0x58] sm:$0xff]   ;;  %v12840_v28 = vld [vmem:[%s15732_s2 + $0x68] sm:$0xff]  }
  0xf7   :  { %v13452_v22 = vpop.f32.mrf.mxu0  ;;  %v13545_v6 = vpack.c.bf16 %v319_v4, %v318_v5 }
  0xf8   :  { %v306_v31 = vmul.f32 0.2, %v13452_v22  ;;  %vm290_vm9 = vcmp.gt.f32.partialorder %v13452_v22, 0.0  ;;  %v317_v7 = vsel %vm285_vm14, %v13450_v21, %v13470_v30  ;;  %v12837_v21 = vld [vmem:[%s15732_s2 + $0x20] sm:$0xff]   ;;  %v12842_v30 = vld [vmem:[#allocation2 + $0x50] sm:$0xff]  }
  0xf9   :  { %v13454_v23 = vpop.f32.mrf.mxu0  ;;  %v13559_v9 = vpack.c.bf16 %v317_v7, %v316_v8 }
  0xfa   :  { %v13474_v33 = vmul.f32 0.2, %v13454_v23  ;;  %vm288_vm11 = vcmp.gt.f32.partialorder %v13454_v23, 0.0  ;;  %v322_v63 = vsel %vm290_vm9, %v13452_v22, %v306_v31  ;;  %v12836_v22 = vld [vmem:[#allocation2 + $0x60] sm:$0xff]   ;;  %v12844_v31 = vld [vmem:[%s15732_s2 + $0x70] sm:$0xff]  }
  0xfb   :  { %v13456_v24 = vpop.f32.mrf.mxu0 }
  0xfc   :  { %v307_v34 = vmul.f32 0.2, %v13456_v24  ;;  %vm291_vm8 = vcmp.gt.f32.partialorder %v13456_v24, 0.0  ;;  %v320_v2 = vsel %vm288_vm11, %v13454_v23, %v13474_v33  ;;  %v12838_v23 = vld [vmem:[%s15732_s2 + $0x60] sm:$0xff]   ;;  %v12847_v33 = vld [vmem:[#allocation2 + $0x48] sm:$0xff]  }
  0xfd   :  { %v13461_v26 = vpop.f32.mrf.mxu0 }
  0xfe   :  { %v305_v36 = vmul.f32 0.2, %v13461_v26  ;;  %vm289_vm10 = vcmp.gt.f32.partialorder %v13461_v26, 0.0  ;;  %v323_v62 = vsel %vm291_vm8, %v13456_v24, %v307_v34  ;;  %v12851_v24 = vld [vmem:[#allocation2 + $0x28] sm:$0xff]   ;;  %v12845_v34 = vld [vmem:[%s15732_s2 + $0x38] sm:$0xff]  }
  0xff   :  { %v11131_v29 = vpop.f32.mrf.mxu0  ;;  %v13518_v0 = vpack.c.bf16 %v323_v62, %v322_v63 }
 0x100   :  { %v310_v37 = vmul.f32 0.2, %v11131_v29  ;;  %vm294_vm2 = vcmp.gt.f32.partialorder %v11131_v29, 0.0  ;;  %v321_v1 = vsel %vm289_vm10, %v13461_v26, %v305_v36  ;;  %v12841_v26 = vld [vmem:[#allocation2 + $0x58] sm:$0xff]   ;;  %v12854_v36 = vld [vmem:[#allocation2 + $0x10] sm:$0xff]  }
 0x101   :  { %v253_v32 = vpop.f32.mrf.mxu0  ;;  %v13531_v3 = vpack.c.bf16 %v321_v1, %v320_v2 }
 0x102   :  { %v308_v39 = vmul.f32 0.2, %v253_v32  ;;  %vm292_vm6 = vcmp.gt.f32.partialorder %v253_v32, 0.0  ;;  %v326_v57 = vsel %vm294_vm2, %v11131_v29, %v310_v37  ;;  %v12843_v29 = vld [vmem:[%s15732_s2 + $0x30] sm:$0xff]   ;;  %v12848_v37 = vld [vmem:[#allocation2 + $0x40] sm:$0xff]  }
 0x103   :  { %v11132_v35 = vpop.f32.mrf.mxu0 }
 0x104   :  { %v311_v40 = vmul.f32 0.2, %v11132_v35  ;;  %vm295_vm0 = vcmp.gt.f32.partialorder %v11132_v35, 0.0  ;;  %v324_v60 = vsel %vm292_vm6, %v253_v32, %v308_v39  ;;  %v12853_v32 = vld [vmem:[#allocation2 + $0x18] sm:$0xff]   ;;  %v12856_v39 = vld [vmem:[#allocation2] sm:$0xff]  }
 0x105   :  { %v256_v38 = vpop.f32.mrf.mxu0 }
 0x106   :  { %v309_v42 = vmul.f32 0.2, %v256_v38  ;;  %vm293_vm3 = vcmp.gt.f32.partialorder %v256_v38, 0.0  ;;  %v327_v56 = vsel %vm295_vm0, %v11132_v35, %v311_v40  ;;  %v12846_v35 = vld [vmem:[%s15732_s2 + $0x78] sm:$0xff]  }
 0x107   :  { %v11135_v41 = vpop.f32.mrf.mxu0  ;;  %v13494_v58 = vpack.c.bf16 %v327_v56, %v326_v57 }
 0x108   :  { %vm298_vm1 = vcmp.gt.f32.partialorder %v11135_v41, 0.0  ;;  %v314_v44 = vmul.f32 0.2, %v11135_v41  ;;  %v325_v59 = vsel %vm293_vm3, %v256_v38, %v309_v42  ;;  %v12855_v38 = vld [vmem:[#allocation2 + $0x8] sm:$0xff]  }
 0x109   :  { %v269_v43 = vpop.f32.mrf.mxu0  ;;  %v13504_v61 = vpack.c.bf16 %v325_v59, %v324_v60 }
 0x10a   :  { %v312_v45 = vmul.f32 0.2, %v269_v43  ;;  %vm296_vm4 = vcmp.gt.f32.partialorder %v269_v43, 0.0  ;;  %v330_v49 = vsel %vm298_vm1, %v11135_v41, %v314_v44 }
 0x10b   :  { %v11136_v46 = vpop.f32.mrf.mxu0 }
 0x10c   :  { %vm299_vm5 = vcmp.gt.f32.partialorder %v11136_v46, 0.0  ;;  %v315_v47 = vmul.f32 0.2, %v11136_v46  ;;  %v328_v53 = vsel %vm296_vm4, %v269_v43, %v312_v45 }
 0x10d   :  { %v272_v48 = vpop.f32.mrf.mxu0 }
 0x10e   :  { %v331_v50 = vsel %vm299_vm5, %v11136_v46, %v315_v47  ;;  %vm297_vm7 = vcmp.gt.f32.partialorder %v272_v48, 0.0  ;;  %v313_v51 = vmul.f32 0.2, %v272_v48 }
 0x10f   :  { %v13479_v52 = vpack.c.bf16 %v331_v50, %v330_v49 }
 0x110   :  { %v329_v54 = vsel %vm297_vm7, %v272_v48, %v313_v51 }
 0x111   :  { %v13482_v55 = vpack.c.bf16 %v329_v54, %v328_v53  ;;  %11137 = vmatprep.subr.bf16.mxu1 %v13479_v52  ;;  %11169 = vmatprep.subr.bf16.mxu0 %v13479_v52 }
 0x112   :  { %11138 = vmatpush3.bf16.msra.mxu1 %v13479_v52  ;;  %11170 = vmatpush3.bf16.msra.mxu0 %v13479_v52 }
 0x113   :  { %11139 = vmatprep.subr.bf16.mxu1 %v13482_v55  ;;  %11171 = vmatprep.subr.bf16.mxu0 %v13482_v55 }
 0x116   :  { %11140 = vmatpush3.bf16.msra.mxu1 %v13482_v55  ;;  %11172 = vmatpush3.bf16.msra.mxu0 %v13482_v55 }
 0x117   :  { %11141 = vmatprep.subr.bf16.mxu1 %v13494_v58  ;;  %11173 = vmatprep.subr.bf16.mxu0 %v13494_v58 }
 0x11a   :  { %11142 = vmatpush3.bf16.msra.mxu1 %v13494_v58  ;;  %11174 = vmatpush3.bf16.msra.mxu0 %v13494_v58 }
 0x11b   :  { %11143 = vmatprep.subr.bf16.mxu1 %v13504_v61  ;;  %11175 = vmatprep.subr.bf16.mxu0 %v13504_v61 }
 0x11e   :  { %11144 = vmatpush3.bf16.msra.mxu1 %v13504_v61  ;;  %11176 = vmatpush3.bf16.msra.mxu0 %v13504_v61 }
 0x11f   :  { %11145 = vmatprep.subr.bf16.mxu1 %v13518_v0  ;;  %11177 = vmatprep.subr.bf16.mxu0 %v13518_v0 }
 0x122   :  { %11146 = vmatpush3.bf16.msra.mxu1 %v13518_v0  ;;  %11178 = vmatpush3.bf16.msra.mxu0 %v13518_v0 }
 0x123   :  { %11147 = vmatprep.subr.bf16.mxu1 %v13531_v3  ;;  %11179 = vmatprep.subr.bf16.mxu0 %v13531_v3 }
 0x126   :  { %11148 = vmatpush3.bf16.msra.mxu1 %v13531_v3  ;;  %11180 = vmatpush3.bf16.msra.mxu0 %v13531_v3 }
 0x127   :  { %11149 = vmatprep.subr.bf16.mxu1 %v13545_v6  ;;  %11181 = vmatprep.subr.bf16.mxu0 %v13545_v6 }
 0x12a   :  { %11150 = vmatpush3.bf16.msra.mxu1 %v13545_v6  ;;  %11182 = vmatpush3.bf16.msra.mxu0 %v13545_v6 }
 0x12b   :  { %11151 = vmatprep.subr.bf16.mxu1 %v13559_v9  ;;  %11183 = vmatprep.subr.bf16.mxu0 %v13559_v9 }
 0x12e   :  { %11152 = vmatpush3.bf16.msra.mxu1 %v13559_v9  ;;  %11184 = vmatpush3.bf16.msra.mxu0 %v13559_v9 }
 0x12f   :  { %11201 = vmatprep.subr.bf16.mxu1 %v12829_v10  ;;  %11233 = vmatprep.subr.bf16.mxu0 %v12849_v11 }
 0x131   :  { %11154 = vmatmul.mubr.bf16.vlgmr.msra.gmra.mxu1 %v12827_v12  ;;  %11186 = vmatmul.mubr.bf16.vlgmr.msra.gmra.mxu0 %v12828_v13 }
 0x132   :  { %11202 = vmatpush3.bf16.msra.mxu1 %v12829_v10  ;;  %11157 = vmatprep.mubr.bf16.mxu1 %v12831_v14 }
 0x133   :  { %11203 = vmatprep.subr.bf16.mxu1 %v12830_v15  ;;  %11189 = vmatprep.mubr.bf16.mxu0 %v12832_v16 }
 0x134   :  { %11234 = vmatpush3.bf16.msra.mxu0 %v12849_v11 }
 0x135   :  { %11235 = vmatprep.subr.bf16.mxu0 %v12850_v17 }
 0x136   :  { %11204 = vmatpush3.bf16.msra.mxu1 %v12830_v15 }
 0x137   :  { %11205 = vmatprep.subr.bf16.mxu1 %v12835_v18 }
 0x138   :  { %11236 = vmatpush3.bf16.msra.mxu0 %v12850_v17 }
 0x139   :  { %11158 = vmatmul.mubr.bf16.gmra.mxu1 %v12833_v19  ;;  %11190 = vmatmul.mubr.bf16.gmra.mxu0 %v12834_v20 }
 0x13a   :  { %11206 = vmatpush3.bf16.msra.mxu1 %v12835_v18  ;;  %11161 = vmatprep.mubr.bf16.mxu1 %v12837_v21 }
 0x13b   :  { %11207 = vmatprep.subr.bf16.mxu1 %v12836_v22  ;;  %11193 = vmatprep.mubr.bf16.mxu0 %v12838_v23 }
 0x13c   :  { %11237 = vmatprep.subr.bf16.mxu0 %v12851_v24 }
 0x13d   :  { %11238 = vmatpush3.bf16.msra.mxu0 %v12851_v24 }
 0x13e   :  { %11208 = vmatpush3.bf16.msra.mxu1 %v12836_v22  ;;  %11239 = vmatprep.subr.bf16.mxu0 %v12852_v25 }
 0x13f   :  { %11209 = vmatprep.subr.bf16.mxu1 %v12841_v26 }
 0x141   :  { %11162 = vmatmul.mubr.bf16.gmra.mxu1 %v12839_v27  ;;  %11194 = vmatmul.mubr.bf16.gmra.mxu0 %v12840_v28 }
 0x142   :  { %11210 = vmatpush3.bf16.msra.mxu1 %v12841_v26  ;;  %11165 = vmatprep.mubr.bf16.mxu1 %v12843_v29 }
 0x143   :  { %11211 = vmatprep.subr.bf16.mxu1 %v12842_v30  ;;  %11197 = vmatprep.mubr.bf16.mxu0 %v12844_v31  ;;  %v12857_v31 = vld [vmem:[%s15732_s2 + $0x80] sm:$0xff]  }
 0x144   :  { %11240 = vmatpush3.bf16.msra.mxu0 %v12852_v25 }
 0x145   :  { %11241 = vmatprep.subr.bf16.mxu0 %v12853_v32 }
 0x146   :  { %11212 = vmatpush3.bf16.msra.mxu1 %v12842_v30 }
 0x147   :  { %11213 = vmatprep.subr.bf16.mxu1 %v12847_v33 }
 0x148   :  { %11242 = vmatpush3.bf16.msra.mxu0 %v12853_v32 }
 0x149   :  { %11166 = vmatmul.mubr.bf16.gmra.mxu1 %v12845_v34  ;;  %11198 = vmatmul.mubr.bf16.gmra.mxu0 %v12846_v35  ;;  %v12859_v34 = vld [vmem:[%s15732_s2 + $0x90] sm:$0xff]   ;;  %v12860_v35 = vld [vmem:[%s15732_s2 + $0x98] sm:$0xff]  }
 0x14a   :  { %11214 = vmatpush3.bf16.msra.mxu1 %v12847_v33  ;;  %11243 = vmatprep.subr.bf16.mxu0 %v12854_v36  ;;  %v12858_v33 = vld [vmem:[%s15732_s2 + $0x88] sm:$0xff]  }
 0x14b   :  { %11215 = vmatprep.subr.bf16.mxu1 %v12848_v37 }
 0x14c   :  { %11244 = vmatpush3.bf16.msra.mxu0 %v12854_v36  ;;  %v12861_v36 = vld [vmem:[%s15732_s2 + $0xa0] sm:$0xff]  }
 0x14d   :  { %11245 = vmatprep.subr.bf16.mxu0 %v12855_v38 }
 0x14e   :  { %11216 = vmatpush3.bf16.msra.mxu1 %v12848_v37  ;;  %v12862_v37 = vld [vmem:[%s15732_s2 + $0xa8] sm:$0xff]  }
 0x14f   :  { %11265 = vmatprep.subr.bf16.mxu1 %v13479_v52 }
 0x150   :  { %11246 = vmatpush3.bf16.msra.mxu0 %v12855_v38  ;;  %v12863_v38 = vld [vmem:[%s15732_s2 + $0xb0] sm:$0xff]  }
 0x151   :  { %11247 = vmatprep.subr.bf16.mxu0 %v12856_v39 }
 0x154   :  { %11248 = vmatpush3.bf16.msra.mxu0 %v12856_v39  ;;  %v12864_v39 = vld [vmem:[%s15732_s2 + $0xb8] sm:$0xff]  }
 0x1f1   :  { %v11155_v40 = vpop.f32.mrf.mxu1  ;;  %v11187_v41 = vpop.f32.mrf.mxu0 }
 0x1f3   :  { %v438_v42 = vpop.f32.mrf.mxu1  ;;  %v624_v43 = vpop.f32.mrf.mxu0 }
 0x1f5   :  { %v11156_v44 = vpop.f32.mrf.mxu1  ;;  %v11188_v45 = vpop.f32.mrf.mxu0 }
 0x1f6   :  { %v502_v46 = vpack.c.bf16 %v11156_v44, %v11155_v40  ;;  %v688_v51 = vpack.c.bf16 %v11188_v45, %v11187_v41  ;;  %v12865_v40 = vld [vmem:[%s15732_s2 + $0xc0] sm:$0xff]   ;;  %v12866_v41 = vld [vmem:[%s15732_s2 + $0xc8] sm:$0xff]   ;;  %v12901_v45 = vld [vmem:[#allocation2 + $0xb8] sm:$0xff]  }
 0x1f7   :  { %v441_v47 = vpop.f32.mrf.mxu1  ;;  %v627_v48 = vpop.f32.mrf.mxu0  ;;  %v12869_v44 = vld [vmem:[%s15732_s2 + $0xe0] sm:$0xff]   ;;  %11297 = vmatprep.subr.bf16.mxu0 %v12901_v45 }
 0x1f8   :  { %v501_v49 = vpack.c.bf16 %v441_v47, %v438_v42  ;;  %v687_v50 = vpack.c.bf16 %v627_v48, %v624_v43  ;;  %v12867_v42 = vld [vmem:[%s15732_s2 + $0xd0] sm:$0xff]   ;;  %v12868_v43 = vld [vmem:[%s15732_s2 + $0xd8] sm:$0xff]  }
 0x1f9   :  { %v11159_v53 = vpop.f32.mrf.mxu1  ;;  %v11191_v54 = vpop.f32.mrf.mxu0  ;;  %v12871_v47 = vld [vmem:[%s15732_s2 + $0xf0] sm:$0xff]  }
 0x1fa   :  { %11217 = vmatprep.mubr.bf16.mxu1 %v687_v50  ;;  %11249 = vmatprep.mubr.bf16.mxu0 %v501_v49  ;;  %v12902_v48 = vld [vmem:[#allocation2 + $0xb0] sm:$0xff]   ;;  %v12905_v49 = vld [vmem:[#allocation2 + $0xa8] sm:$0xff]   ;;  %v12872_v50 = vld [vmem:[%s15732_s2 + $0xf8] sm:$0xff]  }
 0x1fb   :  { %v454_v56 = vpop.f32.mrf.mxu1  ;;  %v640_v57 = vpop.f32.mrf.mxu0  ;;  %11218 = vmatmul.mubr.bf16.vlgmr.msra.gmra.mxu1 %v688_v51  ;;  %11250 = vmatmul.mubr.bf16.vlgmr.msra.gmra.mxu0 %v502_v46  ;;  %v12870_v46 = vld [vmem:[%s15732_s2 + $0xe8] sm:$0xff]   ;;  %v12873_v51 = vld [vmem:[%s15732_s2 + $0x100] sm:$0xff]  }
 0x1fc   :  { %11266 = vmatpush3.bf16.msra.mxu1 %v13479_v52  ;;  %11298 = vmatpush3.bf16.msra.mxu0 %v12901_v45 }
 0x1fd   :  { %11267 = vmatprep.subr.bf16.mxu1 %v13482_v55  ;;  %v11160_v59 = vpop.f32.mrf.mxu1  ;;  %v11192_v60 = vpop.f32.mrf.mxu0  ;;  %11299 = vmatprep.subr.bf16.mxu0 %v12902_v48 }
 0x1fe   :  { %v504_v62 = vpack.c.bf16 %v11160_v59, %v11159_v53  ;;  %v690_v5 = vpack.c.bf16 %v11192_v60, %v11191_v54  ;;  %v12906_v53 = vld [vmem:[#allocation2 + $0xa0] sm:$0xff]   ;;  %v12909_v54 = vld [vmem:[#allocation2 + $0x98] sm:$0xff]   ;;  %v12910_v59 = vld [vmem:[#allocation2 + $0x90] sm:$0xff]  }
 0x1ff   :  { %v457_v63 = vpop.f32.mrf.mxu1  ;;  %v643_v1 = vpop.f32.mrf.mxu0  ;;  %v12913_v60 = vld [vmem:[#allocation2 + $0x88] sm:$0xff]  }
 0x200   :  { %v503_v2 = vpack.c.bf16 %v457_v63, %v454_v56  ;;  %v689_v4 = vpack.c.bf16 %v643_v1, %v640_v57  ;;  %11268 = vmatpush3.bf16.msra.mxu1 %v13482_v55  ;;  %11300 = vmatpush3.bf16.msra.mxu0 %v12902_v48  ;;  %v12874_v56 = vld [vmem:[%s15732_s2 + $0x108] sm:$0xff]   ;;  %v12875_v57 = vld [vmem:[%s15732_s2 + $0x110] sm:$0xff]   ;;  %v12877_v63 = vld [vmem:[%s15732_s2 + $0x120] sm:$0xff]  }
 0x201   :  { %11269 = vmatprep.subr.bf16.mxu1 %v13494_v58  ;;  %v11163_v7 = vpop.f32.mrf.mxu1  ;;  %v11195_v8 = vpop.f32.mrf.mxu0  ;;  %11301 = vmatprep.subr.bf16.mxu0 %v12905_v49  ;;  %v12914_v1 = vld [vmem:[#allocation2 + $0x80] sm:$0xff]  }
 0x202   :  { %11221 = vmatprep.mubr.bf16.mxu1 %v689_v4  ;;  %11253 = vmatprep.mubr.bf16.mxu0 %v503_v2  ;;  %v13726_v2 = vld [vmem:[#allocation2 + $0xf8] sm:$0xff]   ;;  %v12878_v4 = vld [vmem:[%s15732_s2 + $0x128] sm:$0xff]  }
 0x203   :  { %v470_v10 = vpop.f32.mrf.mxu1  ;;  %v656_v11 = vpop.f32.mrf.mxu0  ;;  %11222 = vmatmul.mubr.bf16.gmra.mxu1 %v690_v5  ;;  %11254 = vmatmul.mubr.bf16.gmra.mxu0 %v504_v62  ;;  %v12876_v62 = vld [vmem:[%s15732_s2 + $0x118] sm:$0xff]   ;;  %v12879_v5 = vld [vmem:[%s15732_s2 + $0x130] sm:$0xff]  }
 0x204   :  { %11270 = vmatpush3.bf16.msra.mxu1 %v13494_v58  ;;  %11302 = vmatpush3.bf16.msra.mxu0 %v12905_v49 }
 0x205   :  { %11271 = vmatprep.subr.bf16.mxu1 %v13504_v61  ;;  %v11164_v12 = vpop.f32.mrf.mxu1  ;;  %v11196_v13 = vpop.f32.mrf.mxu0  ;;  %11303 = vmatprep.subr.bf16.mxu0 %v12906_v53 }
 0x206   :  { %v506_v14 = vpack.c.bf16 %v11164_v12, %v11163_v7  ;;  %v692_v19 = vpack.c.bf16 %v11196_v13, %v11195_v8  ;;  %v12880_v7 = vld [vmem:[%s15732_s2 + $0x138] sm:$0xff]   ;;  %v12881_v8 = vld [vmem:[%s15732_s2 + $0x140] sm:$0xff]  }
 0x207   :  { %v473_v15 = vpop.f32.mrf.mxu1  ;;  %v659_v16 = vpop.f32.mrf.mxu0  ;;  %v12884_v12 = vld [vmem:[%s15732_s2 + $0x158] sm:$0xff]   ;;  %v12885_v13 = vld [vmem:[%s15732_s2 + $0x160] sm:$0xff]  }
 0x208   :  { %v505_v17 = vpack.c.bf16 %v473_v15, %v470_v10  ;;  %v691_v18 = vpack.c.bf16 %v659_v16, %v656_v11  ;;  %11272 = vmatpush3.bf16.msra.mxu1 %v13504_v61  ;;  %11304 = vmatpush3.bf16.msra.mxu0 %v12906_v53  ;;  %v12882_v10 = vld [vmem:[%s15732_s2 + $0x148] sm:$0xff]   ;;  %v12883_v11 = vld [vmem:[%s15732_s2 + $0x150] sm:$0xff]   ;;  %v12888_v16 = vld [vmem:[%s15732_s2 + $0x178] sm:$0xff]  }
 0x209   :  { %11273 = vmatprep.subr.bf16.mxu1 %v13518_v0  ;;  %v11167_v20 = vpop.f32.mrf.mxu1  ;;  %v11199_v21 = vpop.f32.mrf.mxu0  ;;  %11305 = vmatprep.subr.bf16.mxu0 %v12909_v54  ;;  %v12887_v15 = vld [vmem:[%s15732_s2 + $0x170] sm:$0xff]  }
 0x20a   :  { %11225 = vmatprep.mubr.bf16.mxu1 %v691_v18  ;;  %11257 = vmatprep.mubr.bf16.mxu0 %v505_v17  ;;  %v12889_v17 = vld [vmem:[%s15732_s2 + $0x180] sm:$0xff]   ;;  %v12890_v18 = vld [vmem:[%s15732_s2 + $0x188] sm:$0xff]  }
 0x20b   :  { %v486_v22 = vpop.f32.mrf.mxu1  ;;  %v672_v23 = vpop.f32.mrf.mxu0  ;;  %11226 = vmatmul.mubr.bf16.gmra.mxu1 %v692_v19  ;;  %11258 = vmatmul.mubr.bf16.gmra.mxu0 %v506_v14  ;;  %v12886_v14 = vld [vmem:[%s15732_s2 + $0x168] sm:$0xff]   ;;  %v12891_v19 = vld [vmem:[%s15732_s2 + $0x190] sm:$0xff]  }
 0x20c   :  { %11274 = vmatpush3.bf16.msra.mxu1 %v13518_v0  ;;  %11306 = vmatpush3.bf16.msra.mxu0 %v12909_v54 }
 0x20d   :  { %11275 = vmatprep.subr.bf16.mxu1 %v13531_v3  ;;  %v11168_v24 = vpop.f32.mrf.mxu1  ;;  %v11200_v25 = vpop.f32.mrf.mxu0  ;;  %11307 = vmatprep.subr.bf16.mxu0 %v12910_v59 }
 0x20e   :  { %v508_v26 = vpack.c.bf16 %v11168_v24, %v11167_v20  ;;  %v694_v32 = vpack.c.bf16 %v11200_v25, %v11199_v21  ;;  %v12892_v20 = vld [vmem:[%s15732_s2 + $0x198] sm:$0xff]   ;;  %v12893_v21 = vld [vmem:[%s15732_s2 + $0x1a0] sm:$0xff]  }
 0x20f   :  { %v489_v27 = vpop.f32.mrf.mxu1  ;;  %v675_v28 = vpop.f32.mrf.mxu0  ;;  %v12896_v24 = vld [vmem:[%s15732_s2 + $0x1b8] sm:$0xff]   ;;  %v12897_v25 = vld [vmem:[%s15732_s2 + $0x1c0] sm:$0xff]  }
 0x210   :  { %v507_v29 = vpack.c.bf16 %v489_v27, %v486_v22  ;;  %v693_v30 = vpack.c.bf16 %v675_v28, %v672_v23  ;;  %11276 = vmatpush3.bf16.msra.mxu1 %v13531_v3  ;;  %11308 = vmatpush3.bf16.msra.mxu0 %v12910_v59  ;;  %v12894_v22 = vld [vmem:[%s15732_s2 + $0x1a8] sm:$0xff]   ;;  %v12895_v23 = vld [vmem:[%s15732_s2 + $0x1b0] sm:$0xff]  }
 0x211   :  { %11277 = vmatprep.subr.bf16.mxu1 %v13545_v6  ;;  %11309 = vmatprep.subr.bf16.mxu0 %v12913_v60  ;;  %v12899_v27 = vld [vmem:[%s15732_s2 + $0x1d0] sm:$0xff]  }
 0x212   :  { %11229 = vmatprep.mubr.bf16.mxu1 %v693_v30  ;;  %11261 = vmatprep.mubr.bf16.mxu0 %v507_v29 }
 0x213   :  { %11230 = vmatmul.mubr.bf16.gmra.mxu1 %v694_v32  ;;  %11262 = vmatmul.mubr.bf16.gmra.mxu0 %v508_v26  ;;  %v12898_v26 = vld [vmem:[%s15732_s2 + $0x1c8] sm:$0xff]  }
 0x214   :  { %11278 = vmatpush3.bf16.msra.mxu1 %v13545_v6  ;;  %11281 = vmatprep.mubr.bf16.mxu1 %v12857_v31 }
 0x215   :  { %11279 = vmatprep.subr.bf16.mxu1 %v13559_v9  ;;  %11310 = vmatpush3.bf16.msra.mxu0 %v12913_v60 }
 0x216   :  { %11311 = vmatprep.subr.bf16.mxu0 %v12914_v1 }
 0x218   :  { %11280 = vmatpush3.bf16.msra.mxu1 %v13559_v9 }
 0x219   :  { %11329 = vmatprep.subr.bf16.mxu1 %v13479_v52  ;;  %11312 = vmatpush3.bf16.msra.mxu0 %v12914_v1 }
 0x21a   :  { %11361 = vmatprep.subr.bf16.mxu0 %v13726_v2 }
 0x21b   :  { %11282 = vmatmul.mubr.bf16.vlgmr.msra.gmra.mxu1 %v12858_v33 }
 0x21c   :  { %11330 = vmatpush3.bf16.msra.mxu1 %v13479_v52  ;;  %11285 = vmatprep.mubr.bf16.mxu1 %v12859_v34 }
 0x21d   :  { %11331 = vmatprep.subr.bf16.mxu1 %v13482_v55 }
 0x220   :  { %11332 = vmatpush3.bf16.msra.mxu1 %v13482_v55 }
 0x221   :  { %11333 = vmatprep.subr.bf16.mxu1 %v13494_v58 }
 0x223   :  { %11286 = vmatmul.mubr.bf16.gmra.mxu1 %v12860_v35 }
 0x224   :  { %11334 = vmatpush3.bf16.msra.mxu1 %v13494_v58  ;;  %11289 = vmatprep.mubr.bf16.mxu1 %v12861_v36  ;;  %v12900_v36 = vld [vmem:[%s15732_s2 + $0x1d8] sm:$0xff]  }
 0x225   :  { %11335 = vmatprep.subr.bf16.mxu1 %v13504_v61 }
 0x228   :  { %11336 = vmatpush3.bf16.msra.mxu1 %v13504_v61 }
 0x229   :  { %11337 = vmatprep.subr.bf16.mxu1 %v13518_v0 }
 0x22b   :  { %11290 = vmatmul.mubr.bf16.gmra.mxu1 %v12862_v37 }
 0x22c   :  { %11338 = vmatpush3.bf16.msra.mxu1 %v13518_v0  ;;  %11293 = vmatprep.mubr.bf16.mxu1 %v12863_v38 }
 0x22d   :  { %11339 = vmatprep.subr.bf16.mxu1 %v13531_v3 }
 0x230   :  { %11340 = vmatpush3.bf16.msra.mxu1 %v13531_v3 }
 0x231   :  { %11341 = vmatprep.subr.bf16.mxu1 %v13545_v6 }
 0x233   :  { %11294 = vmatmul.mubr.bf16.gmra.mxu1 %v12864_v39 }
 0x234   :  { %11342 = vmatpush3.bf16.msra.mxu1 %v13545_v6  ;;  %11345 = vmatprep.mubr.bf16.mxu1 %v12865_v40 }
 0x235   :  { %11343 = vmatprep.subr.bf16.mxu1 %v13559_v9 }
 0x238   :  { %11344 = vmatpush3.bf16.msra.mxu1 %v13559_v9 }
 0x239   :  { %11393 = vmatprep.subr.bf16.mxu1 %v13479_v52 }
 0x23b   :  { %11346 = vmatmul.mubr.bf16.vlgmr.msra.gmra.mxu1 %v12866_v41 }
 0x23c   :  { %11394 = vmatpush3.bf16.msra.mxu1 %v13479_v52  ;;  %11349 = vmatprep.mubr.bf16.mxu1 %v12867_v42 }
 0x23d   :  { %11395 = vmatprep.subr.bf16.mxu1 %v13482_v55 }
 0x240   :  { %11396 = vmatpush3.bf16.msra.mxu1 %v13482_v55 }
 0x241   :  { %11397 = vmatprep.subr.bf16.mxu1 %v13494_v58 }
 0x243   :  { %11350 = vmatmul.mubr.bf16.gmra.mxu1 %v12868_v43 }
 0x244   :  { %11398 = vmatpush3.bf16.msra.mxu1 %v13494_v58  ;;  %11353 = vmatprep.mubr.bf16.mxu1 %v12869_v44 }
 0x245   :  { %11399 = vmatprep.subr.bf16.mxu1 %v13504_v61 }
 0x248   :  { %11400 = vmatpush3.bf16.msra.mxu1 %v13504_v61 }
 0x249   :  { %11401 = vmatprep.subr.bf16.mxu1 %v13518_v0 }
 0x24b   :  { %11354 = vmatmul.mubr.bf16.gmra.mxu1 %v12870_v46 }
 0x24c   :  { %11402 = vmatpush3.bf16.msra.mxu1 %v13518_v0  ;;  %11357 = vmatprep.mubr.bf16.mxu1 %v12871_v47  ;;  %v12904_v47 = vld [vmem:[%s15732_s2 + $0x1e8] sm:$0xff]  }
 0x24d   :  { %11403 = vmatprep.subr.bf16.mxu1 %v13531_v3 }
 0x250   :  { %11404 = vmatpush3.bf16.msra.mxu1 %v13531_v3 }
 0x251   :  { %11405 = vmatprep.subr.bf16.mxu1 %v13545_v6 }
 0x253   :  { %11358 = vmatmul.mubr.bf16.gmra.mxu1 %v12872_v50 }
 0x254   :  { %11406 = vmatpush3.bf16.msra.mxu1 %v13545_v6  ;;  %11409 = vmatprep.mubr.bf16.mxu1 %v12873_v51 }
 0x255   :  { %11407 = vmatprep.subr.bf16.mxu1 %v13559_v9 }
 0x258   :  { %11408 = vmatpush3.bf16.msra.mxu1 %v13559_v9 }
 0x259   :  { %11457 = vmatprep.subr.bf16.mxu1 %v13479_v52 }
 0x25b   :  { %11410 = vmatmul.mubr.bf16.vlgmr.msra.gmra.mxu1 %v12874_v56 }
 0x25c   :  { %11458 = vmatpush3.bf16.msra.mxu1 %v13479_v52  ;;  %11413 = vmatprep.mubr.bf16.mxu1 %v12875_v57 }
 0x25d   :  { %11459 = vmatprep.subr.bf16.mxu1 %v13482_v55 }
 0x260   :  { %11460 = vmatpush3.bf16.msra.mxu1 %v13482_v55 }
 0x261   :  { %11461 = vmatprep.subr.bf16.mxu1 %v13494_v58 }
 0x263   :  { %11414 = vmatmul.mubr.bf16.gmra.mxu1 %v12876_v62  ;;  %v12908_v62 = vld [vmem:[%s15732_s2 + $0x1f8] sm:$0xff]  }
 0x264   :  { %11462 = vmatpush3.bf16.msra.mxu1 %v13494_v58  ;;  %11417 = vmatprep.mubr.bf16.mxu1 %v12877_v63 }
 0x265   :  { %11463 = vmatprep.subr.bf16.mxu1 %v13504_v61 }
 0x268   :  { %11464 = vmatpush3.bf16.msra.mxu1 %v13504_v61 }
 0x269   :  { %11465 = vmatprep.subr.bf16.mxu1 %v13518_v0 }
 0x26b   :  { %11418 = vmatmul.mubr.bf16.gmra.mxu1 %v12878_v4 }
 0x26c   :  { %11466 = vmatpush3.bf16.msra.mxu1 %v13518_v0  ;;  %11421 = vmatprep.mubr.bf16.mxu1 %v12879_v5 }
 0x26d   :  { %11467 = vmatprep.subr.bf16.mxu1 %v13531_v3 }
 0x270   :  { %11468 = vmatpush3.bf16.msra.mxu1 %v13531_v3 }
 0x271   :  { %11469 = vmatprep.subr.bf16.mxu1 %v13545_v6 }
 0x273   :  { %11422 = vmatmul.mubr.bf16.gmra.mxu1 %v12880_v7 }
 0x274   :  { %11470 = vmatpush3.bf16.msra.mxu1 %v13545_v6  ;;  %11473 = vmatprep.mubr.bf16.mxu1 %v12881_v8 }
 0x275   :  { %11471 = vmatprep.subr.bf16.mxu1 %v13559_v9 }
 0x278   :  { %11472 = vmatpush3.bf16.msra.mxu1 %v13559_v9 }
 0x279   :  { %11521 = vmatprep.subr.bf16.mxu1 %v13479_v52 }
 0x27b   :  { %11474 = vmatmul.mubr.bf16.vlgmr.msra.gmra.mxu1 %v12882_v10 }
 0x27c   :  { %11522 = vmatpush3.bf16.msra.mxu1 %v13479_v52  ;;  %11477 = vmatprep.mubr.bf16.mxu1 %v12883_v11 }
 0x27d   :  { %11523 = vmatprep.subr.bf16.mxu1 %v13482_v55 }
 0x280   :  { %11524 = vmatpush3.bf16.msra.mxu1 %v13482_v55 }
 0x281   :  { %11525 = vmatprep.subr.bf16.mxu1 %v13494_v58 }
 0x283   :  { %11478 = vmatmul.mubr.bf16.gmra.mxu1 %v12884_v12 }
 0x284   :  { %11526 = vmatpush3.bf16.msra.mxu1 %v13494_v58  ;;  %11481 = vmatprep.mubr.bf16.mxu1 %v12885_v13 }
 0x285   :  { %11527 = vmatprep.subr.bf16.mxu1 %v13504_v61 }
 0x288   :  { %11528 = vmatpush3.bf16.msra.mxu1 %v13504_v61 }
 0x289   :  { %11529 = vmatprep.subr.bf16.mxu1 %v13518_v0 }
 0x28b   :  { %11482 = vmatmul.mubr.bf16.gmra.mxu1 %v12886_v14  ;;  %v12912_v14 = vld [vmem:[%s15732_s2 + $0x208] sm:$0xff]  }
 0x28c   :  { %11530 = vmatpush3.bf16.msra.mxu1 %v13518_v0  ;;  %11485 = vmatprep.mubr.bf16.mxu1 %v12887_v15 }
 0x28d   :  { %11531 = vmatprep.subr.bf16.mxu1 %v13531_v3 }
 0x290   :  { %11532 = vmatpush3.bf16.msra.mxu1 %v13531_v3 }
 0x291   :  { %11533 = vmatprep.subr.bf16.mxu1 %v13545_v6 }
 0x293   :  { %11486 = vmatmul.mubr.bf16.gmra.mxu1 %v12888_v16 }
 0x294   :  { %11534 = vmatpush3.bf16.msra.mxu1 %v13545_v6  ;;  %11537 = vmatprep.mubr.bf16.mxu1 %v12889_v17 }
 0x295   :  { %11535 = vmatprep.subr.bf16.mxu1 %v13559_v9 }
 0x298   :  { %11536 = vmatpush3.bf16.msra.mxu1 %v13559_v9 }
 0x299   :  { %11585 = vmatprep.subr.bf16.mxu1 %v13479_v52 }
 0x29b   :  { %11538 = vmatmul.mubr.bf16.vlgmr.msra.gmra.mxu1 %v12890_v18 }
 0x29c   :  { %11586 = vmatpush3.bf16.msra.mxu1 %v13479_v52  ;;  %11541 = vmatprep.mubr.bf16.mxu1 %v12891_v19 }
 0x29d   :  { %11587 = vmatprep.subr.bf16.mxu1 %v13482_v55 }
 0x2a0   :  { %11588 = vmatpush3.bf16.msra.mxu1 %v13482_v55 }
 0x2a1   :  { %11589 = vmatprep.subr.bf16.mxu1 %v13494_v58 }
 0x2a3   :  { %11542 = vmatmul.mubr.bf16.gmra.mxu1 %v12892_v20  ;;  %v12916_v20 = vld [vmem:[%s15732_s2 + $0x218] sm:$0xff]  }
 0x2a4   :  { %11590 = vmatpush3.bf16.msra.mxu1 %v13494_v58  ;;  %11545 = vmatprep.mubr.bf16.mxu1 %v12893_v21  ;;  %v12919_v21 = vld [vmem:[%s15732_s2 + $0x220] sm:$0xff]  }
 0x2a5   :  { %11591 = vmatprep.subr.bf16.mxu1 %v13504_v61 }
 0x2a8   :  { %11592 = vmatpush3.bf16.msra.mxu1 %v13504_v61 }
 0x2a9   :  { %11593 = vmatprep.subr.bf16.mxu1 %v13518_v0 }
 0x2ab   :  { %11546 = vmatmul.mubr.bf16.gmra.mxu1 %v12894_v22 }
 0x2ac   :  { %11594 = vmatpush3.bf16.msra.mxu1 %v13518_v0  ;;  %11549 = vmatprep.mubr.bf16.mxu1 %v12895_v23 }
 0x2ad   :  { %11595 = vmatprep.subr.bf16.mxu1 %v13531_v3 }
 0x2b0   :  { %11596 = vmatpush3.bf16.msra.mxu1 %v13531_v3 }
 0x2b1   :  { %11597 = vmatprep.subr.bf16.mxu1 %v13545_v6 }
 0x2b3   :  { %11550 = vmatmul.mubr.bf16.gmra.mxu1 %v12896_v24 }
 0x2b4   :  { %11598 = vmatpush3.bf16.msra.mxu1 %v13545_v6  ;;  %11601 = vmatprep.mubr.bf16.mxu1 %v12897_v25  ;;  %v12918_v25 = vld [vmem:[#allocation2 + $0xf0] sm:$0xff]  }
 0x2b5   :  { %11599 = vmatprep.subr.bf16.mxu1 %v13559_v9 }
 0x2b8   :  { %11600 = vmatpush3.bf16.msra.mxu1 %v13559_v9 }
 0x2b9   :  { %11649 = vmatprep.subr.bf16.mxu1 %v13479_v52 }
 0x2bb   :  { %v11219_v28 = vpop.f32.mrf.mxu1  ;;  %v11251_v29 = vpop.f32.mrf.mxu0  ;;  %11602 = vmatmul.mubr.bf16.vlgmr.msra.gmra.mxu1 %v12898_v26 }
 0x2bc   :  { %v13838_v30 = vadd.f32 %v11251_v29, %v11219_v28  ;;  %11650 = vmatpush3.bf16.msra.mxu1 %v13479_v52  ;;  %11605 = vmatprep.mubr.bf16.mxu1 %v12899_v27  ;;  %v12903_v52 = vld [vmem:[%s15732_s2 + $0x1e0] sm:$0xff]   ;;  %v12920_v28 = vld [vmem:[%s15732_s2 + $0x228] sm:$0xff]  }
 0x2bd   :  { %11651 = vmatprep.subr.bf16.mxu1 %v13482_v55  ;;  %v794_v31 = vpop.f32.mrf.mxu1  ;;  %v939_v32 = vpop.f32.mrf.mxu0  ;;  %v12921_v29 = vld [vmem:[#allocation2 + $0xe8] sm:$0xff]  }
 0x2be   :  { %v13842_v33 = vadd.f32 %v939_v32, %v794_v31  ;;  %v12923_v31 = vld [vmem:[%s15732_s2 + $0x230] sm:$0xff]  }
 0x2bf   :  { %v11220_v34 = vpop.f32.mrf.mxu1  ;;  %v11252_v35 = vpop.f32.mrf.mxu0 }
 0x2c0   :  { %v13847_v37 = vadd.f32 %v11252_v35, %v11220_v34  ;;  %11652 = vmatpush3.bf16.msra.mxu1 %v13482_v55 }
 0x2c1   :  { %11653 = vmatprep.subr.bf16.mxu1 %v13494_v58  ;;  %v13854_v38 = vpop.f32.mrf.mxu1  ;;  %v13856_v39 = vpop.f32.mrf.mxu0 }
 0x2c3   :  { %v11223_v40 = vpop.f32.mrf.mxu1  ;;  %v11255_v41 = vpop.f32.mrf.mxu0  ;;  %11606 = vmatmul.mubr.bf16.gmra.mxu1 %v12900_v36 }
 0x2c4   :  { %v13858_v42 = vadd.f32 %v11255_v41, %v11223_v40  ;;  %11654 = vmatpush3.bf16.msra.mxu1 %v13494_v58  ;;  %11609 = vmatprep.mubr.bf16.mxu1 %v12903_v52  ;;  %v12907_v58 = vld [vmem:[%s15732_s2 + $0x1f0] sm:$0xff]   ;;  %v12922_v52 = vld [vmem:[#allocation2 + $0xe0] sm:$0xff]   ;;  %v12924_v41 = vld [vmem:[%s15732_s2 + $0x238] sm:$0xff]  }
 0x2c5   :  { %11655 = vmatprep.subr.bf16.mxu1 %v13504_v61  ;;  %v810_v55 = vpop.f32.mrf.mxu1  ;;  %v955_v43 = vpop.f32.mrf.mxu0 }
 0x2c6   :  { %v13862_v44 = vadd.f32 %v955_v43, %v810_v55  ;;  %v12925_v55 = vld [vmem:[#allocation2 + $0xd8] sm:$0xff]  }
 0x2c7   :  { %v11224_v45 = vpop.f32.mrf.mxu1  ;;  %v11256_v46 = vpop.f32.mrf.mxu0 }
 0x2c8   :  { %v13867_v48 = vadd.f32 %v11256_v46, %v11224_v45  ;;  %11656 = vmatpush3.bf16.msra.mxu1 %v13504_v61 }
 0x2c9   :  { %11657 = vmatprep.subr.bf16.mxu1 %v13518_v0  ;;  %v13874_v49 = vpop.f32.mrf.mxu1  ;;  %v13876_v50 = vpop.f32.mrf.mxu0 }
 0x2cb   :  { %v11227_v51 = vpop.f32.mrf.mxu1  ;;  %v11259_v53 = vpop.f32.mrf.mxu0  ;;  %11610 = vmatmul.mubr.bf16.gmra.mxu1 %v12904_v47 }
 0x2cc   :  { %v13878_v54 = vadd.f32 %v11259_v53, %v11227_v51  ;;  %11658 = vmatpush3.bf16.msra.mxu1 %v13518_v0  ;;  %11613 = vmatprep.mubr.bf16.mxu1 %v12907_v58  ;;  %v12911_v0 = vld [vmem:[%s15732_s2 + $0x200] sm:$0xff]   ;;  %v12926_v58 = vld [vmem:[#allocation2 + $0xd0] sm:$0xff]  }
 0x2cd   :  { %11659 = vmatprep.subr.bf16.mxu1 %v13531_v3  ;;  %v826_v61 = vpop.f32.mrf.mxu1  ;;  %v971_v56 = vpop.f32.mrf.mxu0 }
 0x2ce   :  { %v13882_v57 = vadd.f32 %v971_v56, %v826_v61  ;;  %v12927_v61 = vld [vmem:[#allocation2 + $0xc8] sm:$0xff]  }
 0x2cf   :  { %v11228_v59 = vpop.f32.mrf.mxu1  ;;  %v11260_v60 = vpop.f32.mrf.mxu0 }
 0x2d0   :  { %v13887_v63 = vadd.f32 %v11260_v60, %v11228_v59  ;;  %11660 = vmatpush3.bf16.msra.mxu1 %v13531_v3 }
 0x2d1   :  { %11661 = vmatprep.subr.bf16.mxu1 %v13545_v6  ;;  %v13894_v1 = vpop.f32.mrf.mxu1  ;;  %v13896_v4 = vpop.f32.mrf.mxu0 }
 0x2d3   :  { %v11231_v5 = vpop.f32.mrf.mxu1  ;;  %v11263_v7 = vpop.f32.mrf.mxu0  ;;  %11614 = vmatmul.mubr.bf16.gmra.mxu1 %v12908_v62 }
 0x2d4   :  { %v13898_v8 = vadd.f32 %v11263_v7, %v11231_v5  ;;  %11662 = vmatpush3.bf16.msra.mxu1 %v13545_v6  ;;  %11665 = vmatprep.mubr.bf16.mxu1 %v12911_v0  ;;  %v12915_v6 = vld [vmem:[%s15732_s2 + $0x210] sm:$0xff]   ;;  %v12928_v0 = vld [vmem:[#allocation2 + $0xc0] sm:$0xff]  }
 0x2d5   :  { %11663 = vmatprep.subr.bf16.mxu1 %v13559_v9  ;;  %v842_v3 = vpop.f32.mrf.mxu1  ;;  %v987_v10 = vpop.f32.mrf.mxu0 }
 0x2d6   :  { %v13902_v11 = vadd.f32 %v987_v10, %v842_v3  ;;  %v12929_v3 = vld [vmem:[#allocation2 + $0x138] sm:$0xff]  }
 0x2d7   :  { %v11232_v12 = vpop.f32.mrf.mxu1  ;;  %v11264_v13 = vpop.f32.mrf.mxu0 }
 0x2d8   :  { %v13907_v15 = vadd.f32 %v11264_v13, %v11232_v12  ;;  %11664 = vmatpush3.bf16.msra.mxu1 %v13559_v9 }
 0x2d9   :  { %v13913_v16 = vpop.f32.mrf.mxu1 }
 0x2db   :  { %v11283_v17 = vpop.f32.mrf.mxu1  ;;  %11666 = vmatmul.mubr.bf16.vlgmr.msra.gmra.mxu1 %v12912_v14 }
 0x2dc   :  { %11669 = vmatprep.mubr.bf16.mxu1 %v12915_v6  ;;  %v12930_v6 = vld [vmem:[#allocation2 + $0x130] sm:$0xff]  }
 0x2dd   :  { %v1101_v18 = vpop.f32.mrf.mxu1 }
 0x2df   :  { %v11284_v19 = vpop.f32.mrf.mxu1 }
 0x2e0   :  { %v1165_v23 = vpack.c.bf16 %v11284_v19, %v11283_v17  ;;  %v12931_v19 = vld [vmem:[#allocation2 + $0x128] sm:$0xff]  }
 0x2e1   :  { %v1104_v9 = vpop.f32.mrf.mxu1 }
 0x2e2   :  { %v1164_v22 = vpack.c.bf16 %v1104_v9, %v1101_v18 }
 0x2e3   :  { %v11287_v24 = vpop.f32.mrf.mxu1  ;;  %11670 = vmatmul.mubr.bf16.gmra.mxu1 %v12916_v20 }
 0x2e4   :  { %11313 = vmatprep.mubr.bf16.mxu0 %v1164_v22  ;;  %11673 = vmatprep.mubr.bf16.mxu1 %v12919_v21 }
 0x2e5   :  { %v1117_v26 = vpop.f32.mrf.mxu1  ;;  %11314 = vmatmul.mubr.bf16.vlgmr.msra.gmra.mxu0 %v1165_v23  ;;  %v12932_v23 = vld [vmem:[#allocation2 + $0x120] sm:$0xff]  }
 0x2e6   :  { %11362 = vmatpush3.bf16.msra.mxu0 %v13726_v2 }
 0x2e7   :  { %v11288_v27 = vpop.f32.mrf.mxu1  ;;  %11363 = vmatprep.subr.bf16.mxu0 %v12918_v25 }
 0x2e8   :  { %v1167_v35 = vpack.c.bf16 %v11288_v27, %v11287_v24 }
 0x2e9   :  { %v1120_v32 = vpop.f32.mrf.mxu1 }
 0x2ea   :  { %v1166_v34 = vpack.c.bf16 %v1120_v32, %v1117_v26  ;;  %11364 = vmatpush3.bf16.msra.mxu0 %v12918_v25  ;;  %v12933_v26 = vld [vmem:[#allocation2 + $0x118] sm:$0xff]   ;;  %v12934_v32 = vld [vmem:[#allocation2 + $0x110] sm:$0xff]  }
 0x2eb   :  { %v11291_v36 = vpop.f32.mrf.mxu1  ;;  %11674 = vmatmul.mubr.bf16.gmra.mxu1 %v12920_v28  ;;  %11365 = vmatprep.subr.bf16.mxu0 %v12921_v29 }
 0x2ec   :  { %11317 = vmatprep.mubr.bf16.mxu0 %v1166_v34  ;;  %11677 = vmatprep.mubr.bf16.mxu1 %v12923_v31 }
 0x2ed   :  { %v1133_v2 = vpop.f32.mrf.mxu1  ;;  %11318 = vmatmul.mubr.bf16.gmra.mxu0 %v1167_v35 }
 0x2ee   :  { %11366 = vmatpush3.bf16.msra.mxu0 %v12921_v29 }
 0x2ef   :  { %v11292_v40 = vpop.f32.mrf.mxu1  ;;  %11367 = vmatprep.subr.bf16.mxu0 %v12922_v52 }
 0x2f0   :  { %v1169_v46 = vpack.c.bf16 %v11292_v40, %v11291_v36  ;;  %v12935_v36 = vld [vmem:[#allocation2 + $0x108] sm:$0xff]  }
 0x2f1   :  { %v1136_v43 = vpop.f32.mrf.mxu1 }
 0x2f2   :  { %v1168_v45 = vpack.c.bf16 %v1136_v43, %v1133_v2  ;;  %11368 = vmatpush3.bf16.msra.mxu0 %v12922_v52 }
 0x2f3   :  { %v11295_v47 = vpop.f32.mrf.mxu1  ;;  %11678 = vmatmul.mubr.bf16.gmra.mxu1 %v12924_v41  ;;  %11369 = vmatprep.subr.bf16.mxu0 %v12925_v55 }
 0x2f4   :  { %11321 = vmatprep.mubr.bf16.mxu0 %v1168_v45 }
 0x2f5   :  { %v1149_v51 = vpop.f32.mrf.mxu1  ;;  %11322 = vmatmul.mubr.bf16.gmra.mxu0 %v1169_v46  ;;  %v12937_v46 = vld [vmem:[#allocation2 + $0x178] sm:$0xff]  }
 0x2f6   :  { %11370 = vmatpush3.bf16.msra.mxu0 %v12925_v55  ;;  %v12936_v55 = vld [vmem:[#allocation2 + $0x100] sm:$0xff]  }
 0x2f7   :  { %v11296_v53 = vpop.f32.mrf.mxu1  ;;  %11371 = vmatprep.subr.bf16.mxu0 %v12926_v58 }
 0x2f8   :  { %v1171_v60 = vpack.c.bf16 %v11296_v53, %v11295_v47 }
 0x2f9   :  { %v1152_v56 = vpop.f32.mrf.mxu1 }
 0x2fa   :  { %v1170_v59 = vpack.c.bf16 %v1152_v56, %v1149_v51  ;;  %11372 = vmatpush3.bf16.msra.mxu0 %v12926_v58 }
 0x2fb   :  { %v11347_v62 = vpop.f32.mrf.mxu1  ;;  %11373 = vmatprep.subr.bf16.mxu0 %v12927_v61 }
 0x2fc   :  { %11325 = vmatprep.mubr.bf16.mxu0 %v1170_v59 }
 0x2fd   :  { %11326 = vmatmul.mubr.bf16.gmra.mxu0 %v1171_v60  ;;  %v1449_v5 = vpop.f32.mrf.mxu1  ;;  %v12939_v60 = vld [vmem:[#allocation2 + $0x168] sm:$0xff]  }
 0x2fe   :  { %11374 = vmatpush3.bf16.msra.mxu0 %v12927_v61  ;;  %v12938_v61 = vld [vmem:[#allocation2 + $0x170] sm:$0xff]  }
 0x2ff   :  { %v11348_v7 = vpop.f32.mrf.mxu1  ;;  %11375 = vmatprep.subr.bf16.mxu0 %v12928_v0 }
 0x300   :  { %v1513_v13 = vpack.c.bf16 %v11348_v7, %v11347_v62 }
 0x301   :  { %v1452_v10 = vpop.f32.mrf.mxu1 }
 0x302   :  { %v1512_v12 = vpack.c.bf16 %v1452_v10, %v1449_v5  ;;  %11376 = vmatpush3.bf16.msra.mxu0 %v12928_v0 }
 0x303   :  { %v11351_v14 = vpop.f32.mrf.mxu1  ;;  %11425 = vmatprep.subr.bf16.mxu0 %v12929_v3 }
 0x304   :  { %11377 = vmatprep.mubr.bf16.mxu0 %v1512_v12 }
 0x305   :  { %v1465_v17 = vpop.f32.mrf.mxu1  ;;  %11378 = vmatmul.mubr.bf16.vlgmr.msra.gmra.mxu0 %v1513_v13  ;;  %v12941_v13 = vld [vmem:[#allocation2 + $0x158] sm:$0xff]  }
 0x306   :  { %11426 = vmatpush3.bf16.msra.mxu0 %v12929_v3  ;;  %v12940_v3 = vld [vmem:[#allocation2 + $0x160] sm:$0xff]  }
 0x307   :  { %v11352_v18 = vpop.f32.mrf.mxu1  ;;  %11427 = vmatprep.subr.bf16.mxu0 %v12930_v6 }
 0x308   :  { %v1515_v9 = vpack.c.bf16 %v11352_v18, %v11351_v14 }
 0x309   :  { %v1468_v20 = vpop.f32.mrf.mxu1 }
 0x30a   :  { %v1514_v21 = vpack.c.bf16 %v1468_v20, %v1465_v17  ;;  %11428 = vmatpush3.bf16.msra.mxu0 %v12930_v6 }
 0x30b   :  { %v11355_v22 = vpop.f32.mrf.mxu1  ;;  %11429 = vmatprep.subr.bf16.mxu0 %v12931_v19 }
 0x30c   :  { %11381 = vmatprep.mubr.bf16.mxu0 %v1514_v21 }
 0x30d   :  { %v1481_v24 = vpop.f32.mrf.mxu1  ;;  %11382 = vmatmul.mubr.bf16.gmra.mxu0 %v1515_v9  ;;  %v12943_v9 = vld [vmem:[#allocation2 + $0x148] sm:$0xff]  }
 0x30e   :  { %11430 = vmatpush3.bf16.msra.mxu0 %v12931_v19  ;;  %v12942_v19 = vld [vmem:[#allocation2 + $0x150] sm:$0xff]  }
 0x30f   :  { %v11356_v25 = vpop.f32.mrf.mxu1  ;;  %11431 = vmatprep.subr.bf16.mxu0 %v12932_v23 }
 0x310   :  { %v1517_v29 = vpack.c.bf16 %v11356_v25, %v11355_v22 }
 0x311   :  { %v1484_v27 = vpop.f32.mrf.mxu1 }
 0x312   :  { %v1516_v28 = vpack.c.bf16 %v1484_v27, %v1481_v24  ;;  %11432 = vmatpush3.bf16.msra.mxu0 %v12932_v23 }
 0x313   :  { %v11359_v31 = vpop.f32.mrf.mxu1  ;;  %11433 = vmatprep.subr.bf16.mxu0 %v12933_v26 }
 0x314   :  { %11385 = vmatprep.mubr.bf16.mxu0 %v1516_v28 }
 0x315   :  { %v1497_v34 = vpop.f32.mrf.mxu1  ;;  %11386 = vmatmul.mubr.bf16.gmra.mxu0 %v1517_v29  ;;  %v12945_v29 = vld [vmem:[#allocation2 + $0x1b8] sm:$0xff]  }
 0x316   :  { %11434 = vmatpush3.bf16.msra.mxu0 %v12933_v26  ;;  %v12944_v26 = vld [vmem:[#allocation2 + $0x140] sm:$0xff]  }
 0x317   :  { %v11360_v35 = vpop.f32.mrf.mxu1  ;;  %11435 = vmatprep.subr.bf16.mxu0 %v12934_v32 }
 0x318   :  { %v1519_v40 = vpack.c.bf16 %v11360_v35, %v11359_v31 }
 0x319   :  { %v1500_v52 = vpop.f32.mrf.mxu1 }
 0x31a   :  { %v1518_v2 = vpack.c.bf16 %v1500_v52, %v1497_v34  ;;  %11436 = vmatpush3.bf16.msra.mxu0 %v12934_v32 }
 0x31b   :  { %v11411_v41 = vpop.f32.mrf.mxu1  ;;  %11437 = vmatprep.subr.bf16.mxu0 %v12935_v36 }
 0x31c   :  { %11389 = vmatprep.mubr.bf16.mxu0 %v1518_v2 }
 0x31d   :  { %11390 = vmatmul.mubr.bf16.gmra.mxu0 %v1519_v40  ;;  %v1797_v43 = vpop.f32.mrf.mxu1  ;;  %v12947_v40 = vld [vmem:[#allocation2 + $0x1a8] sm:$0xff]  }
 0x31e   :  { %11438 = vmatpush3.bf16.msra.mxu0 %v12935_v36  ;;  %v12946_v36 = vld [vmem:[#allocation2 + $0x1b0] sm:$0xff]  }
 0x31f   :  { %v11412_v45 = vpop.f32.mrf.mxu1  ;;  %11439 = vmatprep.subr.bf16.mxu0 %v12936_v55 }
 0x320   :  { %v1861_v51 = vpack.c.bf16 %v11412_v45, %v11411_v41 }
 0x321   :  { %v1800_v47 = vpop.f32.mrf.mxu1 }
 0x322   :  { %v1860_v58 = vpack.c.bf16 %v1800_v47, %v1797_v43  ;;  %11440 = vmatpush3.bf16.msra.mxu0 %v12936_v55 }
 0x323   :  { %v11415_v53 = vpop.f32.mrf.mxu1  ;;  %11489 = vmatprep.subr.bf16.mxu0 %v12937_v46 }
 0x324   :  { %11441 = vmatprep.mubr.bf16.mxu0 %v1860_v58 }
 0x325   :  { %v1813_v56 = vpop.f32.mrf.mxu1  ;;  %11442 = vmatmul.mubr.bf16.vlgmr.msra.gmra.mxu0 %v1861_v51  ;;  %v12949_v51 = vld [vmem:[#allocation2 + $0x198] sm:$0xff]  }
 0x326   :  { %11490 = vmatpush3.bf16.msra.mxu0 %v12937_v46  ;;  %v12948_v46 = vld [vmem:[#allocation2 + $0x1a0] sm:$0xff]  }
 0x327   :  { %v11416_v59 = vpop.f32.mrf.mxu1  ;;  %11491 = vmatprep.subr.bf16.mxu0 %v12938_v61 }
 0x328   :  { %v1863_v5 = vpack.c.bf16 %v11416_v59, %v11415_v53 }
 0x329   :  { %v1816_v62 = vpop.f32.mrf.mxu1 }
 0x32a   :  { %v1862_v0 = vpack.c.bf16 %v1816_v62, %v1813_v56  ;;  %11492 = vmatpush3.bf16.msra.mxu0 %v12938_v61 }
 0x32b   :  { %v11419_v7 = vpop.f32.mrf.mxu1  ;;  %11493 = vmatprep.subr.bf16.mxu0 %v12939_v60 }
 0x32c   :  { %11445 = vmatprep.mubr.bf16.mxu0 %v1862_v0 }
 0x32d   :  { %v1829_v10 = vpop.f32.mrf.mxu1  ;;  %11446 = vmatmul.mubr.bf16.gmra.mxu0 %v1863_v5  ;;  %v12951_v5 = vld [vmem:[#allocation2 + $0x188] sm:$0xff]  }
 0x32e   :  { %11494 = vmatpush3.bf16.msra.mxu0 %v12939_v60  ;;  %v12950_v60 = vld [vmem:[#allocation2 + $0x190] sm:$0xff]  }
 0x32f   :  { %v11420_v12 = vpop.f32.mrf.mxu1  ;;  %11495 = vmatprep.subr.bf16.mxu0 %v12940_v3 }
 0x330   :  { %v1865_v17 = vpack.c.bf16 %v11420_v12, %v11419_v7 }
 0x331   :  { %v1832_v14 = vpop.f32.mrf.mxu1 }
 0x332   :  { %v1864_v6 = vpack.c.bf16 %v1832_v14, %v1829_v10  ;;  %11496 = vmatpush3.bf16.msra.mxu0 %v12940_v3 }
 0x333   :  { %v11423_v18 = vpop.f32.mrf.mxu1  ;;  %11497 = vmatprep.subr.bf16.mxu0 %v12941_v13 }
 0x334   :  { %11449 = vmatprep.mubr.bf16.mxu0 %v1864_v6 }
 0x335   :  { %v1845_v20 = vpop.f32.mrf.mxu1  ;;  %11450 = vmatmul.mubr.bf16.gmra.mxu0 %v1865_v17  ;;  %v12953_v17 = vld [vmem:[#allocation2 + $0x1f8] sm:$0xff]  }
 0x336   :  { %11498 = vmatpush3.bf16.msra.mxu0 %v12941_v13  ;;  %v12952_v13 = vld [vmem:[#allocation2 + $0x180] sm:$0xff]  }
 0x337   :  { %v11424_v21 = vpop.f32.mrf.mxu1  ;;  %11499 = vmatprep.subr.bf16.mxu0 %v12942_v19 }
 0x338   :  { %v1867_v24 = vpack.c.bf16 %v11424_v21, %v11423_v18 }
 0x339   :  { %v1848_v22 = vpop.f32.mrf.mxu1 }
 0x33a   :  { %v1866_v23 = vpack.c.bf16 %v1848_v22, %v1845_v20  ;;  %11500 = vmatpush3.bf16.msra.mxu0 %v12942_v19 }
 0x33b   :  { %v11475_v25 = vpop.f32.mrf.mxu1  ;;  %11501 = vmatprep.subr.bf16.mxu0 %v12943_v9 }
 0x33c   :  { %11453 = vmatprep.mubr.bf16.mxu0 %v1866_v23 }
 0x33d   :  { %11454 = vmatmul.mubr.bf16.gmra.mxu0 %v1867_v24  ;;  %v2145_v27 = vpop.f32.mrf.mxu1  ;;  %v12955_v24 = vld [vmem:[#allocation2 + $0x1e8] sm:$0xff]  }
 0x33e   :  { %11502 = vmatpush3.bf16.msra.mxu0 %v12943_v9  ;;  %v12954_v9 = vld [vmem:[#allocation2 + $0x1f0] sm:$0xff]  }
 0x33f   :  { %v11476_v28 = vpop.f32.mrf.mxu1  ;;  %11503 = vmatprep.subr.bf16.mxu0 %v12944_v26 }
 0x340   :  { %v2209_v34 = vpack.c.bf16 %v11476_v28, %v11475_v25 }
 0x341   :  { %v2148_v31 = vpop.f32.mrf.mxu1 }
 0x342   :  { %v2208_v32 = vpack.c.bf16 %v2148_v31, %v2145_v27  ;;  %11504 = vmatpush3.bf16.msra.mxu0 %v12944_v26 }
 0x343   :  { %v11479_v35 = vpop.f32.mrf.mxu1  ;;  %11553 = vmatprep.subr.bf16.mxu0 %v12945_v29 }
 0x344   :  { %11505 = vmatprep.mubr.bf16.mxu0 %v2208_v32 }
 0x345   :  { %v2161_v52 = vpop.f32.mrf.mxu1  ;;  %11506 = vmatmul.mubr.bf16.vlgmr.msra.gmra.mxu0 %v2209_v34  ;;  %v12957_v34 = vld [vmem:[#allocation2 + $0x1d8] sm:$0xff]  }
 0x346   :  { %11554 = vmatpush3.bf16.msra.mxu0 %v12945_v29  ;;  %v12956_v29 = vld [vmem:[#allocation2 + $0x1e0] sm:$0xff]  }
 0x347   :  { %v11480_v2 = vpop.f32.mrf.mxu1  ;;  %11555 = vmatprep.subr.bf16.mxu0 %v12946_v36 }
 0x348   :  { %v2211_v43 = vpack.c.bf16 %v11480_v2, %v11479_v35 }
 0x349   :  { %v2164_v41 = vpop.f32.mrf.mxu1 }
 0x34a   :  { %v2210_v55 = vpack.c.bf16 %v2164_v41, %v2161_v52  ;;  %11556 = vmatpush3.bf16.msra.mxu0 %v12946_v36 }
 0x34b   :  { %v11483_v45 = vpop.f32.mrf.mxu1  ;;  %11557 = vmatprep.subr.bf16.mxu0 %v12947_v40 }
 0x34c   :  { %11509 = vmatprep.mubr.bf16.mxu0 %v2210_v55 }
 0x34d   :  { %v2177_v47 = vpop.f32.mrf.mxu1  ;;  %11510 = vmatmul.mubr.bf16.gmra.mxu0 %v2211_v43  ;;  %v12959_v43 = vld [vmem:[#allocation2 + $0x1c8] sm:$0xff]  }
 0x34e   :  { %11558 = vmatpush3.bf16.msra.mxu0 %v12947_v40  ;;  %v12958_v40 = vld [vmem:[#allocation2 + $0x1d0] sm:$0xff]  }
 0x34f   :  { %v11484_v58 = vpop.f32.mrf.mxu1  ;;  %11559 = vmatprep.subr.bf16.mxu0 %v12948_v46 }
 0x350   :  { %v2213_v56 = vpack.c.bf16 %v11484_v58, %v11483_v45 }
 0x351   :  { %v2180_v53 = vpop.f32.mrf.mxu1 }
 0x352   :  { %v2212_v61 = vpack.c.bf16 %v2180_v53, %v2177_v47  ;;  %11560 = vmatpush3.bf16.msra.mxu0 %v12948_v46 }
 0x353   :  { %v11487_v59 = vpop.f32.mrf.mxu1  ;;  %11561 = vmatprep.subr.bf16.mxu0 %v12949_v51 }
 0x354   :  { %11513 = vmatprep.mubr.bf16.mxu0 %v2212_v61 }
 0x355   :  { %v2193_v62 = vpop.f32.mrf.mxu1  ;;  %11514 = vmatmul.mubr.bf16.gmra.mxu0 %v2213_v56  ;;  %v12961_v56 = vld [vmem:[#allocation2 + $0x238] sm:$0xff]  }
 0x356   :  { %11562 = vmatpush3.bf16.msra.mxu0 %v12949_v51  ;;  %v12960_v51 = vld [vmem:[#allocation2 + $0x1c0] sm:$0xff]  }
 0x357   :  { %v11488_v0 = vpop.f32.mrf.mxu1  ;;  %11563 = vmatprep.subr.bf16.mxu0 %v12950_v60 }
 0x358   :  { %v2215_v10 = vpack.c.bf16 %v11488_v0, %v11487_v59 }
 0x359   :  { %v2196_v7 = vpop.f32.mrf.mxu1 }
 0x35a   :  { %v2214_v3 = vpack.c.bf16 %v2196_v7, %v2193_v62  ;;  %11564 = vmatpush3.bf16.msra.mxu0 %v12950_v60 }
 0x35b   :  { %v11539_v12 = vpop.f32.mrf.mxu1  ;;  %11565 = vmatprep.subr.bf16.mxu0 %v12951_v5 }
 0x35c   :  { %11517 = vmatprep.mubr.bf16.mxu0 %v2214_v3 }
 0x35d   :  { %11518 = vmatmul.mubr.bf16.gmra.mxu0 %v2215_v10  ;;  %v2493_v14 = vpop.f32.mrf.mxu1  ;;  %v12963_v10 = vld [vmem:[#allocation2 + $0x228] sm:$0xff]  }
 0x35e   :  { %11566 = vmatpush3.bf16.msra.mxu0 %v12951_v5  ;;  %v12962_v5 = vld [vmem:[#allocation2 + $0x230] sm:$0xff]  }
 0x35f   :  { %v11540_v6 = vpop.f32.mrf.mxu1  ;;  %11567 = vmatprep.subr.bf16.mxu0 %v12952_v13 }
 0x360   :  { %v2557_v20 = vpack.c.bf16 %v11540_v6, %v11539_v12 }
 0x361   :  { %v2496_v18 = vpop.f32.mrf.mxu1 }
 0x362   :  { %v2556_v19 = vpack.c.bf16 %v2496_v18, %v2493_v14  ;;  %11568 = vmatpush3.bf16.msra.mxu0 %v12952_v13 }
 0x363   :  { %v11543_v21 = vpop.f32.mrf.mxu1  ;;  %11617 = vmatprep.subr.bf16.mxu0 %v12953_v17 }
 0x364   :  { %11569 = vmatprep.mubr.bf16.mxu0 %v2556_v19 }
 0x365   :  { %v2509_v22 = vpop.f32.mrf.mxu1  ;;  %11570 = vmatmul.mubr.bf16.vlgmr.msra.gmra.mxu0 %v2557_v20  ;;  %v12965_v20 = vld [vmem:[#allocation2 + $0x218] sm:$0xff]  }
 0x366   :  { %11618 = vmatpush3.bf16.msra.mxu0 %v12953_v17  ;;  %v12964_v17 = vld [vmem:[#allocation2 + $0x220] sm:$0xff]  }
 0x367   :  { %v11544_v23 = vpop.f32.mrf.mxu1  ;;  %11619 = vmatprep.subr.bf16.mxu0 %v12954_v9 }
 0x368   :  { %v2559_v27 = vpack.c.bf16 %v11544_v23, %v11543_v21 }
 0x369   :  { %v2512_v25 = vpop.f32.mrf.mxu1 }
 0x36a   :  { %v2558_v26 = vpack.c.bf16 %v2512_v25, %v2509_v22  ;;  %11620 = vmatpush3.bf16.msra.mxu0 %v12954_v9 }
 0x36b   :  { %v11547_v28 = vpop.f32.mrf.mxu1  ;;  %11621 = vmatprep.subr.bf16.mxu0 %v12955_v24 }
 0x36c   :  { %11573 = vmatprep.mubr.bf16.mxu0 %v2558_v26 }
 0x36d   :  { %v2525_v31 = vpop.f32.mrf.mxu1  ;;  %11574 = vmatmul.mubr.bf16.gmra.mxu0 %v2559_v27  ;;  %v12967_v27 = vld [vmem:[#allocation2 + $0x208] sm:$0xff]  }
 0x36e   :  { %11622 = vmatpush3.bf16.msra.mxu0 %v12955_v24  ;;  %v12966_v24 = vld [vmem:[#allocation2 + $0x210] sm:$0xff]  }
 0x36f   :  { %v11548_v32 = vpop.f32.mrf.mxu1  ;;  %11623 = vmatprep.subr.bf16.mxu0 %v12956_v29 }
 0x370   :  { %v2561_v52 = vpack.c.bf16 %v11548_v32, %v11547_v28 }
 0x371   :  { %v2528_v35 = vpop.f32.mrf.mxu1 }
 0x372   :  { %v2560_v36 = vpack.c.bf16 %v2528_v35, %v2525_v31  ;;  %11624 = vmatpush3.bf16.msra.mxu0 %v12956_v29 }
 0x373   :  { %v11551_v2 = vpop.f32.mrf.mxu1  ;;  %11625 = vmatprep.subr.bf16.mxu0 %v12957_v34 }
 0x374   :  { %11577 = vmatprep.mubr.bf16.mxu0 %v2560_v36 }
 0x375   :  { %v2541_v41 = vpop.f32.mrf.mxu1  ;;  %11578 = vmatmul.mubr.bf16.gmra.mxu0 %v2561_v52 }
 0x376   :  { %11626 = vmatpush3.bf16.msra.mxu0 %v12957_v34  ;;  %v12968_v34 = vld [vmem:[#allocation2 + $0x200] sm:$0xff]  }
 0x377   :  { %v11552_v55 = vpop.f32.mrf.mxu1  ;;  %11627 = vmatprep.subr.bf16.mxu0 %v12958_v40 }
 0x378   :  { %v2563_v47 = vpack.c.bf16 %v11552_v55, %v11551_v2 }
 0x379   :  { %v2544_v45 = vpop.f32.mrf.mxu1 }
 0x37a   :  { %v2562_v46 = vpack.c.bf16 %v2544_v45, %v2541_v41  ;;  %11628 = vmatpush3.bf16.msra.mxu0 %v12958_v40  ;;  %v13931_v40 = vpop.f32.mrf.mxu0 }
 0x37b   :  { %v11603_v58 = vpop.f32.mrf.mxu1  ;;  %11629 = vmatprep.subr.bf16.mxu0 %v12959_v43 }
 0x37c   :  { %11581 = vmatprep.mubr.bf16.mxu0 %v2562_v46 }
 0x37d   :  { %11582 = vmatmul.mubr.bf16.gmra.mxu0 %v2563_v47  ;;  %v2841_v53 = vpop.f32.mrf.mxu1 }
 0x37e   :  { %11630 = vmatpush3.bf16.msra.mxu0 %v12959_v43 }
 0x37f   :  { %v11604_v61 = vpop.f32.mrf.mxu1  ;;  %11631 = vmatprep.subr.bf16.mxu0 %v12960_v51 }
 0x380   :  { %v2905_v62 = vpack.c.bf16 %v11604_v61, %v11603_v58 }
 0x381   :  { %v2844_v59 = vpop.f32.mrf.mxu1 }
 0x382   :  { %v2904_v60 = vpack.c.bf16 %v2844_v59, %v2841_v53  ;;  %11632 = vmatpush3.bf16.msra.mxu0 %v12960_v51 }
 0x383   :  { %v11607_v0 = vpop.f32.mrf.mxu1  ;;  %11681 = vmatprep.subr.bf16.mxu0 %v12961_v56 }
 0x384   :  { %11633 = vmatprep.mubr.bf16.mxu0 %v2904_v60 }
 0x385   :  { %v2857_v7 = vpop.f32.mrf.mxu1  ;;  %11634 = vmatmul.mubr.bf16.vlgmr.msra.gmra.mxu0 %v2905_v62 }
 0x386   :  { %11682 = vmatpush3.bf16.msra.mxu0 %v12961_v56 }
 0x387   :  { %v11608_v3 = vpop.f32.mrf.mxu1  ;;  %11683 = vmatprep.subr.bf16.mxu0 %v12962_v5 }
 0x388   :  { %v2907_v14 = vpack.c.bf16 %v11608_v3, %v11607_v0 }
 0x389   :  { %v2860_v12 = vpop.f32.mrf.mxu1 }
 0x38a   :  { %v2906_v13 = vpack.c.bf16 %v2860_v12, %v2857_v7  ;;  %11684 = vmatpush3.bf16.msra.mxu0 %v12962_v5 }
 0x38b   :  { %v11611_v6 = vpop.f32.mrf.mxu1  ;;  %11685 = vmatprep.subr.bf16.mxu0 %v12963_v10 }
 0x38c   :  { %11637 = vmatprep.mubr.bf16.mxu0 %v2906_v13 }
 0x38d   :  { %v2873_v18 = vpop.f32.mrf.mxu1  ;;  %11638 = vmatmul.mubr.bf16.gmra.mxu0 %v2907_v14 }
 0x38e   :  { %11686 = vmatpush3.bf16.msra.mxu0 %v12963_v10 }
 0x38f   :  { %v11612_v19 = vpop.f32.mrf.mxu1  ;;  %11687 = vmatprep.subr.bf16.mxu0 %v12964_v17 }
 0x390   :  { %v2909_v22 = vpack.c.bf16 %v11612_v19, %v11611_v6 }
 0x391   :  { %v2876_v21 = vpop.f32.mrf.mxu1 }
 0x392   :  { %v2908_v9 = vpack.c.bf16 %v2876_v21, %v2873_v18  ;;  %11688 = vmatpush3.bf16.msra.mxu0 %v12964_v17 }
 0x393   :  { %v11615_v23 = vpop.f32.mrf.mxu1  ;;  %11689 = vmatprep.subr.bf16.mxu0 %v12965_v20 }
 0x394   :  { %11641 = vmatprep.mubr.bf16.mxu0 %v2908_v9 }
 0x395   :  { %v2889_v25 = vpop.f32.mrf.mxu1  ;;  %11642 = vmatmul.mubr.bf16.gmra.mxu0 %v2909_v22 }
 0x396   :  { %11690 = vmatpush3.bf16.msra.mxu0 %v12965_v20 }
 0x397   :  { %v11616_v26 = vpop.f32.mrf.mxu1  ;;  %11691 = vmatprep.subr.bf16.mxu0 %v12966_v24 }
 0x398   :  { %v2911_v31 = vpack.c.bf16 %v11616_v26, %v11615_v23 }
 0x399   :  { %v2892_v28 = vpop.f32.mrf.mxu1 }
 0x39a   :  { %v2910_v29 = vpack.c.bf16 %v2892_v28, %v2889_v25  ;;  %11692 = vmatpush3.bf16.msra.mxu0 %v12966_v24 }
 0x39b   :  { %v11667_v32 = vpop.f32.mrf.mxu1  ;;  %11693 = vmatprep.subr.bf16.mxu0 %v12967_v27 }
 0x39c   :  { %11645 = vmatprep.mubr.bf16.mxu0 %v2910_v29 }
 0x39d   :  { %11646 = vmatmul.mubr.bf16.gmra.mxu0 %v2911_v31  ;;  %v3189_v35 = vpop.f32.mrf.mxu1 }
 0x39e   :  { %11694 = vmatpush3.bf16.msra.mxu0 %v12967_v27 }
 0x39f   :  { %v11668_v36 = vpop.f32.mrf.mxu1  ;;  %11695 = vmatprep.subr.bf16.mxu0 %v12968_v34 }
 0x3a0   :  { %v3253_v41 = vpack.c.bf16 %v11668_v36, %v11667_v32 }
 0x3a1   :  { %v3192_v52 = vpop.f32.mrf.mxu1 }
 0x3a2   :  { %v3252_v2 = vpack.c.bf16 %v3192_v52, %v3189_v35  ;;  %11696 = vmatpush3.bf16.msra.mxu0 %v12968_v34 }
 0x3a3   :  { %v11671_v55 = vpop.f32.mrf.mxu1 }
 0x3a4   :  { %11697 = vmatprep.mubr.bf16.mxu0 %v3252_v2 }
 0x3a5   :  { %v11315_v43 = vpop.f32.mrf.mxu0  ;;  %v3205_v45 = vpop.f32.mrf.mxu1  ;;  %11698 = vmatmul.mubr.bf16.vlgmr.msra.gmra.mxu0 %v3253_v41 }
 0x3a6   :  { %v1336_v46 = vadd.f32 %v11315_v43, %v13838_v30 }
 0x3a7   :  { %v1271_v47 = vpop.f32.mrf.mxu0  ;;  %v11672_v58 = vpop.f32.mrf.mxu1 }
 0x3a8   :  { %v1334_v51 = vadd.f32 %v1271_v47, %v13842_v33  ;;  %v3255_v60 = vpack.c.bf16 %v11672_v58, %v11671_v55 }
 0x3a9   :  { %v11316_v53 = vpop.f32.mrf.mxu0  ;;  %v3208_v61 = vpop.f32.mrf.mxu1 }
 0x3aa   :  { %v1337_v56 = vadd.f32 %v11316_v53, %v13847_v37  ;;  %v3254_v59 = vpack.c.bf16 %v3208_v61, %v3205_v45 }
 0x3ab   :  { %v13936_v62 = vpop.f32.mrf.mxu0  ;;  %v11675_v0 = vpop.f32.mrf.mxu1 }
 0x3ac   :  { %11701 = vmatprep.mubr.bf16.mxu0 %v3254_v59 }
 0x3ad   :  { %v11319_v5 = vpop.f32.mrf.mxu0  ;;  %v3221_v7 = vpop.f32.mrf.mxu1  ;;  %11702 = vmatmul.mubr.bf16.gmra.mxu0 %v3255_v60 }
 0x3ae   :  { %v1340_v3 = vadd.f32 %v11319_v5, %v13858_v42 }
 0x3af   :  { %v1287_v30 = vpop.f32.mrf.mxu0  ;;  %v11676_v10 = vpop.f32.mrf.mxu1 }
 0x3b0   :  { %v1338_v12 = vadd.f32 %v1287_v30, %v13862_v44  ;;  %v3257_v6 = vpack.c.bf16 %v11676_v10, %v11675_v0 }
 0x3b1   :  { %v11320_v33 = vpop.f32.mrf.mxu0  ;;  %v3224_v13 = vpop.f32.mrf.mxu1 }
 0x3b2   :  { %v1341_v14 = vadd.f32 %v11320_v33, %v13867_v48  ;;  %v3256_v37 = vpack.c.bf16 %v3224_v13, %v3221_v7 }
 0x3b3   :  { %v13941_v17 = vpop.f32.mrf.mxu0  ;;  %v11679_v18 = vpop.f32.mrf.mxu1 }
 0x3b4   :  { %11705 = vmatprep.mubr.bf16.mxu0 %v3256_v37 }
 0x3b5   :  { %v11323_v19 = vpop.f32.mrf.mxu0  ;;  %v3237_v20 = vpop.f32.mrf.mxu1  ;;  %11706 = vmatmul.mubr.bf16.gmra.mxu0 %v3257_v6 }
 0x3b6   :  { %v1344_v21 = vadd.f32 %v11323_v19, %v13878_v54 }
 0x3b7   :  { %v1303_v42 = vpop.f32.mrf.mxu0  ;;  %v11680_v9 = vpop.f32.mrf.mxu1 }
 0x3b8   :  { %v1342_v22 = vadd.f32 %v1303_v42, %v13882_v57  ;;  %v3259_v25 = vpack.c.bf16 %v11680_v9, %v11679_v18 }
 0x3b9   :  { %v11324_v44 = vpop.f32.mrf.mxu0  ;;  %v3240_v23 = vpop.f32.mrf.mxu1 }
 0x3ba   :  { %v1345_v24 = vadd.f32 %v11324_v44, %v13887_v63  ;;  %v3258_v48 = vpack.c.bf16 %v3240_v23, %v3237_v20 }
 0x3bb   :  { %v13946_v26 = vpop.f32.mrf.mxu0 }
 0x3bc   :  { %11709 = vmatprep.mubr.bf16.mxu0 %v3258_v48 }
 0x3bd   :  { %v11327_v27 = vpop.f32.mrf.mxu0  ;;  %11710 = vmatmul.mubr.bf16.gmra.mxu0 %v3259_v25 }
 0x3be   :  { %v1348_v28 = vadd.f32 %v11327_v27, %v13898_v8 }
 0x3bf   :  { %v1319_v29 = vpop.f32.mrf.mxu0 }
 0x3c0   :  { %v1346_v54 = vadd.f32 %v1319_v29, %v13902_v11 }
 0x3c1   :  { %v11328_v31 = vpop.f32.mrf.mxu0 }
 0x3c2   :  { %v1349_v32 = vadd.f32 %v11328_v31, %v13907_v15 }
 0x3c3   :  { %v13951_v57 = vpop.f32.mrf.mxu0 }
 0x3c5   :  { %v11379_v34 = vpop.f32.mrf.mxu0 }
 0x3c6   :  { %v1684_v35 = vadd.f32 %v11379_v34, %v1336_v46 }
 0x3c7   :  { %v1619_v63 = vpop.f32.mrf.mxu0 }
 0x3c8   :  { %v1682_v36 = vadd.f32 %v1619_v63, %v1334_v51 }
 0x3c9   :  { %v11380_v52 = vpop.f32.mrf.mxu0 }
 0x3ca   :  { %v1685_v2 = vadd.f32 %v11380_v52, %v1337_v56 }
 0x3cb   :  { %v13953_v41 = vpop.f32.mrf.mxu0 }
 0x3cd   :  { %v11383_v55 = vpop.f32.mrf.mxu0 }
 0x3ce   :  { %v1688_v43 = vadd.f32 %v11383_v55, %v1340_v3 }
 0x3cf   :  { %v1635_v45 = vpop.f32.mrf.mxu0 }
 0x3d0   :  { %v1686_v8 = vadd.f32 %v1635_v45, %v1338_v12 }
 0x3d1   :  { %v11384_v47 = vpop.f32.mrf.mxu0 }
 0x3d2   :  { %v1689_v58 = vadd.f32 %v11384_v47, %v1341_v14 }
 0x3d3   :  { %v13955_v11 = vpop.f32.mrf.mxu0 }
 0x3d5   :  { %v11387_v53 = vpop.f32.mrf.mxu0 }
 0x3d6   :  { %v1692_v15 = vadd.f32 %v11387_v53, %v1344_v21 }
 0x3d7   :  { %v1651_v61 = vpop.f32.mrf.mxu0 }
 0x3d8   :  { %v1690_v59 = vadd.f32 %v1651_v61, %v1342_v22 }
 0x3d9   :  { %v11388_v60 = vpop.f32.mrf.mxu0 }
 0x3da   :  { %v1693_v46 = vadd.f32 %v11388_v60, %v1345_v24 }
 0x3db   :  { %v13957_v0 = vpop.f32.mrf.mxu0 }
 0x3dd   :  { %v11391_v51 = vpop.f32.mrf.mxu0 }
 0x3de   :  { %v1696_v56 = vadd.f32 %v11391_v51, %v1348_v28 }
 0x3df   :  { %v1667_v5 = vpop.f32.mrf.mxu0 }
 0x3e0   :  { %v1694_v7 = vadd.f32 %v1667_v5, %v1346_v54 }
 0x3e1   :  { %v11392_v30 = vpop.f32.mrf.mxu0 }
 0x3e2   :  { %v1697_v3 = vadd.f32 %v11392_v30, %v1349_v32 }
 0x3e3   :  { %v13959_v10 = vpop.f32.mrf.mxu0 }
 0x3e5   :  { %v11443_v12 = vpop.f32.mrf.mxu0 }
 0x3e6   :  { %v2032_v33 = vadd.f32 %v11443_v12, %v1684_v35 }
 0x3e7   :  { %v1967_v13 = vpop.f32.mrf.mxu0 }
 0x3e8   :  { %v2030_v14 = vadd.f32 %v1967_v13, %v1682_v36 }
 0x3e9   :  { %v11444_v37 = vpop.f32.mrf.mxu0 }
 0x3ea   :  { %v2033_v6 = vadd.f32 %v11444_v37, %v1685_v2 }
 0x3eb   :  { %v13961_v18 = vpop.f32.mrf.mxu0 }
 0x3ed   :  { %v11447_v19 = vpop.f32.mrf.mxu0 }
 0x3ee   :  { %v2036_v20 = vadd.f32 %v11447_v19, %v1688_v43 }
 0x3ef   :  { %v1983_v21 = vpop.f32.mrf.mxu0 }
 0x3f0   :  { %v2034_v42 = vadd.f32 %v1983_v21, %v1686_v8 }
 0x3f1   :  { %v11448_v9 = vpop.f32.mrf.mxu0 }
 0x3f2   :  { %v2037_v22 = vadd.f32 %v11448_v9, %v1689_v58 }
 0x3f3   :  { %v13963_v44 = vpop.f32.mrf.mxu0 }
 0x3f5   :  { %v11451_v23 = vpop.f32.mrf.mxu0 }
 0x3f6   :  { %v2040_v24 = vadd.f32 %v11451_v23, %v1692_v15 }
 0x3f7   :  { %v1999_v48 = vpop.f32.mrf.mxu0 }
 0x3f8   :  { %v2038_v25 = vadd.f32 %v1999_v48, %v1690_v59 }
 0x3f9   :  { %v11452_v27 = vpop.f32.mrf.mxu0 }
 0x3fa   :  { %v2041_v28 = vadd.f32 %v11452_v27, %v1693_v46 }
 0x3fb   :  { %v13965_v29 = vpop.f32.mrf.mxu0 }
 0x3fd   :  { %v11455_v54 = vpop.f32.mrf.mxu0 }
 0x3fe   :  { %v2044_v31 = vadd.f32 %v11455_v54, %v1696_v56 }
 0x3ff   :  { %v2015_v32 = vpop.f32.mrf.mxu0 }
 0x400   :  { %v2042_v34 = vadd.f32 %v2015_v32, %v1694_v7 }
 0x401   :  { %v11456_v35 = vpop.f32.mrf.mxu0 }
 0x402   :  { %v2045_v63 = vadd.f32 %v11456_v35, %v1697_v3 }
 0x403   :  { %v13967_v36 = vpop.f32.mrf.mxu0 }
 0x405   :  { %v11507_v52 = vpop.f32.mrf.mxu0 }
 0x406   :  { %v2380_v2 = vadd.f32 %v11507_v52, %v2032_v33 }
 0x407   :  { %v2315_v55 = vpop.f32.mrf.mxu0 }
 0x408   :  { %v2378_v43 = vadd.f32 %v2315_v55, %v2030_v14 }
 0x409   :  { %v11508_v45 = vpop.f32.mrf.mxu0 }
 0x40a   :  { %v2381_v8 = vadd.f32 %v11508_v45, %v2033_v6 }
 0x40b   :  { %v13969_v47 = vpop.f32.mrf.mxu0 }
 0x40d   :  { %v11511_v58 = vpop.f32.mrf.mxu0 }
 0x40e   :  { %v2384_v53 = vadd.f32 %v11511_v58, %v2036_v20 }
 0x40f   :  { %v2331_v15 = vpop.f32.mrf.mxu0 }
 0x410   :  { %v13971_v61 = vadd.f32 %v2331_v15, %v2034_v42 }
 0x411   :  { %v11512_v59 = vpop.f32.mrf.mxu0 }
 0x412   :  { %v2385_v60 = vadd.f32 %v11512_v59, %v2037_v22 }
 0x413   :  { %v13973_v46 = vpop.f32.mrf.mxu0 }
 0x415   :  { %v11515_v51 = vpop.f32.mrf.mxu0 }
 0x416   :  { %v2388_v56 = vadd.f32 %v11515_v51, %v2040_v24 }
 0x417   :  { %v2347_v5 = vpop.f32.mrf.mxu0 }
 0x418   :  { %v13975_v7 = vadd.f32 %v2347_v5, %v2038_v25 }
 0x419   :  { %v11516_v30 = vpop.f32.mrf.mxu0 }
 0x41a   :  { %v2389_v3 = vadd.f32 %v11516_v30, %v2041_v28 }
 0x41b   :  { %v13977_v12 = vpop.f32.mrf.mxu0 }
 0x41d   :  { %v11519_v33 = vpop.f32.mrf.mxu0 }
 0x41e   :  { %v2392_v13 = vadd.f32 %v11519_v33, %v2044_v31 }
 0x41f   :  { %v2363_v14 = vpop.f32.mrf.mxu0 }
 0x420   :  { %v13979_v37 = vadd.f32 %v2363_v14, %v2042_v34 }
 0x421   :  { %v11520_v6 = vpop.f32.mrf.mxu0 }
 0x422   :  { %v2393_v19 = vadd.f32 %v11520_v6, %v2045_v63 }
 0x423   :  { %v13981_v20 = vpop.f32.mrf.mxu0 }
 0x425   :  { %v11571_v21 = vpop.f32.mrf.mxu0 }
 0x426   :  { %v2728_v42 = vadd.f32 %v11571_v21, %v2380_v2 }
 0x427   :  { %v2663_v9 = vpop.f32.mrf.mxu0 }
 0x428   :  { %v2726_v22 = vadd.f32 %v2663_v9, %v2378_v43  ;;  %v943_v9 = vadd.f32 %v13856_v39, %v13854_v38 }
 0x429   :  { %v11572_v23 = vpop.f32.mrf.mxu0 }
 0x42a   :  { %v2729_v24 = vadd.f32 %v11572_v23, %v2381_v8 }
 0x42b   :  { %v2666_v48 = vpop.f32.mrf.mxu0 }
 0x42d   :  { %v11575_v25 = vpop.f32.mrf.mxu0 }
 0x42e   :  { %v13983_v27 = vadd.f32 %v11575_v25, %v2384_v53  ;;  %v1335_v25 = vadd.f32 %v13936_v62, %v943_v9 }
 0x42f   :  { %v2679_v28 = vpop.f32.mrf.mxu0 }
 0x431   :  { %v11576_v54 = vpop.f32.mrf.mxu0 }
 0x432   :  { %v13985_v31 = vadd.f32 %v11576_v54, %v2385_v60 }
 0x433   :  { %v13987_v32 = vpop.f32.mrf.mxu0 }
 0x435   :  { %v11579_v34 = vpop.f32.mrf.mxu0 }
 0x436   :  { %v13989_v35 = vadd.f32 %v11579_v34, %v2388_v56  ;;  %v1683_v34 = vadd.f32 %v13953_v41, %v1335_v25  ;;  %v12969_v41 = vld [vmem:[%s15736_s6] sm:$0xff]  }
 0x437   :  { %v13991_v63 = vpop.f32.mrf.mxu0  ;;  %11729 = vmatprep.mubr.bf16.mxu1 %v12969_v41 }
 0x439   :  { %v11580_v52 = vpop.f32.mrf.mxu0 }
 0x43a   :  { %v13993_v2 = vadd.f32 %v11580_v52, %v2389_v3 }
 0x43b   :  { %v13995_v55 = vpop.f32.mrf.mxu0 }
 0x43d   :  { %v11583_v43 = vpop.f32.mrf.mxu0 }
 0x43e   :  { %v13997_v45 = vadd.f32 %v11583_v43, %v2392_v13  ;;  %v2031_v43 = vadd.f32 %v13961_v18, %v1683_v34  ;;  %v12970_v18 = vld [vmem:[%s15736_s6 + $0x10] sm:$0xff]  }
 0x43f   :  { %v13999_v8 = vpop.f32.mrf.mxu0  ;;  %11749 = vmatprep.mubr.bf16.mxu0 %v12970_v18 }
 0x440   :  { %15744 = vst [vmem:[#allocation8_spill] sm:$0xff] %v13997_v45 }
 0x441   :  { %v11584_v58 = vpop.f32.mrf.mxu0 }
 0x442   :  { %v14001_v53 = vadd.f32 %v11584_v58, %v2393_v19  ;;  %v959_v58 = vadd.f32 %v13876_v50, %v13874_v49 }
 0x443   :  { %v14003_v15 = vpop.f32.mrf.mxu0 }
 0x444   :  { %15745 = vst [vmem:[#allocation9_spill] sm:$0xff] %v14001_v53  ;;  %15746 = vst [vmem:[#allocation10_spill] sm:$0xff] %v14003_v15  ;;  %v1339_v38 = vadd.f32 %v13941_v17, %v959_v58 }
 0x445   :  { %v11635_v59 = vpop.f32.mrf.mxu0 }
 0x446   :  { %v1687_v62 = vadd.f32 %v13955_v11, %v1339_v38  ;;  %v3076_v49 = vadd.f32 %v11635_v59, %v2728_v42 }
 0x447   :  { %v3011_v60 = vpop.f32.mrf.mxu0 }
 0x448   :  { %v3074_v15 = vadd.f32 %v3011_v60, %v2726_v22  ;;  %v2035_v17 = vadd.f32 %v13963_v44, %v1687_v62  ;;  %v2734_v62 = vadd.f32 %v13991_v63, %v13975_v7 }
 0x449   :  { %v11636_v51 = vpop.f32.mrf.mxu0 }
 0x44a   :  { %v3077_v11 = vadd.f32 %v11636_v51, %v2729_v24  ;;  %v2383_v42 = vadd.f32 %v13973_v46, %v2035_v17 }
 0x44b   :  { %v3014_v56 = vpop.f32.mrf.mxu0 }
 0x44d   :  { %v11639_v5 = vpop.f32.mrf.mxu0 }
 0x44e   :  { %v3080_v34 = vadd.f32 %v11639_v5, %v13983_v27 }
 0x44f   :  { %v3027_v30 = vpop.f32.mrf.mxu0 }
 0x451   :  { %v11640_v3 = vpop.f32.mrf.mxu0 }
 0x453   :  { %v3030_v33 = vpop.f32.mrf.mxu0 }
 0x455   :  { %v14005_v14 = vpop.f32.mrf.mxu0 }
 0x457   :  { %v14007_v6 = vpop.f32.mrf.mxu0 }
 0x458   :  { %v3082_v7 = vadd.f32 %v14007_v6, %v2734_v62 }
 0x459   :  { %v14009_v13 = vpop.f32.mrf.mxu0 }
 0x45b   :  { %v14011_v21 = vpop.f32.mrf.mxu0 }
 0x45d   :  { %v14013_v19 = vpop.f32.mrf.mxu0 }
 0x45e   :  { %15747 = vst [vmem:[#allocation11_spill] sm:$0xff] %v14013_v19  ;;  %v2379_v19 = vadd.f32 %v13969_v47, %v2031_v43  ;;  %v2730_v47 = vadd.f32 %v2679_v28, %v13971_v61 }
 0x45f   :  { %v14017_v23 = vpop.f32.mrf.mxu0 }
 0x460   :  { %v2727_v45 = vadd.f32 %v2666_v48, %v2379_v19  ;;  %v975_v19 = vadd.f32 %v13896_v4, %v13894_v1 }
 0x461   :  { %v14020_v54 = vpop.f32.mrf.mxu0 }
 0x462   :  { %v3075_v50 = vadd.f32 %v3014_v56, %v2727_v45  ;;  %v3078_v45 = vadd.f32 %v3027_v30, %v2730_v47  ;;  %v1343_v28 = vadd.f32 %v13946_v26, %v975_v19 }
 0x463   :  { %v14023_v52 = vpop.f32.mrf.mxu0 }
 0x464   :  { %v1691_v30 = vadd.f32 %v13957_v0, %v1343_v28 }
 0x465   :  { %v11699_v53 = vpop.f32.mrf.mxu0 }
 0x466   :  { %v14041_v48 = vadd.f32 %v11699_v53, %v3076_v49  ;;  %v2731_v53 = vadd.f32 %v13987_v32, %v2383_v42  ;;  %v991_v49 = vadd.f32 %v13931_v40, %v13913_v16  ;;  %v3084_v42 = vadd.f32 %v14005_v14, %v13989_v35 }
 0x467   :  { %v3359_v39 = vpop.f32.mrf.mxu0 }
 0x468   :  { %v14037_v25 = vadd.f32 %v3359_v39, %v3074_v15  ;;  %v3463_v4 = vmul.f32 %v14041_v48, %v14041_v48  ;;  %v3079_v58 = vadd.f32 %v3030_v33, %v2731_v53  ;;  %v2039_v39 = vadd.f32 %v13965_v29, %v1691_v30 }
 0x469   :  { %v11700_v9 = vpop.f32.mrf.mxu0  ;;  %v1347_v47 = vadd.f32 %v13951_v57, %v991_v49 }
 0x46a   :  { %v3461_v44 = vmul.f32 %v14037_v25, %v14037_v25  ;;  %v14050_v59 = vadd.f32 %v11700_v9, %v3077_v11  ;;  %v3081_v9 = vadd.f32 %v11640_v3, %v13985_v31  ;;  %v2387_v29 = vadd.f32 %v13977_v12, %v2039_v39 }
 0x46b   :  { %v3362_v22 = vpop.f32.mrf.mxu0  ;;  %v1695_v19 = vadd.f32 %v13959_v10, %v1347_v47  ;;  %v3085_v10 = vadd.f32 %v14009_v13, %v13993_v2 }
 0x46c   :  { %v14043_v60 = vadd.f32 %v3362_v22, %v3075_v50  ;;  %v3464_v26 = vmul.f32 %v14050_v59, %v14050_v59  ;;  %v2735_v22 = vadd.f32 %v13995_v55, %v2387_v29 }
 0x46d   :  { %v11703_v15 = vpop.f32.mrf.mxu0 }
 0x46e   :  { %v3438_v61 = vadd.f32 %v14043_v60, %v14037_v25  ;;  %v3462_v24 = vmul.f32 %v14043_v60, %v14043_v60  ;;  %v14072_v41 = vadd.f32 %v11703_v15, %v3080_v34  ;;  %v3083_v15 = vadd.f32 %v14011_v21, %v2735_v22 }
 0x46f   :  { %v3375_v1 = vpop.f32.mrf.mxu0 }
 0x470   :  { %v3439_v46 = vadd.f32 %v3438_v61, %v14041_v48  ;;  %v3477_v51 = vadd.f32 %v3462_v24, %v3461_v44  ;;  %v14061_v56 = vadd.f32 %v3375_v1, %v3078_v45  ;;  %v3467_v16 = vmul.f32 %v14072_v41, %v14072_v41 }
 0x471   :  { %v11704_v43 = vpop.f32.mrf.mxu0  ;;  %v2043_v61 = vadd.f32 %v13967_v36, %v1695_v19  ;;  %v2738_v24 = vadd.f32 %v13999_v8, %v13979_v37 }
 0x472   :  { %v3478_v38 = vadd.f32 %v3477_v51, %v3463_v4  ;;  %v3440_v32 = vadd.f32 %v3439_v46, %v14050_v59  ;;  %v3465_v5 = vmul.f32 %v14061_v56, %v14061_v56  ;;  %v14083_v3 = vadd.f32 %v11704_v43, %v3081_v9  ;;  %v15748_v51 = vld [vmem:[#allocation10_spill] sm:$0xff] }
 0x473   :  { %v3378_v0 = vpop.f32.mrf.mxu0  ;;  %v2391_v4 = vadd.f32 %v13981_v20, %v2043_v61  ;;  %v3086_v36 = vadd.f32 %v14017_v23, %v2738_v24  ;;  %v15749_v23 = vld [vmem:[#allocation8_spill] sm:$0xff] }
 0x474   :  { %v3441_v27 = vadd.f32 %v3440_v32, %v14061_v56  ;;  %v3479_v33 = vadd.f32 %v3478_v38, %v3464_v26  ;;  %v14077_v18 = vadd.f32 %v3378_v0, %v3079_v58  ;;  %v3468_v57 = vmul.f32 %v14083_v3, %v14083_v3  ;;  %v15750_v38 = vld [vmem:[#allocation11_spill] sm:$0xff] }
 0x475   :  { %v11707_v63 = vpop.f32.mrf.mxu0  ;;  %v2739_v30 = vadd.f32 %v15748_v51, %v2391_v4  ;;  %v3088_v32 = vadd.f32 %v15750_v38, %v15749_v23 }
 0x476   :  { %v3480_v31 = vadd.f32 %v3479_v33, %v3465_v5  ;;  %v3442_v50 = vadd.f32 %v3441_v27, %v14077_v18  ;;  %v3466_v17 = vmul.f32 %v14077_v18, %v14077_v18  ;;  %v14107_v28 = vadd.f32 %v11707_v63, %v3084_v42  ;;  %v15751_v5 = vld [vmem:[#allocation9_spill] sm:$0xff] }
 0x477   :  { %v3391_v11 = vpop.f32.mrf.mxu0  ;;  %v3087_v62 = vadd.f32 %v14023_v52, %v2739_v30  ;;  %v3089_v33 = vadd.f32 %v14020_v54, %v15751_v5 }
 0x478   :  { %v3443_v40 = vadd.f32 %v3442_v50, %v14072_v41  ;;  %v3481_v12 = vadd.f32 %v3480_v31, %v3466_v17  ;;  %v14093_v6 = vadd.f32 %v3391_v11, %v3082_v7  ;;  %v3471_v43 = vmul.f32 %v14107_v28, %v14107_v28 }
 0x479   :  { %v11708_v45 = vpop.f32.mrf.mxu0 }
 0x47a   :  { %v3482_v55 = vadd.f32 %v3481_v12, %v3467_v16  ;;  %v3444_v44 = vadd.f32 %v3443_v40, %v14083_v3  ;;  %v3469_v21 = vmul.f32 %v14093_v6, %v14093_v6  ;;  %v14116_v8 = vadd.f32 %v11708_v45, %v3085_v10 }
 0x47b   :  { %v3394_v35 = vpop.f32.mrf.mxu0 }
 0x47c   :  { %v3445_v14 = vadd.f32 %v3444_v44, %v14093_v6  ;;  %v3483_v53 = vadd.f32 %v3482_v55, %v3468_v57  ;;  %v14112_v1 = vadd.f32 %v3394_v35, %v3083_v15  ;;  %v3472_v9 = vmul.f32 %v14116_v8, %v14116_v8 }
 0x47d   :  { %v11711_v46 = vpop.f32.mrf.mxu0 }
 0x47e   :  { %v3484_v37 = vadd.f32 %v3483_v53, %v3469_v21  ;;  %v3446_v2 = vadd.f32 %v3445_v14, %v14112_v1  ;;  %v3470_v13 = vmul.f32 %v14112_v1, %v14112_v1  ;;  %v14135_v49 = vadd.f32 %v11711_v46, %v3088_v32 }
 0x47f   :  { %v3407_v34 = vpop.f32.mrf.mxu0 }
 0x480   :  { %v3447_v58 = vadd.f32 %v3446_v2, %v14107_v28  ;;  %v3485_v20 = vadd.f32 %v3484_v37, %v3470_v13  ;;  %v14125_v26 = vadd.f32 %v3407_v34, %v3086_v36  ;;  %v3475_v54 = vmul.f32 %v14135_v49, %v14135_v49 }
 0x481   :  { %v11712_v39 = vpop.f32.mrf.mxu0 }
 0x482   :  { %v3486_v0 = vadd.f32 %v3485_v20, %v3471_v43  ;;  %v3448_v27 = vadd.f32 %v3447_v58, %v14116_v8  ;;  %v3473_v63 = vmul.f32 %v14125_v26, %v14125_v26  ;;  %v14142_v17 = vadd.f32 %v11712_v39, %v3089_v33 }
 0x483   :  { %v3410_v29 = vpop.f32.mrf.mxu0 }
 0x484   :  { %v3449_v7 = vadd.f32 %v3448_v27, %v14125_v26  ;;  %v3487_v31 = vadd.f32 %v3486_v0, %v3472_v9  ;;  %v14140_v50 = vadd.f32 %v3410_v29, %v3087_v62  ;;  %v3476_v40 = vmul.f32 %v14142_v17, %v14142_v17 }
 0x486   :  { %v3488_v52 = vadd.f32 %v3487_v31, %v3473_v63  ;;  %v3450_v47 = vadd.f32 %v3449_v7, %v14140_v50  ;;  %v3474_v22 = vmul.f32 %v14140_v50, %v14140_v50 }
 0x488   :  { %v3451_v11 = vadd.f32 %v3450_v47, %v14135_v49  ;;  %v3489_v16 = vadd.f32 %v3488_v52, %v3474_v22 }
 0x48a   :  { %v3452_v12 = vadd.f32 %v3451_v11, %v14142_v17  ;;  %v3490_v19 = vadd.f32 %v3489_v16, %v3475_v54 }
 0x48c   :  { %v3453_v42 = vrot.slane %v3452_v12, 4  ;;  %v3491_v45 = vadd.f32 %v3490_v19, %v3476_v40  ;;  %v9427_v40 = vld [vmem:[%s15735_s5] ss:$0 sm:$0xff] }
 0x48e   :  { %v3454_v15 = vadd.f32 %v3453_v42, %v3452_v12  ;;  %v3492_v57 = vrot.slane %v3491_v45, 4 }
 0x490   :  { %v3455_v55 = vrot.slane %v3454_v15, 2  ;;  %v3493_v44 = vadd.f32 %v3492_v57, %v3491_v45 }
 0x492   :  { %v3456_v61 = vadd.f32 %v3455_v55, %v3454_v15  ;;  %v3494_v24 = vrot.slane %v3493_v44, 2 }
 0x494   :  { %v3457_v10 = vrot.slane %v3456_v61, 1  ;;  %v3495_v35 = vadd.f32 %v3494_v24, %v3493_v44 }
 0x496   :  { %v3458_v14 = vadd.f32 %v3457_v10, %v3456_v61  ;;  %v3496_v21 = vrot.slane %v3495_v35, 1 }
 0x498   :  { %v3460_v53 = vmul.f32 0.0078125, %v3458_v14  ;;  %v3497_v4 = vadd.f32 %v3496_v21, %v3495_v35 }
 0x49a   :  { %v3498_v36 = vmul.f32 0.0078125, %v3497_v4  ;;  %v3499_v46 = vmul.f32 %v3460_v53, %v3460_v53  ;;  %v3502_v37 = vsub.f32 %v14037_v25, %v3460_v53  ;;  %v3503_v2 = vsub.f32 %v14043_v60, %v3460_v53 }
 0x49b   :  { %v3504_v13 = vsub.f32 %v14041_v48, %v3460_v53  ;;  %v3505_v51 = vsub.f32 %v14050_v59, %v3460_v53  ;;  %v3506_v30 = vsub.f32 %v14061_v56, %v3460_v53  ;;  %v3507_v34 = vsub.f32 %v14077_v18, %v3460_v53 }
 0x49c   :  { %v3500_v43 = vsub.f32 %v3498_v36, %v3499_v46  ;;  %v3508_v58 = vsub.f32 %v14072_v41, %v3460_v53  ;;  %v3509_v20 = vsub.f32 %v14083_v3, %v3460_v53  ;;  %v3510_v23 = vsub.f32 %v14093_v6, %v3460_v53 }
 0x49d   :  { %v3511_v38 = vsub.f32 %v14112_v1, %v3460_v53  ;;  %v3512_v25 = vsub.f32 %v14107_v28, %v3460_v53  ;;  %v3513_v60 = vsub.f32 %v14116_v8, %v3460_v53  ;;  %v3514_v48 = vsub.f32 %v14125_v26, %v3460_v53  ;;  %v9426_v26 = vld [vmem:[%s15734_s4] ss:$0 sm:$0xff] }
 0x49e   :  { %v3501_v59 = vmax.f32 %v3500_v43, 0.0  ;;  %v3515_v56 = vsub.f32 %v14140_v50, %v3460_v53  ;;  %v3516_v18 = vsub.f32 %v14135_v49, %v3460_v53  ;;  %v3517_v32 = vsub.f32 %v14142_v17, %v3460_v53 }
 0x4a0   :  { %v3518_v41 = vadd.f32 1e-05, %v3501_v59 }
 0x4a2   :  { %13257 = vrsqrt.f32 %v3518_v41 }
 0x4af   :  { %v13258_v3 = vpop.eup %13257 }
 0x4b0   :  { %v3520_v39 = vmul.f32 %v13258_v3, %v3502_v37  ;;  %v3521_v6 = vmul.f32 %v13258_v3, %v3503_v2  ;;  %v3522_v62 = vmul.f32 %v13258_v3, %v3504_v13  ;;  %v3523_v1 = vmul.f32 %v13258_v3, %v3505_v51 }
 0x4b1   :  { %v3524_v9 = vmul.f32 %v13258_v3, %v3506_v30  ;;  %v3525_v28 = vmul.f32 %v13258_v3, %v3507_v34  ;;  %v3526_v0 = vmul.f32 %v13258_v3, %v3508_v58  ;;  %v3527_v8 = vmul.f32 %v13258_v3, %v3509_v20 }
 0x4b2   :  { %v3528_v27 = vmul.f32 %v13258_v3, %v3510_v23  ;;  %v3529_v5 = vmul.f32 %v13258_v3, %v3511_v38  ;;  %v3530_v33 = vmul.f32 %v13258_v3, %v3512_v25  ;;  %v3531_v49 = vmul.f32 %v13258_v3, %v3513_v60 }
 0x4b3   :  { %v3532_v29 = vmul.f32 %v13258_v3, %v3514_v48  ;;  %v3533_v7 = vmul.f32 %v13258_v3, %v3515_v56  ;;  %v3534_v63 = vmul.f32 %v13258_v3, %v3516_v18  ;;  %v3535_v31 = vmul.f32 %v13258_v3, %v3517_v32 }
 0x4b4   :  { %v3543_v50 = vmul.f32 %v9426_v26, %v3520_v39  ;;  %v3544_v52 = vmul.f32 %v9426_v26, %v3521_v6  ;;  %v3545_v17 = vmul.f32 %v9426_v26, %v3522_v62  ;;  %v3546_v47 = vmul.f32 %v9426_v26, %v3523_v1 }
 0x4b5   :  { %v3547_v22 = vmul.f32 %v9426_v26, %v3524_v9  ;;  %v3548_v54 = vmul.f32 %v9426_v26, %v3525_v28  ;;  %v3549_v11 = vmul.f32 %v9426_v26, %v3526_v0  ;;  %v3550_v16 = vmul.f32 %v9426_v26, %v3527_v8 }
 0x4b6   :  { %v3551_v12 = vmul.f32 %v9426_v26, %v3528_v27  ;;  %v3552_v19 = vmul.f32 %v9426_v26, %v3529_v5  ;;  %v3553_v42 = vmul.f32 %v9426_v26, %v3530_v33  ;;  %v3554_v45 = vmul.f32 %v9426_v26, %v3531_v49 }
 0x4b7   :  { %v3555_v15 = vmul.f32 %v9426_v26, %v3532_v29  ;;  %v3556_v57 = vmul.f32 %v9426_v26, %v3533_v7  ;;  %v3557_v55 = vmul.f32 %v9426_v26, %v3534_v63  ;;  %v3558_v44 = vmul.f32 %v9426_v26, %v3535_v31 }
 0x4b8   :  { %v3566_v61 = vadd.f32 %v9427_v40, %v3543_v50  ;;  %v3567_v24 = vadd.f32 %v9427_v40, %v3544_v52  ;;  %v3568_v10 = vadd.f32 %v9427_v40, %v3545_v17  ;;  %v3569_v35 = vadd.f32 %v9427_v40, %v3546_v47 }
 0x4b9   :  { %v3570_v14 = vadd.f32 %v9427_v40, %v3547_v22  ;;  %v3571_v21 = vadd.f32 %v9427_v40, %v3548_v54  ;;  %v3572_v53 = vadd.f32 %v9427_v40, %v3549_v11  ;;  %v3573_v4 = vadd.f32 %v9427_v40, %v3550_v16 }
 0x4ba   :  { %v3574_v36 = vadd.f32 %v9427_v40, %v3551_v12  ;;  %v3575_v46 = vadd.f32 %v9427_v40, %v3552_v19  ;;  %v3576_v37 = vadd.f32 %v9427_v40, %v3553_v42  ;;  %v3577_v2 = vadd.f32 %v9427_v40, %v3554_v45  ;;  %v12973_v12 = vld [vmem:[%s15737_s7 + $0x78] sm:$0xff]   ;;  %v12971_v42 = vld [vmem:[%s15736_s6 + $0x8] sm:$0xff]  }
 0x4bb   :  { %v3578_v13 = vadd.f32 %v9427_v40, %v3555_v15  ;;  %v3579_v51 = vadd.f32 %v9427_v40, %v3556_v57  ;;  %v3580_v30 = vadd.f32 %v9427_v40, %v3557_v55  ;;  %v3581_v34 = vadd.f32 %v9427_v40, %v3558_v44  ;;  %v12981_v19 = vld [vmem:[%s15737_s7 + $0x38] sm:$0xff]   ;;  %v12974_v15 = vld [vmem:[%s15737_s7 + $0x70] sm:$0xff]   ;;  %v12975_v55 = vld [vmem:[%s15737_s7 + $0x68] sm:$0xff]  }
 0x4bc   :  { %vm3582_vm0 = vcmp.gt.f32.partialorder %v3566_v61, 0.0  ;;  %vm3583_vm1 = vcmp.gt.f32.partialorder %v3567_v24, 0.0  ;;  %vm3584_vm2 = vcmp.gt.f32.partialorder %v3568_v10, 0.0  ;;  %vm3585_vm3 = vcmp.gt.f32.partialorder %v3569_v35, 0.0  ;;  %v12972_v45 = vld [vmem:[%s15736_s6 + $0x18] sm:$0xff]   ;;  %v12982_v57 = vld [vmem:[%s15737_s7 + $0x30] sm:$0xff]  }
 0x4bd   :  { %vm3586_vm4 = vcmp.gt.f32.partialorder %v3570_v14, 0.0  ;;  %vm3587_vm5 = vcmp.gt.f32.partialorder %v3571_v21, 0.0  ;;  %vm3588_vm6 = vcmp.gt.f32.partialorder %v3572_v53, 0.0  ;;  %vm3589_vm7 = vcmp.gt.f32.partialorder %v3573_v4, 0.0  ;;  %v12983_v44 = vld [vmem:[%s15737_s7 + $0x28] sm:$0xff]  }
 0x4be   :  { %vm3590_vm8 = vcmp.gt.f32.partialorder %v3574_v36, 0.0  ;;  %vm3591_vm9 = vcmp.gt.f32.partialorder %v3575_v46, 0.0  ;;  %vm3592_vm10 = vcmp.gt.f32.partialorder %v3576_v37, 0.0  ;;  %vm3593_vm11 = vcmp.gt.f32.partialorder %v3577_v2, 0.0 }
 0x4bf   :  { %vm3594_vm12 = vcmp.gt.f32.partialorder %v3578_v13, 0.0  ;;  %vm3595_vm13 = vcmp.gt.f32.partialorder %v3579_v51, 0.0  ;;  %vm3596_vm14 = vcmp.gt.f32.partialorder %v3580_v30, 0.0  ;;  %vm3597_vm15 = vcmp.gt.f32.partialorder %v3581_v34, 0.0 }
 0x4c0   :  { %v3598_v43 = vmul.f32 0.2, %v3566_v61  ;;  %v3599_v58 = vmul.f32 0.2, %v3567_v24  ;;  %v3600_v20 = vmul.f32 0.2, %v3568_v10 }
 0x4c1   :  { %v3601_v23 = vmul.f32 0.2, %v3569_v35  ;;  %v3602_v38 = vmul.f32 0.2, %v3570_v14  ;;  %v3603_v25 = vmul.f32 0.2, %v3571_v21 }
 0x4c2   :  { %v3604_v60 = vmul.f32 0.2, %v3572_v53  ;;  %v3605_v48 = vmul.f32 0.2, %v3573_v4  ;;  %v3606_v59 = vmul.f32 0.2, %v3574_v36  ;;  %v3614_v56 = vsel %vm3582_vm0, %v3566_v61, %v3598_v43 }
 0x4c3   :  { %v3607_v18 = vmul.f32 0.2, %v3575_v46  ;;  %v3608_v32 = vmul.f32 0.2, %v3576_v37  ;;  %v3609_v41 = vmul.f32 0.2, %v3577_v2  ;;  %v3615_v3 = vsel %vm3583_vm1, %v3567_v24, %v3599_v58 }
 0x4c4   :  { %v3610_v39 = vmul.f32 0.2, %v3578_v13  ;;  %v3611_v6 = vmul.f32 0.2, %v3579_v51  ;;  %v3612_v62 = vmul.f32 0.2, %v3580_v30  ;;  %v3616_v1 = vsel %vm3584_vm2, %v3568_v10, %v3600_v20 }
 0x4c5   :  { %v3613_v9 = vmul.f32 0.2, %v3581_v34  ;;  %v3617_v28 = vsel %vm3585_vm3, %v3569_v35, %v3601_v23  ;;  %v3618_v0 = vsel %vm3586_vm4, %v3570_v14, %v3602_v38  ;;  %v3619_v8 = vsel %vm3587_vm5, %v3571_v21, %v3603_v25  ;;  %v12976_v61 = vld [vmem:[%s15737_s7 + $0x60] sm:$0xff]   ;;  %v12977_v10 = vld [vmem:[%s15737_s7 + $0x58] sm:$0xff]   ;;  %v12978_v14 = vld [vmem:[%s15737_s7 + $0x50] sm:$0xff]  }
 0x4c6   :  { %v3620_v26 = vsel %vm3588_vm6, %v3572_v53, %v3604_v60  ;;  %v3621_v27 = vsel %vm3589_vm7, %v3573_v4, %v3605_v48  ;;  %v3622_v5 = vsel %vm3590_vm8, %v3574_v36, %v3606_v59  ;;  %v3623_v33 = vsel %vm3591_vm9, %v3575_v46, %v3607_v18  ;;  %v12984_v24 = vld [vmem:[%s15737_s7 + $0x20] sm:$0xff]   ;;  %v12985_v35 = vld [vmem:[%s15737_s7 + $0x18] sm:$0xff]   ;;  %v12986_v21 = vld [vmem:[%s15737_s7 + $0x10] sm:$0xff]  }
 0x4c7   :  { %v3624_v49 = vsel %vm3592_vm10, %v3576_v37, %v3608_v32  ;;  %v3625_v29 = vsel %vm3593_vm11, %v3577_v2, %v3609_v41  ;;  %v3626_v7 = vsel %vm3594_vm12, %v3578_v13, %v3610_v39  ;;  %v3627_v63 = vsel %vm3595_vm13, %v3579_v51, %v3611_v6  ;;  %v12979_v53 = vld [vmem:[%s15737_s7 + $0x48] sm:$0xff]   ;;  %v12980_v4 = vld [vmem:[%s15737_s7 + $0x40] sm:$0xff]   ;;  %v12991_v59 = vld [vmem:[%s15736_s6 + $0x30] sm:$0xff]  }
 0x4c8   :  { %v3628_v31 = vsel %vm3596_vm14, %v3580_v30, %v3612_v62  ;;  %v3629_v50 = vsel %vm3597_vm15, %v3581_v34, %v3613_v9  ;;  %v14191_v52 = vpack.c.bf16 %v3615_v3, %v3614_v56  ;;  %v14193_v17 = vpack.c.bf16 %v3617_v28, %v3616_v1  ;;  %v12987_v36 = vld [vmem:[%s15737_s7 + $0x8] sm:$0xff]   ;;  %v12988_v46 = vld [vmem:[%s15737_s7] sm:$0xff]   ;;  %v12992_v56 = vld [vmem:[%s15736_s6 + $0x38] sm:$0xff]  }
 0x4c9   :  { %v14195_v47 = vpack.c.bf16 %v3619_v8, %v3618_v0  ;;  %v14197_v22 = vpack.c.bf16 %v3621_v27, %v3620_v26  ;;  %v14199_v54 = vpack.c.bf16 %v3623_v33, %v3622_v5  ;;  %v14201_v11 = vpack.c.bf16 %v3625_v29, %v3624_v49  ;;  %v12989_v25 = vld [vmem:[%s15736_s6 + $0x20] sm:$0xff]   ;;  %v12990_v48 = vld [vmem:[%s15736_s6 + $0x28] sm:$0xff]   ;;  %v13001_v32 = vld [vmem:[%s15737_s7 + $0xb8] sm:$0xff]  }
 0x4ca   :  { %v14203_v16 = vpack.c.bf16 %v3627_v63, %v3626_v7  ;;  %v14205_v40 = vpack.c.bf16 %v3629_v50, %v3628_v31  ;;  %v12993_v18 = vld [vmem:[%s15736_s6 + $0x40] sm:$0xff]   ;;  %v13002_v41 = vld [vmem:[%s15737_s7 + $0xb0] sm:$0xff]   ;;  %v13003_v3 = vld [vmem:[%s15737_s7 + $0xa8] sm:$0xff]   ;;  %vm13313_vm0 = vmmov 0   ;;  %vm6683_vm5 = vcmask 261120  }
 0x4cb   :  { %v13004_v39 = vld [vmem:[%s15737_s7 + $0xa0] sm:$0xff]   ;;  %v13005_v6 = vld [vmem:[%s15737_s7 + $0x98] sm:$0xff]   ;;  %v12994_v62 = vld [vmem:[%s15736_s6 + $0x48] sm:$0xff]  }
 0x4cc   :  { %11713 = vmatprep.subr.bf16.mxu1 %v14205_v40  ;;  %11733 = vmatprep.subr.bf16.mxu0 %v14205_v40  ;;  %v13006_v1 = vld [vmem:[%s15737_s7 + $0x90] sm:$0xff]   ;;  %v13009_v28 = vld [vmem:[%s15737_s7 + $0x88] sm:$0xff]   ;;  %v13010_v0 = vld [vmem:[%s15737_s7 + $0x80] sm:$0xff]  }
 0x4cd   :  { %11714 = vmatpush3.bf16.msra.mxu1 %v14205_v40  ;;  %11734 = vmatpush3.bf16.msra.mxu0 %v14205_v40  ;;  %v12995_v9 = vld [vmem:[%s15736_s6 + $0x50] sm:$0xff]   ;;  %v14394_v8 = vld [vmem:[%s15737_s7 + $0xf8] sm:$0xff]   ;;  %v12997_v27 = vld [vmem:[%s15736_s6 + $0x60] sm:$0xff]  }
 0x4ce   :  { %11715 = vmatprep.subr.bf16.mxu1 %v14203_v16  ;;  %11735 = vmatprep.subr.bf16.mxu0 %v14203_v16  ;;  %v12996_v26 = vld [vmem:[%s15736_s6 + $0x58] sm:$0xff]   ;;  %v12998_v5 = vld [vmem:[%s15736_s6 + $0x68] sm:$0xff]   ;;  %v12999_v33 = vld [vmem:[%s15736_s6 + $0x70] sm:$0xff]  }
 0x4cf   :  { %v13000_v49 = vld [vmem:[%s15736_s6 + $0x78] sm:$0xff]   ;;  %v13007_v29 = vld [vmem:[%s15736_s6 + $0x80] sm:$0xff]  }
 0x4d1   :  { %11716 = vmatpush3.bf16.msra.mxu1 %v14203_v16  ;;  %11736 = vmatpush3.bf16.msra.mxu0 %v14203_v16 }
 0x4d2   :  { %11717 = vmatprep.subr.bf16.mxu1 %v14201_v11  ;;  %11737 = vmatprep.subr.bf16.mxu0 %v14201_v11 }
 0x4d5   :  { %11718 = vmatpush3.bf16.msra.mxu1 %v14201_v11  ;;  %11738 = vmatpush3.bf16.msra.mxu0 %v14201_v11 }
 0x4d6   :  { %11719 = vmatprep.subr.bf16.mxu1 %v14199_v54  ;;  %11739 = vmatprep.subr.bf16.mxu0 %v14199_v54 }
 0x4d9   :  { %11720 = vmatpush3.bf16.msra.mxu1 %v14199_v54  ;;  %11740 = vmatpush3.bf16.msra.mxu0 %v14199_v54 }
 0x4da   :  { %11721 = vmatprep.subr.bf16.mxu1 %v14197_v22  ;;  %11741 = vmatprep.subr.bf16.mxu0 %v14197_v22 }
 0x4dd   :  { %11722 = vmatpush3.bf16.msra.mxu1 %v14197_v22  ;;  %11742 = vmatpush3.bf16.msra.mxu0 %v14197_v22 }
 0x4de   :  { %11723 = vmatprep.subr.bf16.mxu1 %v14195_v47  ;;  %11743 = vmatprep.subr.bf16.mxu0 %v14195_v47 }
 0x4e1   :  { %11724 = vmatpush3.bf16.msra.mxu1 %v14195_v47  ;;  %11744 = vmatpush3.bf16.msra.mxu0 %v14195_v47 }
 0x4e2   :  { %11725 = vmatprep.subr.bf16.mxu1 %v14193_v17  ;;  %11745 = vmatprep.subr.bf16.mxu0 %v14193_v17 }
 0x4e5   :  { %11726 = vmatpush3.bf16.msra.mxu1 %v14193_v17  ;;  %11746 = vmatpush3.bf16.msra.mxu0 %v14193_v17 }
 0x4e6   :  { %11727 = vmatprep.subr.bf16.mxu1 %v14191_v52  ;;  %11747 = vmatprep.subr.bf16.mxu0 %v14191_v52 }
 0x4e9   :  { %11728 = vmatpush3.bf16.msra.mxu1 %v14191_v52  ;;  %11748 = vmatpush3.bf16.msra.mxu0 %v14191_v52 }
 0x4ea   :  { %11753 = vmatprep.subr.bf16.mxu1 %v12973_v12  ;;  %11773 = vmatprep.subr.bf16.mxu0 %v12981_v19 }
 0x4ec   :  { %11730 = vmatmul.mubr.bf16.vlgmr.msra.gmra.mxu1 %v12971_v42  ;;  %11750 = vmatmul.mubr.bf16.vlgmr.msra.gmra.mxu0 %v12972_v45 }
 0x4ed   :  { %11754 = vmatpush3.bf16.msra.mxu1 %v12973_v12  ;;  %11774 = vmatpush3.bf16.msra.mxu0 %v12981_v19 }
 0x4ee   :  { %11755 = vmatprep.subr.bf16.mxu1 %v12974_v15  ;;  %11775 = vmatprep.subr.bf16.mxu0 %v12982_v57 }
 0x4f1   :  { %11756 = vmatpush3.bf16.msra.mxu1 %v12974_v15  ;;  %11776 = vmatpush3.bf16.msra.mxu0 %v12982_v57  ;;  %v13008_v57 = vld [vmem:[%s15736_s6 + $0x88] sm:$0xff]  }
 0x4f2   :  { %11757 = vmatprep.subr.bf16.mxu1 %v12975_v55  ;;  %11777 = vmatprep.subr.bf16.mxu0 %v12983_v44 }
 0x4f5   :  { %11758 = vmatpush3.bf16.msra.mxu1 %v12975_v55  ;;  %11778 = vmatpush3.bf16.msra.mxu0 %v12983_v44  ;;  %v13017_v55 = vld [vmem:[%s15736_s6 + $0x90] sm:$0xff]  }
 0x4f6   :  { %11759 = vmatprep.subr.bf16.mxu1 %v12976_v61  ;;  %11779 = vmatprep.subr.bf16.mxu0 %v12984_v24 }
 0x4f9   :  { %11760 = vmatpush3.bf16.msra.mxu1 %v12976_v61  ;;  %11780 = vmatpush3.bf16.msra.mxu0 %v12984_v24 }
 0x4fa   :  { %11761 = vmatprep.subr.bf16.mxu1 %v12977_v10  ;;  %11781 = vmatprep.subr.bf16.mxu0 %v12985_v35 }
 0x4fd   :  { %11762 = vmatpush3.bf16.msra.mxu1 %v12977_v10  ;;  %11782 = vmatpush3.bf16.msra.mxu0 %v12985_v35 }
 0x4fe   :  { %11763 = vmatprep.subr.bf16.mxu1 %v12978_v14  ;;  %11783 = vmatprep.subr.bf16.mxu0 %v12986_v21 }
 0x501   :  { %11764 = vmatpush3.bf16.msra.mxu1 %v12978_v14  ;;  %11784 = vmatpush3.bf16.msra.mxu0 %v12986_v21 }
 0x502   :  { %11765 = vmatprep.subr.bf16.mxu1 %v12979_v53  ;;  %11785 = vmatprep.subr.bf16.mxu0 %v12987_v36 }
 0x505   :  { %11766 = vmatpush3.bf16.msra.mxu1 %v12979_v53  ;;  %11786 = vmatpush3.bf16.msra.mxu0 %v12987_v36  ;;  %v13012_v53 = vld [vmem:[%s15737_s7 + $0xf0] sm:$0xff]   ;;  %v13014_v36 = vld [vmem:[%s15737_s7 + $0xe0] sm:$0xff]  }
 0x506   :  { %11767 = vmatprep.subr.bf16.mxu1 %v12980_v4  ;;  %11787 = vmatprep.subr.bf16.mxu0 %v12988_v46 }
 0x509   :  { %11768 = vmatpush3.bf16.msra.mxu1 %v12980_v4  ;;  %11788 = vmatpush3.bf16.msra.mxu0 %v12988_v46  ;;  %v13013_v4 = vld [vmem:[%s15737_s7 + $0xe8] sm:$0xff]   ;;  %v13015_v46 = vld [vmem:[%s15737_s7 + $0xd8] sm:$0xff]  }
 0x50a   :  { %11793 = vmatprep.subr.bf16.mxu1 %v14205_v40  ;;  %11813 = vmatprep.subr.bf16.mxu0 %v13001_v32 }
 0x5ac   :  { %v11731_v37 = vpop.f32.mrf.mxu1  ;;  %v11751_v2 = vpop.f32.mrf.mxu0 }
 0x5ae   :  { %v3688_v13 = vpop.f32.mrf.mxu1  ;;  %v3772_v51 = vpop.f32.mrf.mxu0 }
 0x5b0   :  { %v11732_v30 = vpop.f32.mrf.mxu1  ;;  %v11752_v34 = vpop.f32.mrf.mxu0 }
 0x5b1   :  { %v3704_v43 = vpack.c.bf16 %v11732_v30, %v11731_v37  ;;  %v3788_v60 = vpack.c.bf16 %v11752_v34, %v11751_v2  ;;  %v13016_v37 = vld [vmem:[%s15737_s7 + $0xd0] sm:$0xff]   ;;  %v13018_v2 = vld [vmem:[%s15736_s6 + $0x98] sm:$0xff]   ;;  %v13020_v34 = vld [vmem:[%s15737_s7 + $0xc0] sm:$0xff]  }
 0x5b2   :  { %v3691_v58 = vpop.f32.mrf.mxu1  ;;  %v3775_v20 = vpop.f32.mrf.mxu0 }
 0x5b3   :  { %v3703_v23 = vpack.c.bf16 %v3691_v58, %v3688_v13  ;;  %v3787_v38 = vpack.c.bf16 %v3775_v20, %v3772_v51  ;;  %v13019_v13 = vld [vmem:[%s15737_s7 + $0xc8] sm:$0xff]   ;;  %v13027_v51 = vld [vmem:[%s15736_s6 + $0xa0] sm:$0xff]   ;;  %v13021_v20 = vld [vmem:[%s15737_s7 + $0x138] sm:$0xff]  }
 0x5b5   :  { %11769 = vmatprep.mubr.bf16.mxu1 %v3787_v38  ;;  %11789 = vmatprep.mubr.bf16.mxu0 %v3703_v23 }
 0x5b6   :  { %11770 = vmatmul.mubr.bf16.vlgmr.msra.gmra.mxu1 %v3788_v60  ;;  %11790 = vmatmul.mubr.bf16.vlgmr.msra.gmra.mxu0 %v3704_v43  ;;  %v13022_v60 = vld [vmem:[%s15737_s7 + $0x130] sm:$0xff]  }
 0x5b7   :  { %11794 = vmatpush3.bf16.msra.mxu1 %v14205_v40  ;;  %11809 = vmatprep.mubr.bf16.mxu1 %v12989_v25 }
 0x5b8   :  { %11795 = vmatprep.subr.bf16.mxu1 %v14203_v16  ;;  %11814 = vmatpush3.bf16.msra.mxu0 %v13001_v32  ;;  %v13028_v32 = vld [vmem:[%s15736_s6 + $0xa8] sm:$0xff]  }
 0x5b9   :  { %11815 = vmatprep.subr.bf16.mxu0 %v13002_v41 }
 0x5bb   :  { %11796 = vmatpush3.bf16.msra.mxu1 %v14203_v16 }
 0x5bc   :  { %11797 = vmatprep.subr.bf16.mxu1 %v14201_v11  ;;  %11816 = vmatpush3.bf16.msra.mxu0 %v13002_v41  ;;  %v13029_v41 = vld [vmem:[%s15737_s7 + $0x108] sm:$0xff]  }
 0x5bd   :  { %11817 = vmatprep.subr.bf16.mxu0 %v13003_v3 }
 0x5bf   :  { %11798 = vmatpush3.bf16.msra.mxu1 %v14201_v11 }
 0x5c0   :  { %11799 = vmatprep.subr.bf16.mxu1 %v14199_v54  ;;  %11818 = vmatpush3.bf16.msra.mxu0 %v13003_v3  ;;  %v13037_v3 = vld [vmem:[%s15736_s6 + $0xb0] sm:$0xff]  }
 0x5c1   :  { %11819 = vmatprep.subr.bf16.mxu0 %v13004_v39 }
 0x5c3   :  { %11800 = vmatpush3.bf16.msra.mxu1 %v14199_v54 }
 0x5c4   :  { %11801 = vmatprep.subr.bf16.mxu1 %v14197_v22  ;;  %11820 = vmatpush3.bf16.msra.mxu0 %v13004_v39 }
 0x5c5   :  { %11821 = vmatprep.subr.bf16.mxu0 %v13005_v6 }
 0x5c7   :  { %11802 = vmatpush3.bf16.msra.mxu1 %v14197_v22 }
 0x5c8   :  { %11803 = vmatprep.subr.bf16.mxu1 %v14195_v47  ;;  %11822 = vmatpush3.bf16.msra.mxu0 %v13005_v6  ;;  %v13030_v6 = vld [vmem:[%s15737_s7 + $0x100] sm:$0xff]  }
 0x5c9   :  { %11823 = vmatprep.subr.bf16.mxu0 %v13006_v1 }
 0x5cb   :  { %11804 = vmatpush3.bf16.msra.mxu1 %v14195_v47 }
 0x5cc   :  { %11805 = vmatprep.subr.bf16.mxu1 %v14193_v17  ;;  %11824 = vmatpush3.bf16.msra.mxu0 %v13006_v1 }
 0x5cd   :  { %11825 = vmatprep.subr.bf16.mxu0 %v13009_v28 }
 0x5cf   :  { %11806 = vmatpush3.bf16.msra.mxu1 %v14193_v17 }
 0x5d0   :  { %11807 = vmatprep.subr.bf16.mxu1 %v14191_v52  ;;  %11826 = vmatpush3.bf16.msra.mxu0 %v13009_v28 }
 0x5d1   :  { %11827 = vmatprep.subr.bf16.mxu0 %v13010_v0 }
 0x5d3   :  { %11808 = vmatpush3.bf16.msra.mxu1 %v14191_v52 }
 0x5d4   :  { %11833 = vmatprep.subr.bf16.mxu1 %v14205_v40  ;;  %11828 = vmatpush3.bf16.msra.mxu0 %v13010_v0 }
 0x5d5   :  { %11853 = vmatprep.subr.bf16.mxu0 %v14394_v8 }
 0x5d6   :  { %11810 = vmatmul.mubr.bf16.vlgmr.msra.gmra.mxu1 %v12990_v48  ;;  %v13023_v48 = vld [vmem:[%s15737_s7 + $0x128] sm:$0xff]  }
 0x5d7   :  { %11834 = vmatpush3.bf16.msra.mxu1 %v14205_v40  ;;  %11849 = vmatprep.mubr.bf16.mxu1 %v12991_v59  ;;  %v13024_v59 = vld [vmem:[%s15737_s7 + $0x120] sm:$0xff]  }
 0x5d8   :  { %11835 = vmatprep.subr.bf16.mxu1 %v14203_v16 }
 0x5db   :  { %11836 = vmatpush3.bf16.msra.mxu1 %v14203_v16 }
 0x5dc   :  { %11837 = vmatprep.subr.bf16.mxu1 %v14201_v11 }
 0x5df   :  { %11838 = vmatpush3.bf16.msra.mxu1 %v14201_v11 }
 0x5e0   :  { %11839 = vmatprep.subr.bf16.mxu1 %v14199_v54 }
 0x5e3   :  { %11840 = vmatpush3.bf16.msra.mxu1 %v14199_v54 }
 0x5e4   :  { %11841 = vmatprep.subr.bf16.mxu1 %v14197_v22 }
 0x5e7   :  { %11842 = vmatpush3.bf16.msra.mxu1 %v14197_v22 }
 0x5e8   :  { %11843 = vmatprep.subr.bf16.mxu1 %v14195_v47 }
 0x5eb   :  { %11844 = vmatpush3.bf16.msra.mxu1 %v14195_v47 }
 0x5ec   :  { %11845 = vmatprep.subr.bf16.mxu1 %v14193_v17 }
 0x5ef   :  { %11846 = vmatpush3.bf16.msra.mxu1 %v14193_v17 }
 0x5f0   :  { %11847 = vmatprep.subr.bf16.mxu1 %v14191_v52 }
 0x5f3   :  { %11848 = vmatpush3.bf16.msra.mxu1 %v14191_v52 }
 0x5f4   :  { %11873 = vmatprep.subr.bf16.mxu1 %v14205_v40 }
 0x5f6   :  { %11850 = vmatmul.mubr.bf16.vlgmr.msra.gmra.mxu1 %v12992_v56  ;;  %v13025_v56 = vld [vmem:[%s15737_s7 + $0x118] sm:$0xff]  }
 0x5f7   :  { %11874 = vmatpush3.bf16.msra.mxu1 %v14205_v40  ;;  %11889 = vmatprep.mubr.bf16.mxu1 %v12993_v18  ;;  %v13026_v18 = vld [vmem:[%s15737_s7 + $0x110] sm:$0xff]  }
 0x5f8   :  { %11875 = vmatprep.subr.bf16.mxu1 %v14203_v16 }
 0x5fb   :  { %11876 = vmatpush3.bf16.msra.mxu1 %v14203_v16 }
 0x5fc   :  { %11877 = vmatprep.subr.bf16.mxu1 %v14201_v11 }
 0x5ff   :  { %11878 = vmatpush3.bf16.msra.mxu1 %v14201_v11 }
 0x600   :  { %11879 = vmatprep.subr.bf16.mxu1 %v14199_v54 }
 0x603   :  { %11880 = vmatpush3.bf16.msra.mxu1 %v14199_v54 }
 0x604   :  { %11881 = vmatprep.subr.bf16.mxu1 %v14197_v22 }
 0x607   :  { %11882 = vmatpush3.bf16.msra.mxu1 %v14197_v22 }
 0x608   :  { %11883 = vmatprep.subr.bf16.mxu1 %v14195_v47 }
 0x60b   :  { %11884 = vmatpush3.bf16.msra.mxu1 %v14195_v47 }
 0x60c   :  { %11885 = vmatprep.subr.bf16.mxu1 %v14193_v17 }
 0x60f   :  { %11886 = vmatpush3.bf16.msra.mxu1 %v14193_v17 }
 0x610   :  { %11887 = vmatprep.subr.bf16.mxu1 %v14191_v52 }
 0x613   :  { %11888 = vmatpush3.bf16.msra.mxu1 %v14191_v52 }
 0x614   :  { %11913 = vmatprep.subr.bf16.mxu1 %v14205_v40 }
 0x616   :  { %11890 = vmatmul.mubr.bf16.vlgmr.msra.gmra.mxu1 %v12994_v62 }
 0x617   :  { %11914 = vmatpush3.bf16.msra.mxu1 %v14205_v40  ;;  %11929 = vmatprep.mubr.bf16.mxu1 %v12995_v9  ;;  %v13031_v9 = vld [vmem:[%s15737_s7 + $0x178] sm:$0xff]  }
 0x618   :  { %11915 = vmatprep.subr.bf16.mxu1 %v14203_v16 }
 0x61b   :  { %11916 = vmatpush3.bf16.msra.mxu1 %v14203_v16 }
 0x61c   :  { %11917 = vmatprep.subr.bf16.mxu1 %v14201_v11 }
 0x61f   :  { %11918 = vmatpush3.bf16.msra.mxu1 %v14201_v11 }
 0x620   :  { %11919 = vmatprep.subr.bf16.mxu1 %v14199_v54 }
 0x623   :  { %11920 = vmatpush3.bf16.msra.mxu1 %v14199_v54 }
 0x624   :  { %11921 = vmatprep.subr.bf16.mxu1 %v14197_v22 }
 0x627   :  { %11922 = vmatpush3.bf16.msra.mxu1 %v14197_v22 }
 0x628   :  { %11923 = vmatprep.subr.bf16.mxu1 %v14195_v47 }
 0x62b   :  { %11924 = vmatpush3.bf16.msra.mxu1 %v14195_v47 }
 0x62c   :  { %11925 = vmatprep.subr.bf16.mxu1 %v14193_v17 }
 0x62f   :  { %11926 = vmatpush3.bf16.msra.mxu1 %v14193_v17 }
 0x630   :  { %11927 = vmatprep.subr.bf16.mxu1 %v14191_v52 }
 0x633   :  { %11928 = vmatpush3.bf16.msra.mxu1 %v14191_v52 }
 0x634   :  { %11953 = vmatprep.subr.bf16.mxu1 %v14205_v40 }
 0x636   :  { %11930 = vmatmul.mubr.bf16.vlgmr.msra.gmra.mxu1 %v12996_v26  ;;  %v13032_v26 = vld [vmem:[%s15737_s7 + $0x170] sm:$0xff]  }
 0x637   :  { %11954 = vmatpush3.bf16.msra.mxu1 %v14205_v40  ;;  %11969 = vmatprep.mubr.bf16.mxu1 %v12997_v27  ;;  %v13033_v27 = vld [vmem:[%s15737_s7 + $0x168] sm:$0xff]  }
 0x638   :  { %11955 = vmatprep.subr.bf16.mxu1 %v14203_v16 }
 0x63b   :  { %11956 = vmatpush3.bf16.msra.mxu1 %v14203_v16 }
 0x63c   :  { %11957 = vmatprep.subr.bf16.mxu1 %v14201_v11 }
 0x63f   :  { %11958 = vmatpush3.bf16.msra.mxu1 %v14201_v11 }
 0x640   :  { %11959 = vmatprep.subr.bf16.mxu1 %v14199_v54 }
 0x643   :  { %11960 = vmatpush3.bf16.msra.mxu1 %v14199_v54 }
 0x644   :  { %11961 = vmatprep.subr.bf16.mxu1 %v14197_v22 }
 0x647   :  { %11962 = vmatpush3.bf16.msra.mxu1 %v14197_v22 }
 0x648   :  { %11963 = vmatprep.subr.bf16.mxu1 %v14195_v47 }
 0x64b   :  { %11964 = vmatpush3.bf16.msra.mxu1 %v14195_v47 }
 0x64c   :  { %11965 = vmatprep.subr.bf16.mxu1 %v14193_v17 }
 0x64f   :  { %11966 = vmatpush3.bf16.msra.mxu1 %v14193_v17 }
 0x650   :  { %11967 = vmatprep.subr.bf16.mxu1 %v14191_v52 }
 0x653   :  { %11968 = vmatpush3.bf16.msra.mxu1 %v14191_v52 }
 0x654   :  { %11993 = vmatprep.subr.bf16.mxu1 %v14205_v40 }
 0x656   :  { %11970 = vmatmul.mubr.bf16.vlgmr.msra.gmra.mxu1 %v12998_v5  ;;  %v13034_v5 = vld [vmem:[%s15737_s7 + $0x160] sm:$0xff]  }
 0x657   :  { %11994 = vmatpush3.bf16.msra.mxu1 %v14205_v40  ;;  %12009 = vmatprep.mubr.bf16.mxu1 %v12999_v33  ;;  %v13035_v33 = vld [vmem:[%s15737_s7 + $0x158] sm:$0xff]  }
 0x658   :  { %11995 = vmatprep.subr.bf16.mxu1 %v14203_v16 }
 0x65b   :  { %11996 = vmatpush3.bf16.msra.mxu1 %v14203_v16 }
 0x65c   :  { %11997 = vmatprep.subr.bf16.mxu1 %v14201_v11 }
 0x65f   :  { %11998 = vmatpush3.bf16.msra.mxu1 %v14201_v11 }
 0x660   :  { %11999 = vmatprep.subr.bf16.mxu1 %v14199_v54 }
 0x663   :  { %12000 = vmatpush3.bf16.msra.mxu1 %v14199_v54 }
 0x664   :  { %12001 = vmatprep.subr.bf16.mxu1 %v14197_v22 }
 0x667   :  { %12002 = vmatpush3.bf16.msra.mxu1 %v14197_v22 }
 0x668   :  { %12003 = vmatprep.subr.bf16.mxu1 %v14195_v47 }
 0x66b   :  { %12004 = vmatpush3.bf16.msra.mxu1 %v14195_v47 }
 0x66c   :  { %12005 = vmatprep.subr.bf16.mxu1 %v14193_v17 }
 0x66f   :  { %12006 = vmatpush3.bf16.msra.mxu1 %v14193_v17 }
 0x670   :  { %12007 = vmatprep.subr.bf16.mxu1 %v14191_v52 }
 0x673   :  { %12008 = vmatpush3.bf16.msra.mxu1 %v14191_v52 }
 0x674   :  { %12033 = vmatprep.subr.bf16.mxu1 %v14205_v40 }
 0x676   :  { %12010 = vmatmul.mubr.bf16.vlgmr.msra.gmra.mxu1 %v13000_v49  ;;  %v11771_v7 = vpop.f32.mrf.mxu1  ;;  %v11791_v63 = vpop.f32.mrf.mxu0  ;;  %v13036_v49 = vld [vmem:[%s15737_s7 + $0x150] sm:$0xff]  }
 0x677   :  { %v14459_v31 = vadd.f32 %v11791_v63, %v11771_v7  ;;  %12034 = vmatpush3.bf16.msra.mxu1 %v14205_v40  ;;  %12049 = vmatprep.mubr.bf16.mxu1 %v13007_v29  ;;  %v13038_v29 = vld [vmem:[%s15736_s6 + $0xb8] sm:$0xff]   ;;  %v13039_v7 = vld [vmem:[%s15737_s7 + $0x148] sm:$0xff]   ;;  %v13047_v63 = vld [vmem:[%s15736_s6 + $0xc0] sm:$0xff]  }
 0x678   :  { %12035 = vmatprep.subr.bf16.mxu1 %v14203_v16  ;;  %v3888_v50 = vpop.f32.mrf.mxu1  ;;  %v3985_v12 = vpop.f32.mrf.mxu0 }
 0x679   :  { %v14463_v19 = vadd.f32 %v3985_v12, %v3888_v50  ;;  %v13040_v12 = vld [vmem:[%s15737_s7 + $0x140] sm:$0xff]  }
 0x67a   :  { %v11772_v42 = vpop.f32.mrf.mxu1  ;;  %v11792_v45 = vpop.f32.mrf.mxu0 }
 0x67b   :  { %v14465_v15 = vadd.f32 %v11792_v45, %v11772_v42  ;;  %12036 = vmatpush3.bf16.msra.mxu1 %v14203_v16 }
 0x67c   :  { %12037 = vmatprep.subr.bf16.mxu1 %v14201_v11  ;;  %v14486_v44 = vpop.f32.mrf.mxu1 }
 0x67f   :  { %12038 = vmatpush3.bf16.msra.mxu1 %v14201_v11 }
 0x680   :  { %12039 = vmatprep.subr.bf16.mxu1 %v14199_v54 }
 0x683   :  { %12040 = vmatpush3.bf16.msra.mxu1 %v14199_v54 }
 0x684   :  { %12041 = vmatprep.subr.bf16.mxu1 %v14197_v22 }
 0x687   :  { %12042 = vmatpush3.bf16.msra.mxu1 %v14197_v22 }
 0x688   :  { %12043 = vmatprep.subr.bf16.mxu1 %v14195_v47 }
 0x68b   :  { %12044 = vmatpush3.bf16.msra.mxu1 %v14195_v47 }
 0x68c   :  { %12045 = vmatprep.subr.bf16.mxu1 %v14193_v17 }
 0x68f   :  { %12046 = vmatpush3.bf16.msra.mxu1 %v14193_v17 }
 0x690   :  { %12047 = vmatprep.subr.bf16.mxu1 %v14191_v52 }
 0x693   :  { %12048 = vmatpush3.bf16.msra.mxu1 %v14191_v52 }
 0x694   :  { %12073 = vmatprep.subr.bf16.mxu1 %v14205_v40 }
 0x696   :  { %v11811_v61 = vpop.f32.mrf.mxu1  ;;  %12050 = vmatmul.mubr.bf16.vlgmr.msra.gmra.mxu1 %v13008_v57  ;;  %v13041_v57 = vld [vmem:[%s15737_s7 + $0x1b8] sm:$0xff]  }
 0x697   :  { %12074 = vmatpush3.bf16.msra.mxu1 %v14205_v40  ;;  %12089 = vmatprep.mubr.bf16.mxu1 %v13017_v55 }
 0x698   :  { %v4051_v24 = vpop.f32.mrf.mxu1  ;;  %12075 = vmatprep.subr.bf16.mxu1 %v14203_v16 }
 0x69a   :  { %v11812_v10 = vpop.f32.mrf.mxu1 }
 0x69b   :  { %12076 = vmatpush3.bf16.msra.mxu1 %v14203_v16  ;;  %v4067_v21 = vpack.c.bf16 %v11812_v10, %v11811_v61  ;;  %v13042_v10 = vld [vmem:[%s15737_s7 + $0x1b0] sm:$0xff]  }
 0x69c   :  { %v4054_v35 = vpop.f32.mrf.mxu1  ;;  %12077 = vmatprep.subr.bf16.mxu1 %v14201_v11 }
 0x69d   :  { %v4066_v14 = vpack.c.bf16 %v4054_v35, %v4051_v24  ;;  %v13043_v35 = vld [vmem:[%s15737_s7 + $0x1a8] sm:$0xff]  }
 0x69f   :  { %11829 = vmatprep.mubr.bf16.mxu0 %v4066_v14  ;;  %12078 = vmatpush3.bf16.msra.mxu1 %v14201_v11  ;;  %v13044_v14 = vld [vmem:[%s15737_s7 + $0x1a0] sm:$0xff]  }
 0x6a0   :  { %11830 = vmatmul.mubr.bf16.vlgmr.msra.gmra.mxu0 %v4067_v21  ;;  %12079 = vmatprep.subr.bf16.mxu1 %v14199_v54  ;;  %v13045_v21 = vld [vmem:[%s15737_s7 + $0x198] sm:$0xff]  }
 0x6a1   :  { %11854 = vmatpush3.bf16.msra.mxu0 %v14394_v8 }
 0x6a2   :  { %11855 = vmatprep.subr.bf16.mxu0 %v13012_v53 }
 0x6a3   :  { %12080 = vmatpush3.bf16.msra.mxu1 %v14199_v54 }
 0x6a4   :  { %12081 = vmatprep.subr.bf16.mxu1 %v14197_v22 }
 0x6a5   :  { %11856 = vmatpush3.bf16.msra.mxu0 %v13012_v53  ;;  %v13046_v53 = vld [vmem:[%s15737_s7 + $0x190] sm:$0xff]  }
 0x6a6   :  { %11857 = vmatprep.subr.bf16.mxu0 %v13013_v4 }
 0x6a7   :  { %12082 = vmatpush3.bf16.msra.mxu1 %v14197_v22 }
 0x6a8   :  { %12083 = vmatprep.subr.bf16.mxu1 %v14195_v47 }
 0x6a9   :  { %11858 = vmatpush3.bf16.msra.mxu0 %v13013_v4  ;;  %v13048_v4 = vld [vmem:[%s15736_s6 + $0xc8] sm:$0xff]  }
 0x6aa   :  { %11859 = vmatprep.subr.bf16.mxu0 %v13014_v36 }
 0x6ab   :  { %12084 = vmatpush3.bf16.msra.mxu1 %v14195_v47 }
 0x6ac   :  { %12085 = vmatprep.subr.bf16.mxu1 %v14193_v17 }
 0x6ad   :  { %11860 = vmatpush3.bf16.msra.mxu0 %v13014_v36  ;;  %v13049_v36 = vld [vmem:[%s15737_s7 + $0x188] sm:$0xff]  }
 0x6ae   :  { %11861 = vmatprep.subr.bf16.mxu0 %v13015_v46 }
 0x6af   :  { %12086 = vmatpush3.bf16.msra.mxu1 %v14193_v17 }
 0x6b0   :  { %12087 = vmatprep.subr.bf16.mxu1 %v14191_v52 }
 0x6b1   :  { %11862 = vmatpush3.bf16.msra.mxu0 %v13015_v46  ;;  %v13057_v46 = vld [vmem:[%s15736_s6 + $0xd0] sm:$0xff]  }
 0x6b2   :  { %11863 = vmatprep.subr.bf16.mxu0 %v13016_v37 }
 0x6b3   :  { %12088 = vmatpush3.bf16.msra.mxu1 %v14191_v52 }
 0x6b4   :  { %12113 = vmatprep.subr.bf16.mxu1 %v14205_v40 }
 0x6b5   :  { %11864 = vmatpush3.bf16.msra.mxu0 %v13016_v37 }
 0x6b6   :  { %v11851_v30 = vpop.f32.mrf.mxu1  ;;  %12090 = vmatmul.mubr.bf16.vlgmr.msra.gmra.mxu1 %v13018_v2  ;;  %11865 = vmatprep.subr.bf16.mxu0 %v13019_v13  ;;  %v13050_v2 = vld [vmem:[%s15737_s7 + $0x180] sm:$0xff]  }
 0x6b7   :  { %12114 = vmatpush3.bf16.msra.mxu1 %v14205_v40  ;;  %12129 = vmatprep.mubr.bf16.mxu1 %v13027_v51 }
 0x6b8   :  { %v4237_v43 = vpop.f32.mrf.mxu1  ;;  %12115 = vmatprep.subr.bf16.mxu1 %v14203_v16 }
 0x6b9   :  { %11866 = vmatpush3.bf16.msra.mxu0 %v13019_v13 }
 0x6ba   :  { %v11852_v58 = vpop.f32.mrf.mxu1  ;;  %11867 = vmatprep.subr.bf16.mxu0 %v13020_v34 }
 0x6bb   :  { %12116 = vmatpush3.bf16.msra.mxu1 %v14203_v16  ;;  %v4253_v25 = vpack.c.bf16 %v11852_v58, %v11851_v30  ;;  %v13051_v30 = vld [vmem:[%s15737_s7 + $0x1f8] sm:$0xff]  }
 0x6bc   :  { %v4240_v23 = vpop.f32.mrf.mxu1  ;;  %12117 = vmatprep.subr.bf16.mxu1 %v14201_v11 }
 0x6bd   :  { %v4252_v38 = vpack.c.bf16 %v4240_v23, %v4237_v43  ;;  %11868 = vmatpush3.bf16.msra.mxu0 %v13020_v34  ;;  %v13053_v23 = vld [vmem:[%s15737_s7 + $0x1e8] sm:$0xff]  }
 0x6be   :  { %11893 = vmatprep.subr.bf16.mxu0 %v13021_v20 }
 0x6bf   :  { %11869 = vmatprep.mubr.bf16.mxu0 %v4252_v38  ;;  %12118 = vmatpush3.bf16.msra.mxu1 %v14201_v11  ;;  %v13054_v38 = vld [vmem:[%s15737_s7 + $0x1e0] sm:$0xff]  }
 0x6c0   :  { %11870 = vmatmul.mubr.bf16.vlgmr.msra.gmra.mxu0 %v4253_v25  ;;  %12119 = vmatprep.subr.bf16.mxu1 %v14199_v54  ;;  %v13055_v25 = vld [vmem:[%s15737_s7 + $0x1d8] sm:$0xff]  }
 0x6c1   :  { %11894 = vmatpush3.bf16.msra.mxu0 %v13021_v20  ;;  %v13052_v20 = vld [vmem:[%s15737_s7 + $0x1f0] sm:$0xff]  }
 0x6c2   :  { %11895 = vmatprep.subr.bf16.mxu0 %v13022_v60 }
 0x6c3   :  { %12120 = vmatpush3.bf16.msra.mxu1 %v14199_v54 }
 0x6c4   :  { %12121 = vmatprep.subr.bf16.mxu1 %v14197_v22 }
 0x6c5   :  { %11896 = vmatpush3.bf16.msra.mxu0 %v13022_v60  ;;  %v13056_v60 = vld [vmem:[%s15737_s7 + $0x1d0] sm:$0xff]  }
 0x6c6   :  { %11897 = vmatprep.subr.bf16.mxu0 %v13023_v48 }
 0x6c7   :  { %12122 = vmatpush3.bf16.msra.mxu1 %v14197_v22 }
 0x6c8   :  { %12123 = vmatprep.subr.bf16.mxu1 %v14195_v47 }
 0x6c9   :  { %11898 = vmatpush3.bf16.msra.mxu0 %v13023_v48  ;;  %v13058_v48 = vld [vmem:[%s15736_s6 + $0xd8] sm:$0xff]  }
 0x6ca   :  { %11899 = vmatprep.subr.bf16.mxu0 %v13024_v59 }
 0x6cb   :  { %12124 = vmatpush3.bf16.msra.mxu1 %v14195_v47 }
 0x6cc   :  { %12125 = vmatprep.subr.bf16.mxu1 %v14193_v17 }
 0x6cd   :  { %11900 = vmatpush3.bf16.msra.mxu0 %v13024_v59  ;;  %v13059_v59 = vld [vmem:[%s15737_s7 + $0x1c8] sm:$0xff]  }
 0x6ce   :  { %11901 = vmatprep.subr.bf16.mxu0 %v13025_v56 }
 0x6cf   :  { %12126 = vmatpush3.bf16.msra.mxu1 %v14193_v17 }
 0x6d0   :  { %12127 = vmatprep.subr.bf16.mxu1 %v14191_v52 }
 0x6d1   :  { %11902 = vmatpush3.bf16.msra.mxu0 %v13025_v56  ;;  %v13067_v56 = vld [vmem:[%s15736_s6 + $0xe0] sm:$0xff]  }
 0x6d2   :  { %11903 = vmatprep.subr.bf16.mxu0 %v13026_v18 }
 0x6d3   :  { %12128 = vmatpush3.bf16.msra.mxu1 %v14191_v52 }
 0x6d4   :  { %12153 = vmatprep.subr.bf16.mxu1 %v14205_v40 }
 0x6d5   :  { %11904 = vmatpush3.bf16.msra.mxu0 %v13026_v18 }
 0x6d6   :  { %v11891_v39 = vpop.f32.mrf.mxu1  ;;  %12130 = vmatmul.mubr.bf16.vlgmr.msra.gmra.mxu1 %v13028_v32  ;;  %11905 = vmatprep.subr.bf16.mxu0 %v13029_v41  ;;  %v13060_v32 = vld [vmem:[%s15737_s7 + $0x1c0] sm:$0xff]  }
 0x6d7   :  { %12154 = vmatpush3.bf16.msra.mxu1 %v14205_v40  ;;  %12169 = vmatprep.mubr.bf16.mxu1 %v13037_v3 }
 0x6d8   :  { %v4423_v62 = vpop.f32.mrf.mxu1  ;;  %12155 = vmatprep.subr.bf16.mxu1 %v14203_v16 }
 0x6d9   :  { %11906 = vmatpush3.bf16.msra.mxu0 %v13029_v41 }
 0x6da   :  { %v11892_v1 = vpop.f32.mrf.mxu1  ;;  %11907 = vmatprep.subr.bf16.mxu0 %v13030_v6 }
 0x6db   :  { %12156 = vmatpush3.bf16.msra.mxu1 %v14203_v16  ;;  %v4439_v8 = vpack.c.bf16 %v11892_v1, %v11891_v39  ;;  %v13061_v39 = vld [vmem:[%s15737_s7 + $0x238] sm:$0xff]  }
 0x6dc   :  { %v4426_v28 = vpop.f32.mrf.mxu1  ;;  %12157 = vmatprep.subr.bf16.mxu1 %v14201_v11 }
 0x6dd   :  { %v4438_v0 = vpack.c.bf16 %v4426_v28, %v4423_v62  ;;  %11908 = vmatpush3.bf16.msra.mxu0 %v13030_v6  ;;  %v13063_v28 = vld [vmem:[%s15737_s7 + $0x228] sm:$0xff]  }
 0x6de   :  { %11933 = vmatprep.subr.bf16.mxu0 %v13031_v9 }
 0x6df   :  { %11909 = vmatprep.mubr.bf16.mxu0 %v4438_v0  ;;  %12158 = vmatpush3.bf16.msra.mxu1 %v14201_v11  ;;  %v13064_v0 = vld [vmem:[%s15737_s7 + $0x220] sm:$0xff]  }
 0x6e0   :  { %11910 = vmatmul.mubr.bf16.vlgmr.msra.gmra.mxu0 %v4439_v8  ;;  %12159 = vmatprep.subr.bf16.mxu1 %v14199_v54  ;;  %v13065_v8 = vld [vmem:[%s15737_s7 + $0x218] sm:$0xff]  }
 0x6e1   :  { %11934 = vmatpush3.bf16.msra.mxu0 %v13031_v9  ;;  %v13062_v9 = vld [vmem:[%s15737_s7 + $0x230] sm:$0xff]  }
 0x6e2   :  { %11935 = vmatprep.subr.bf16.mxu0 %v13032_v26 }
 0x6e3   :  { %12160 = vmatpush3.bf16.msra.mxu1 %v14199_v54 }
 0x6e4   :  { %12161 = vmatprep.subr.bf16.mxu1 %v14197_v22 }
 0x6e5   :  { %11936 = vmatpush3.bf16.msra.mxu0 %v13032_v26  ;;  %v13066_v26 = vld [vmem:[%s15737_s7 + $0x210] sm:$0xff]  }
 0x6e6   :  { %11937 = vmatprep.subr.bf16.mxu0 %v13033_v27 }
 0x6e7   :  { %12162 = vmatpush3.bf16.msra.mxu1 %v14197_v22 }
 0x6e8   :  { %12163 = vmatprep.subr.bf16.mxu1 %v14195_v47 }
 0x6e9   :  { %11938 = vmatpush3.bf16.msra.mxu0 %v13033_v27  ;;  %v13068_v27 = vld [vmem:[%s15736_s6 + $0xe8] sm:$0xff]  }
 0x6ea   :  { %11939 = vmatprep.subr.bf16.mxu0 %v13034_v5 }
 0x6eb   :  { %12164 = vmatpush3.bf16.msra.mxu1 %v14195_v47 }
 0x6ec   :  { %12165 = vmatprep.subr.bf16.mxu1 %v14193_v17 }
 0x6ed   :  { %11940 = vmatpush3.bf16.msra.mxu0 %v13034_v5  ;;  %v13069_v5 = vld [vmem:[%s15737_s7 + $0x208] sm:$0xff]  }
 0x6ee   :  { %11941 = vmatprep.subr.bf16.mxu0 %v13035_v33 }
 0x6ef   :  { %12166 = vmatpush3.bf16.msra.mxu1 %v14193_v17 }
 0x6f0   :  { %12167 = vmatprep.subr.bf16.mxu1 %v14191_v52 }
 0x6f1   :  { %11942 = vmatpush3.bf16.msra.mxu0 %v13035_v33  ;;  %v13077_v33 = vld [vmem:[%s15736_s6 + $0xf0] sm:$0xff]  }
 0x6f2   :  { %11943 = vmatprep.subr.bf16.mxu0 %v13036_v49 }
 0x6f3   :  { %12168 = vmatpush3.bf16.msra.mxu1 %v14191_v52 }
 0x6f4   :  { %12193 = vmatprep.subr.bf16.mxu1 %v14205_v40 }
 0x6f5   :  { %11944 = vmatpush3.bf16.msra.mxu0 %v13036_v49 }
 0x6f6   :  { %v11931_v50 = vpop.f32.mrf.mxu1  ;;  %12170 = vmatmul.mubr.bf16.vlgmr.msra.gmra.mxu1 %v13038_v29  ;;  %11945 = vmatprep.subr.bf16.mxu0 %v13039_v7  ;;  %v13070_v29 = vld [vmem:[%s15737_s7 + $0x200] sm:$0xff]  }
 0x6f7   :  { %12194 = vmatpush3.bf16.msra.mxu1 %v14205_v40  ;;  %12209 = vmatprep.mubr.bf16.mxu1 %v13047_v63 }
 0x6f8   :  { %v4609_v42 = vpop.f32.mrf.mxu1  ;;  %12195 = vmatprep.subr.bf16.mxu1 %v14203_v16 }
 0x6f9   :  { %11946 = vmatpush3.bf16.msra.mxu0 %v13039_v7 }
 0x6fa   :  { %v11932_v45 = vpop.f32.mrf.mxu1  ;;  %11947 = vmatprep.subr.bf16.mxu0 %v13040_v12 }
 0x6fb   :  { %12196 = vmatpush3.bf16.msra.mxu1 %v14203_v16  ;;  %v4625_v24 = vpack.c.bf16 %v11932_v45, %v11931_v50  ;;  %v13071_v50 = vld [vmem:[%s15737_s7 + $0x278] sm:$0xff]   ;;  %v14770_v45 = vpop.f32.mrf.mxu0 }
 0x6fc   :  { %v4612_v55 = vpop.f32.mrf.mxu1  ;;  %12197 = vmatprep.subr.bf16.mxu1 %v14201_v11 }
 0x6fd   :  { %v4624_v61 = vpack.c.bf16 %v4612_v55, %v4609_v42  ;;  %11948 = vmatpush3.bf16.msra.mxu0 %v13040_v12 }
 0x6fe   :  { %11973 = vmatprep.subr.bf16.mxu0 %v13041_v57 }
 0x6ff   :  { %11949 = vmatprep.mubr.bf16.mxu0 %v4624_v61  ;;  %12198 = vmatpush3.bf16.msra.mxu1 %v14201_v11 }
 0x700   :  { %11950 = vmatmul.mubr.bf16.vlgmr.msra.gmra.mxu0 %v4625_v24  ;;  %12199 = vmatprep.subr.bf16.mxu1 %v14199_v54  ;;  %v13073_v24 = vld [vmem:[%s15737_s7 + $0x268] sm:$0xff]  }
 0x701   :  { %11974 = vmatpush3.bf16.msra.mxu0 %v13041_v57  ;;  %v13072_v57 = vld [vmem:[%s15737_s7 + $0x270] sm:$0xff]  }
 0x702   :  { %11975 = vmatprep.subr.bf16.mxu0 %v13042_v10 }
 0x703   :  { %12200 = vmatpush3.bf16.msra.mxu1 %v14199_v54 }
 0x704   :  { %12201 = vmatprep.subr.bf16.mxu1 %v14197_v22 }
 0x705   :  { %11976 = vmatpush3.bf16.msra.mxu0 %v13042_v10 }
 0x706   :  { %11977 = vmatprep.subr.bf16.mxu0 %v13043_v35 }
 0x707   :  { %12202 = vmatpush3.bf16.msra.mxu1 %v14197_v22 }
 0x708   :  { %12203 = vmatprep.subr.bf16.mxu1 %v14195_v47 }
 0x709   :  { %11978 = vmatpush3.bf16.msra.mxu0 %v13043_v35 }
 0x70a   :  { %11979 = vmatprep.subr.bf16.mxu0 %v13044_v14 }
 0x70b   :  { %12204 = vmatpush3.bf16.msra.mxu1 %v14195_v47 }
 0x70c   :  { %12205 = vmatprep.subr.bf16.mxu1 %v14193_v17 }
 0x70d   :  { %11980 = vmatpush3.bf16.msra.mxu0 %v13044_v14 }
 0x70e   :  { %11981 = vmatprep.subr.bf16.mxu0 %v13045_v21 }
 0x70f   :  { %12206 = vmatpush3.bf16.msra.mxu1 %v14193_v17 }
 0x710   :  { %12207 = vmatprep.subr.bf16.mxu1 %v14191_v52 }
 0x711   :  { %11982 = vmatpush3.bf16.msra.mxu0 %v13045_v21 }
 0x712   :  { %11983 = vmatprep.subr.bf16.mxu0 %v13046_v53 }
 0x713   :  { %12208 = vmatpush3.bf16.msra.mxu1 %v14191_v52 }
 0x714   :  { %12233 = vmatprep.subr.bf16.mxu1 %v14205_v40 }
 0x715   :  { %11984 = vmatpush3.bf16.msra.mxu0 %v13046_v53  ;;  %v13081_v53 = vld [vmem:[%s15737_s7 + $0x2b8] sm:$0xff]  }
 0x716   :  { %v11971_v37 = vpop.f32.mrf.mxu1  ;;  %12210 = vmatmul.mubr.bf16.vlgmr.msra.gmra.mxu1 %v13048_v4  ;;  %11985 = vmatprep.subr.bf16.mxu0 %v13049_v36 }
 0x717   :  { %12234 = vmatpush3.bf16.msra.mxu1 %v14205_v40  ;;  %12249 = vmatprep.mubr.bf16.mxu1 %v13057_v46 }
 0x718   :  { %v4795_v13 = vpop.f32.mrf.mxu1  ;;  %12235 = vmatprep.subr.bf16.mxu1 %v14203_v16 }
 0x719   :  { %11986 = vmatpush3.bf16.msra.mxu0 %v13049_v36 }
 0x71a   :  { %v11972_v51 = vpop.f32.mrf.mxu1  ;;  %11987 = vmatprep.subr.bf16.mxu0 %v13050_v2 }
 0x71b   :  { %12236 = vmatpush3.bf16.msra.mxu1 %v14203_v16  ;;  %v4811_v58 = vpack.c.bf16 %v11972_v51, %v11971_v37  ;;  %v13082_v37 = vld [vmem:[%s15737_s7 + $0x2b0] sm:$0xff]  }
 0x71c   :  { %v4798_v34 = vpop.f32.mrf.mxu1  ;;  %12237 = vmatprep.subr.bf16.mxu1 %v14201_v11 }
 0x71d   :  { %v4810_v43 = vpack.c.bf16 %v4798_v34, %v4795_v13  ;;  %11988 = vmatpush3.bf16.msra.mxu0 %v13050_v2  ;;  %v3989_v34 = vadd.f32 %v14770_v45, %v14486_v44  ;;  %v13086_v44 = vld [vmem:[%s15737_s7 + $0x290] sm:$0xff]  }
 0x71e   :  { %12013 = vmatprep.subr.bf16.mxu0 %v13051_v30 }
 0x71f   :  { %11989 = vmatprep.mubr.bf16.mxu0 %v4810_v43  ;;  %12238 = vmatpush3.bf16.msra.mxu1 %v14201_v11 }
 0x720   :  { %11990 = vmatmul.mubr.bf16.vlgmr.msra.gmra.mxu0 %v4811_v58  ;;  %12239 = vmatprep.subr.bf16.mxu1 %v14199_v54 }
 0x721   :  { %12014 = vmatpush3.bf16.msra.mxu0 %v13051_v30  ;;  %v13083_v30 = vld [vmem:[%s15737_s7 + $0x2a8] sm:$0xff]  }
 0x722   :  { %12015 = vmatprep.subr.bf16.mxu0 %v13052_v20 }
 0x723   :  { %12240 = vmatpush3.bf16.msra.mxu1 %v14199_v54 }
 0x724   :  { %12241 = vmatprep.subr.bf16.mxu1 %v14197_v22 }
 0x725   :  { %12016 = vmatpush3.bf16.msra.mxu0 %v13052_v20 }
 0x726   :  { %12017 = vmatprep.subr.bf16.mxu0 %v13053_v23 }
 0x727   :  { %12242 = vmatpush3.bf16.msra.mxu1 %v14197_v22 }
 0x728   :  { %12243 = vmatprep.subr.bf16.mxu1 %v14195_v47 }
 0x729   :  { %12018 = vmatpush3.bf16.msra.mxu0 %v13053_v23 }
 0x72a   :  { %12019 = vmatprep.subr.bf16.mxu0 %v13054_v38 }
 0x72b   :  { %12244 = vmatpush3.bf16.msra.mxu1 %v14195_v47 }
 0x72c   :  { %12245 = vmatprep.subr.bf16.mxu1 %v14193_v17 }
 0x72d   :  { %12020 = vmatpush3.bf16.msra.mxu0 %v13054_v38 }
 0x72e   :  { %12021 = vmatprep.subr.bf16.mxu0 %v13055_v25 }
 0x72f   :  { %12246 = vmatpush3.bf16.msra.mxu1 %v14193_v17 }
 0x730   :  { %12247 = vmatprep.subr.bf16.mxu1 %v14191_v52 }
 0x731   :  { %12022 = vmatpush3.bf16.msra.mxu0 %v13055_v25  ;;  %v13084_v25 = vld [vmem:[%s15737_s7 + $0x2a0] sm:$0xff]  }
 0x732   :  { %12023 = vmatprep.subr.bf16.mxu0 %v13056_v60 }
 0x733   :  { %12248 = vmatpush3.bf16.msra.mxu1 %v14191_v52 }
 0x734   :  { %12273 = vmatprep.subr.bf16.mxu1 %v14205_v40 }
 0x735   :  { %12024 = vmatpush3.bf16.msra.mxu0 %v13056_v60 }
 0x736   :  { %v12011_v18 = vpop.f32.mrf.mxu1  ;;  %12250 = vmatmul.mubr.bf16.vlgmr.msra.gmra.mxu1 %v13058_v48  ;;  %12025 = vmatprep.subr.bf16.mxu0 %v13059_v59  ;;  %v13085_v48 = vld [vmem:[%s15737_s7 + $0x298] sm:$0xff]  }
 0x737   :  { %12274 = vmatpush3.bf16.msra.mxu1 %v14205_v40  ;;  %12289 = vmatprep.mubr.bf16.mxu1 %v13067_v56 }
 0x738   :  { %v4981_v41 = vpop.f32.mrf.mxu1  ;;  %12275 = vmatprep.subr.bf16.mxu1 %v14203_v16 }
 0x739   :  { %12026 = vmatpush3.bf16.msra.mxu0 %v13059_v59  ;;  %v13087_v59 = vld [vmem:[%s15737_s7 + $0x288] sm:$0xff]  }
 0x73a   :  { %v12012_v3 = vpop.f32.mrf.mxu1  ;;  %12027 = vmatprep.subr.bf16.mxu0 %v13060_v32 }
 0x73b   :  { %12276 = vmatpush3.bf16.msra.mxu1 %v14203_v16  ;;  %v4997_v1 = vpack.c.bf16 %v12012_v3, %v12011_v18  ;;  %v13088_v18 = vld [vmem:[%s15737_s7 + $0x280] sm:$0xff]   ;;  %v13089_v3 = vld [vmem:[%s15737_s7 + $0x2f8] sm:$0xff]  }
 0x73c   :  { %v4984_v6 = vpop.f32.mrf.mxu1  ;;  %12277 = vmatprep.subr.bf16.mxu1 %v14201_v11 }
 0x73d   :  { %v4996_v62 = vpack.c.bf16 %v4984_v6, %v4981_v41  ;;  %12028 = vmatpush3.bf16.msra.mxu0 %v13060_v32 }
 0x73e   :  { %12053 = vmatprep.subr.bf16.mxu0 %v13061_v39 }
 0x73f   :  { %12029 = vmatprep.mubr.bf16.mxu0 %v4996_v62  ;;  %12278 = vmatpush3.bf16.msra.mxu1 %v14201_v11 }
 0x740   :  { %12030 = vmatmul.mubr.bf16.vlgmr.msra.gmra.mxu0 %v4997_v1  ;;  %12279 = vmatprep.subr.bf16.mxu1 %v14199_v54  ;;  %v13090_v1 = vld [vmem:[%s15737_s7 + $0x2f0] sm:$0xff]  }
 0x741   :  { %12054 = vmatpush3.bf16.msra.mxu0 %v13061_v39 }
 0x742   :  { %12055 = vmatprep.subr.bf16.mxu0 %v13062_v9 }
 0x743   :  { %12280 = vmatpush3.bf16.msra.mxu1 %v14199_v54 }
 0x744   :  { %12281 = vmatprep.subr.bf16.mxu1 %v14197_v22 }
 0x745   :  { %12056 = vmatpush3.bf16.msra.mxu0 %v13062_v9 }
 0x746   :  { %12057 = vmatprep.subr.bf16.mxu0 %v13063_v28 }
 0x747   :  { %12282 = vmatpush3.bf16.msra.mxu1 %v14197_v22 }
 0x748   :  { %12283 = vmatprep.subr.bf16.mxu1 %v14195_v47 }
 0x749   :  { %12058 = vmatpush3.bf16.msra.mxu0 %v13063_v28 }
 0x74a   :  { %12059 = vmatprep.subr.bf16.mxu0 %v13064_v0 }
 0x74b   :  { %12284 = vmatpush3.bf16.msra.mxu1 %v14195_v47 }
 0x74c   :  { %12285 = vmatprep.subr.bf16.mxu1 %v14193_v17 }
 0x74d   :  { %12060 = vmatpush3.bf16.msra.mxu0 %v13064_v0 }
 0x74e   :  { %12061 = vmatprep.subr.bf16.mxu0 %v13065_v8 }
 0x74f   :  { %12286 = vmatpush3.bf16.msra.mxu1 %v14193_v17 }
 0x750   :  { %12287 = vmatprep.subr.bf16.mxu1 %v14191_v52 }
 0x751   :  { %12062 = vmatpush3.bf16.msra.mxu0 %v13065_v8  ;;  %v13091_v8 = vld [vmem:[%s15737_s7 + $0x2e8] sm:$0xff]  }
 0x752   :  { %12063 = vmatprep.subr.bf16.mxu0 %v13066_v26 }
 0x753   :  { %12288 = vmatpush3.bf16.msra.mxu1 %v14191_v52 }
 0x754   :  { %12313 = vmatprep.subr.bf16.mxu1 %v14205_v40 }
 0x755   :  { %12064 = vmatpush3.bf16.msra.mxu0 %v13066_v26 }
 0x756   :  { %v12051_v49 = vpop.f32.mrf.mxu1  ;;  %12290 = vmatmul.mubr.bf16.vlgmr.msra.gmra.mxu1 %v13068_v27  ;;  %12065 = vmatprep.subr.bf16.mxu0 %v13069_v5 }
 0x757   :  { %12314 = vmatpush3.bf16.msra.mxu1 %v14205_v40  ;;  %12329 = vmatprep.mubr.bf16.mxu1 %v13077_v33 }
 0x758   :  { %v5167_v7 = vpop.f32.mrf.mxu1  ;;  %12315 = vmatprep.subr.bf16.mxu1 %v14203_v16 }
 0x759   :  { %12066 = vmatpush3.bf16.msra.mxu0 %v13069_v5 }
 0x75a   :  { %v12052_v63 = vpop.f32.mrf.mxu1  ;;  %12067 = vmatprep.subr.bf16.mxu0 %v13070_v29 }
 0x75b   :  { %12316 = vmatpush3.bf16.msra.mxu1 %v14203_v16  ;;  %v5183_v40 = vpack.c.bf16 %v12052_v63, %v12051_v49  ;;  %v13092_v49 = vld [vmem:[%s15737_s7 + $0x2e0] sm:$0xff]   ;;  %v13094_v63 = vld [vmem:[%s15737_s7 + $0x2d0] sm:$0xff]  }
 0x75c   :  { %v5170_v12 = vpop.f32.mrf.mxu1  ;;  %12317 = vmatprep.subr.bf16.mxu1 %v14201_v11 }
 0x75d   :  { %v5182_v42 = vpack.c.bf16 %v5170_v12, %v5167_v7  ;;  %12068 = vmatpush3.bf16.msra.mxu0 %v13070_v29  ;;  %v13093_v7 = vld [vmem:[%s15737_s7 + $0x2d8] sm:$0xff]  }
 0x75e   :  { %12093 = vmatprep.subr.bf16.mxu0 %v13071_v50 }
 0x75f   :  { %12069 = vmatprep.mubr.bf16.mxu0 %v5182_v42  ;;  %12318 = vmatpush3.bf16.msra.mxu1 %v14201_v11  ;;  %v13096_v42 = vld [vmem:[%s15737_s7 + $0x2c0] sm:$0xff]  }
 0x760   :  { %v11831_v55 = vpop.f32.mrf.mxu0  ;;  %12070 = vmatmul.mubr.bf16.vlgmr.msra.gmra.mxu0 %v5183_v40  ;;  %12319 = vmatprep.subr.bf16.mxu1 %v14199_v54 }
 0x761   :  { %v4184_v16 = vadd.f32 %v11831_v55, %v14459_v31  ;;  %12094 = vmatpush3.bf16.msra.mxu0 %v13071_v50  ;;  %v13074_v31 = vld [vmem:[%s15737_s7 + $0x260] sm:$0xff]   ;;  %v13095_v50 = vld [vmem:[%s15737_s7 + $0x2c8] sm:$0xff]  }
 0x762   :  { %v4167_v61 = vpop.f32.mrf.mxu0  ;;  %12095 = vmatprep.subr.bf16.mxu0 %v13072_v57 }
 0x763   :  { %v4182_v10 = vadd.f32 %v4167_v61, %v14463_v19  ;;  %12320 = vmatpush3.bf16.msra.mxu1 %v14199_v54  ;;  %v13075_v54 = vld [vmem:[%s15737_s7 + $0x258] sm:$0xff]   ;;  %v13076_v19 = vld [vmem:[%s15737_s7 + $0x250] sm:$0xff]  }
 0x764   :  { %v11832_v35 = vpop.f32.mrf.mxu0  ;;  %12321 = vmatprep.subr.bf16.mxu1 %v14197_v22 }
 0x765   :  { %v4185_v11 = vadd.f32 %v11832_v35, %v14465_v15  ;;  %12096 = vmatpush3.bf16.msra.mxu0 %v13072_v57  ;;  %v13097_v57 = vld [vmem:[%s15737_s7 + $0x338] sm:$0xff]  }
 0x766   :  { %12097 = vmatprep.subr.bf16.mxu0 %v13073_v24 }
 0x767   :  { %12322 = vmatpush3.bf16.msra.mxu1 %v14197_v22  ;;  %v13078_v22 = vld [vmem:[%s15736_s6 + $0xf8] sm:$0xff]  }
 0x768   :  { %12323 = vmatprep.subr.bf16.mxu1 %v14195_v47 }
 0x769   :  { %12098 = vmatpush3.bf16.msra.mxu0 %v13073_v24  ;;  %v13098_v24 = vld [vmem:[%s15737_s7 + $0x330] sm:$0xff]  }
 0x76a   :  { %12099 = vmatprep.subr.bf16.mxu0 %v13074_v31 }
 0x76b   :  { %12324 = vmatpush3.bf16.msra.mxu1 %v14195_v47  ;;  %v13079_v47 = vld [vmem:[%s15737_s7 + $0x248] sm:$0xff]  }
 0x76c   :  { %12325 = vmatprep.subr.bf16.mxu1 %v14193_v17 }
 0x76d   :  { %12100 = vmatpush3.bf16.msra.mxu0 %v13074_v31  ;;  %v13099_v31 = vld [vmem:[%s15737_s7 + $0x328] sm:$0xff]  }
 0x76e   :  { %12101 = vmatprep.subr.bf16.mxu0 %v13075_v54 }
 0x76f   :  { %12326 = vmatpush3.bf16.msra.mxu1 %v14193_v17  ;;  %v13080_v17 = vld [vmem:[%s15737_s7 + $0x240] sm:$0xff]  }
 0x770   :  { %12327 = vmatprep.subr.bf16.mxu1 %v14191_v52 }
 0x771   :  { %12102 = vmatpush3.bf16.msra.mxu0 %v13075_v54 }
 0x772   :  { %12103 = vmatprep.subr.bf16.mxu0 %v13076_v19 }
 0x773   :  { %12328 = vmatpush3.bf16.msra.mxu1 %v14191_v52  ;;  %v4170_v52 = vpop.f32.mrf.mxu0 }
 0x774   :  { %v4183_v20 = vadd.f32 %v4170_v52, %v3989_v34  ;;  %v13105_v52 = vld [vmem:[%s15737_s7 + $0x378] sm:$0xff]  }
 0x775   :  { %12104 = vmatpush3.bf16.msra.mxu0 %v13076_v19  ;;  %v13109_v34 = vld [vmem:[%s15737_s7 + $0x358] sm:$0xff]  }
 0x776   :  { %v12091_v15 = vpop.f32.mrf.mxu1  ;;  %12330 = vmatmul.mubr.bf16.vlgmr.msra.gmra.mxu1 %v13078_v22  ;;  %12105 = vmatprep.subr.bf16.mxu0 %v13079_v47 }
 0x778   :  { %v5353_v14 = vpop.f32.mrf.mxu1 }
 0x779   :  { %12106 = vmatpush3.bf16.msra.mxu0 %v13079_v47  ;;  %v13100_v47 = vld [vmem:[%s15737_s7 + $0x320] sm:$0xff]  }
 0x77a   :  { %v12092_v21 = vpop.f32.mrf.mxu1  ;;  %12107 = vmatprep.subr.bf16.mxu0 %v13080_v17 }
 0x77b   :  { %v5369_v46 = vpack.c.bf16 %v12092_v21, %v12091_v15  ;;  %v13101_v15 = vld [vmem:[%s15737_s7 + $0x318] sm:$0xff]  }
 0x77c   :  { %v5356_v4 = vpop.f32.mrf.mxu1 }
 0x77d   :  { %v5368_v36 = vpack.c.bf16 %v5356_v4, %v5353_v14  ;;  %12108 = vmatpush3.bf16.msra.mxu0 %v13080_v17  ;;  %v13102_v17 = vld [vmem:[%s15737_s7 + $0x310] sm:$0xff]   ;;  %v13103_v14 = vld [vmem:[%s15737_s7 + $0x308] sm:$0xff]  }
 0x77e   :  { %12133 = vmatprep.subr.bf16.mxu0 %v13081_v53 }
 0x77f   :  { %12109 = vmatprep.mubr.bf16.mxu0 %v5368_v36 }
 0x780   :  { %v11871_v2 = vpop.f32.mrf.mxu0  ;;  %12110 = vmatmul.mubr.bf16.vlgmr.msra.gmra.mxu0 %v5369_v46 }
 0x781   :  { %v4370_v13 = vadd.f32 %v11871_v2, %v4184_v16  ;;  %12134 = vmatpush3.bf16.msra.mxu0 %v13081_v53  ;;  %v13104_v53 = vld [vmem:[%s15737_s7 + $0x300] sm:$0xff]  }
 0x782   :  { %v4353_v51 = vpop.f32.mrf.mxu0  ;;  %12135 = vmatprep.subr.bf16.mxu0 %v13082_v37 }
 0x783   :  { %v4368_v43 = vadd.f32 %v4353_v51, %v4182_v10  ;;  %v13107_v51 = vld [vmem:[%s15737_s7 + $0x368] sm:$0xff]  }
 0x784   :  { %v11872_v58 = vpop.f32.mrf.mxu0 }
 0x785   :  { %v4371_v23 = vadd.f32 %v11872_v58, %v4185_v11  ;;  %12136 = vmatpush3.bf16.msra.mxu0 %v13082_v37  ;;  %v13111_v58 = vld [vmem:[%s15737_s7 + $0x348] sm:$0xff]  }
 0x786   :  { %v4356_v38 = vpop.f32.mrf.mxu0  ;;  %12137 = vmatprep.subr.bf16.mxu0 %v13083_v30 }
 0x787   :  { %v4369_v60 = vadd.f32 %v4356_v38, %v4183_v20 }
 0x789   :  { %12138 = vmatpush3.bf16.msra.mxu0 %v13083_v30  ;;  %v13108_v30 = vld [vmem:[%s15737_s7 + $0x360] sm:$0xff]  }
 0x78a   :  { %12139 = vmatprep.subr.bf16.mxu0 %v13084_v25 }
 0x78d   :  { %12140 = vmatpush3.bf16.msra.mxu0 %v13084_v25 }
 0x78e   :  { %12141 = vmatprep.subr.bf16.mxu0 %v13085_v48 }
 0x791   :  { %12142 = vmatpush3.bf16.msra.mxu0 %v13085_v48 }
 0x792   :  { %12143 = vmatprep.subr.bf16.mxu0 %v13086_v44 }
 0x795   :  { %12144 = vmatpush3.bf16.msra.mxu0 %v13086_v44 }
 0x796   :  { %v12131_v56 = vpop.f32.mrf.mxu1  ;;  %12145 = vmatprep.subr.bf16.mxu0 %v13087_v59 }
 0x798   :  { %v5539_v32 = vpop.f32.mrf.mxu1 }
 0x799   :  { %12146 = vmatpush3.bf16.msra.mxu0 %v13087_v59 }
 0x79a   :  { %v12132_v41 = vpop.f32.mrf.mxu1  ;;  %12147 = vmatprep.subr.bf16.mxu0 %v13088_v18 }
 0x79b   :  { %v5555_v62 = vpack.c.bf16 %v12132_v41, %v12131_v56  ;;  %v13114_v56 = vld [vmem:[%s15737_s7 + $0x3b0] sm:$0xff]   ;;  %v13117_v41 = vld [vmem:[%s15737_s7 + $0x398] sm:$0xff]  }
 0x79c   :  { %v5542_v39 = vpop.f32.mrf.mxu1 }
 0x79d   :  { %v5554_v6 = vpack.c.bf16 %v5542_v39, %v5539_v32  ;;  %12148 = vmatpush3.bf16.msra.mxu0 %v13088_v18  ;;  %v13115_v18 = vld [vmem:[%s15737_s7 + $0x3a8] sm:$0xff]   ;;  %v13116_v32 = vld [vmem:[%s15737_s7 + $0x3a0] sm:$0xff]  }
 0x79e   :  { %12173 = vmatprep.subr.bf16.mxu0 %v13089_v3  ;;  %v13119_v39 = vld [vmem:[%s15737_s7 + $0x388] sm:$0xff]  }
 0x79f   :  { %12149 = vmatprep.mubr.bf16.mxu0 %v5554_v6 }
 0x7a0   :  { %v11911_v9 = vpop.f32.mrf.mxu0  ;;  %12150 = vmatmul.mubr.bf16.vlgmr.msra.gmra.mxu0 %v5555_v62  ;;  %v13120_v62 = vld [vmem:[%s15737_s7 + $0x380] sm:$0xff]  }
 0x7a1   :  { %v4556_v28 = vadd.f32 %v11911_v9, %v4370_v13  ;;  %12174 = vmatpush3.bf16.msra.mxu0 %v13089_v3  ;;  %v13106_v13 = vld [vmem:[%s15737_s7 + $0x370] sm:$0xff]  }
 0x7a2   :  { %v4539_v0 = vpop.f32.mrf.mxu0  ;;  %12175 = vmatprep.subr.bf16.mxu0 %v13090_v1  ;;  %v13118_v3 = vld [vmem:[%s15737_s7 + $0x390] sm:$0xff]  }
 0x7a3   :  { %v4554_v26 = vadd.f32 %v4539_v0, %v4368_v43  ;;  %v13110_v43 = vld [vmem:[%s15737_s7 + $0x350] sm:$0xff]  }
 0x7a4   :  { %v11912_v27 = vpop.f32.mrf.mxu0 }
 0x7a5   :  { %v4557_v5 = vadd.f32 %v11912_v27, %v4371_v23  ;;  %12176 = vmatpush3.bf16.msra.mxu0 %v13090_v1  ;;  %v13112_v23 = vld [vmem:[%s15737_s7 + $0x340] sm:$0xff]   ;;  %v13122_v27 = vld [vmem:[%s15737_s7 + $0x3f0] sm:$0xff]  }
 0x7a6   :  { %v4542_v33 = vpop.f32.mrf.mxu0  ;;  %12177 = vmatprep.subr.bf16.mxu0 %v13091_v8 }
 0x7a7   :  { %v14848_v29 = vadd.f32 %v4542_v33, %v4369_v60  ;;  %v13113_v60 = vld [vmem:[%s15737_s7 + $0x3b8] sm:$0xff]   ;;  %v13124_v33 = vld [vmem:[%s15737_s7 + $0x3e0] sm:$0xff]  }
 0x7a9   :  { %12178 = vmatpush3.bf16.msra.mxu0 %v13091_v8 }
 0x7aa   :  { %12179 = vmatprep.subr.bf16.mxu0 %v13092_v49 }
 0x7ad   :  { %12180 = vmatpush3.bf16.msra.mxu0 %v13092_v49  ;;  %v13125_v49 = vld [vmem:[%s15737_s7 + $0x3d8] sm:$0xff]  }
 0x7ae   :  { %12181 = vmatprep.subr.bf16.mxu0 %v13093_v7 }
 0x7b1   :  { %12182 = vmatpush3.bf16.msra.mxu0 %v13093_v7  ;;  %v13126_v7 = vld [vmem:[%s15737_s7 + $0x3d0] sm:$0xff]  }
 0x7b2   :  { %12183 = vmatprep.subr.bf16.mxu0 %v13094_v63 }
 0x7b5   :  { %12184 = vmatpush3.bf16.msra.mxu0 %v13094_v63  ;;  %v13127_v63 = vld [vmem:[%s15737_s7 + $0x3c8] sm:$0xff]  }
 0x7b6   :  { %v12171_v12 = vpop.f32.mrf.mxu1  ;;  %12185 = vmatprep.subr.bf16.mxu0 %v13095_v50 }
 0x7b8   :  { %v5725_v45 = vpop.f32.mrf.mxu1 }
 0x7b9   :  { %12186 = vmatpush3.bf16.msra.mxu0 %v13095_v50 }
 0x7ba   :  { %v12172_v40 = vpop.f32.mrf.mxu1  ;;  %12187 = vmatprep.subr.bf16.mxu0 %v13096_v42 }
 0x7bb   :  { %v5741_v61 = vpack.c.bf16 %v12172_v40, %v12171_v12  ;;  %v13128_v12 = vld [vmem:[%s15737_s7 + $0x3c0] sm:$0xff]  }
 0x7bc   :  { %v5728_v55 = vpop.f32.mrf.mxu1 }
 0x7bd   :  { %v5740_v16 = vpack.c.bf16 %v5728_v55, %v5725_v45  ;;  %12188 = vmatpush3.bf16.msra.mxu0 %v13096_v42 }
 0x7be   :  { %12213 = vmatprep.subr.bf16.mxu0 %v13097_v57 }
 0x7bf   :  { %12189 = vmatprep.mubr.bf16.mxu0 %v5740_v16 }
 0x7c0   :  { %v11951_v10 = vpop.f32.mrf.mxu0  ;;  %12190 = vmatmul.mubr.bf16.vlgmr.msra.gmra.mxu0 %v5741_v61 }
 0x7c1   :  { %v14868_v35 = vadd.f32 %v11951_v10, %v4556_v28  ;;  %12214 = vmatpush3.bf16.msra.mxu0 %v13097_v57  ;;  %v13121_v28 = vld [vmem:[%s15737_s7 + $0x3f8] sm:$0xff]  }
 0x7c2   :  { %v4725_v11 = vpop.f32.mrf.mxu0  ;;  %12215 = vmatprep.subr.bf16.mxu0 %v13098_v24 }
 0x7c3   :  { %v14873_v54 = vadd.f32 %v4725_v11, %v4554_v26 }
 0x7c4   :  { %v11952_v19 = vpop.f32.mrf.mxu0 }
 0x7c5   :  { %v14875_v22 = vadd.f32 %v11952_v19, %v4557_v5  ;;  %12216 = vmatpush3.bf16.msra.mxu0 %v13098_v24  ;;  %v13123_v5 = vld [vmem:[%s15737_s7 + $0x3e8] sm:$0xff]  }
 0x7c6   :  { %12217 = vmatprep.subr.bf16.mxu0 %v13099_v31  ;;  %v4728_v16 = vpop.f32.mrf.mxu0 }
 0x7c9   :  { %12218 = vmatpush3.bf16.msra.mxu0 %v13099_v31 }
 0x7ca   :  { %12219 = vmatprep.subr.bf16.mxu0 %v13100_v47 }
 0x7cd   :  { %12220 = vmatpush3.bf16.msra.mxu0 %v13100_v47 }
 0x7ce   :  { %12221 = vmatprep.subr.bf16.mxu0 %v13101_v15 }
 0x7d1   :  { %12222 = vmatpush3.bf16.msra.mxu0 %v13101_v15 }
 0x7d2   :  { %12223 = vmatprep.subr.bf16.mxu0 %v13102_v17 }
 0x7d5   :  { %12224 = vmatpush3.bf16.msra.mxu0 %v13102_v17 }
 0x7d6   :  { %v12211_v21 = vpop.f32.mrf.mxu1  ;;  %12225 = vmatprep.subr.bf16.mxu0 %v13103_v14 }
 0x7d8   :  { %v5911_v4 = vpop.f32.mrf.mxu1 }
 0x7d9   :  { %12226 = vmatpush3.bf16.msra.mxu0 %v13103_v14 }
 0x7da   :  { %v12212_v36 = vpop.f32.mrf.mxu1  ;;  %12227 = vmatprep.subr.bf16.mxu0 %v13104_v53 }
 0x7db   :  { %v5927_v2 = vpack.c.bf16 %v12212_v36, %v12211_v21 }
 0x7dc   :  { %v5914_v46 = vpop.f32.mrf.mxu1 }
 0x7dd   :  { %v5926_v37 = vpack.c.bf16 %v5914_v46, %v5911_v4  ;;  %12228 = vmatpush3.bf16.msra.mxu0 %v13104_v53 }
 0x7de   :  { %12253 = vmatprep.subr.bf16.mxu0 %v13105_v52 }
 0x7df   :  { %12229 = vmatprep.mubr.bf16.mxu0 %v5926_v37 }
 0x7e0   :  { %12230 = vmatmul.mubr.bf16.vlgmr.msra.gmra.mxu0 %v5927_v2  ;;  %v11991_v61 = vpop.f32.mrf.mxu0 }
 0x7e1   :  { %12254 = vmatpush3.bf16.msra.mxu0 %v13105_v52 }
 0x7e2   :  { %12255 = vmatprep.subr.bf16.mxu0 %v13106_v13  ;;  %v4911_v24 = vpop.f32.mrf.mxu0 }
 0x7e4   :  { %v14964_v10 = vpop.f32.mrf.mxu0 }
 0x7e5   :  { %12256 = vmatpush3.bf16.msra.mxu0 %v13106_v13  ;;  %v13312_v13 = vmov 0.0  }
 0x7e6   :  { %12257 = vmatprep.subr.bf16.mxu0 %v13107_v51  ;;  %v4914_v11 = vpop.f32.mrf.mxu0  ;;  %12353 = vmatprep.subr.bf16.mxu1 %v13312_v13 }
 0x7e7   :  { %12357 = vmatprep.mubr.msk.bf16.mxu1 %vm13313_vm0, %v13312_v13 }
 0x7e9   :  { %12258 = vmatpush3.bf16.msra.mxu0 %v13107_v51 }
 0x7ea   :  { %12259 = vmatprep.subr.bf16.mxu0 %v13108_v30 }
 0x7ed   :  { %12260 = vmatpush3.bf16.msra.mxu0 %v13108_v30 }
 0x7ee   :  { %12261 = vmatprep.subr.bf16.mxu0 %v13109_v34 }
 0x7f1   :  { %12262 = vmatpush3.bf16.msra.mxu0 %v13109_v34 }
 0x7f2   :  { %12263 = vmatprep.subr.bf16.mxu0 %v13110_v43 }
 0x7f5   :  { %12264 = vmatpush3.bf16.msra.mxu0 %v13110_v43 }
 0x7f6   :  { %v12251_v20 = vpop.f32.mrf.mxu1  ;;  %12265 = vmatprep.subr.bf16.mxu0 %v13111_v58 }
 0x7f8   :  { %v6097_v38 = vpop.f32.mrf.mxu1 }
 0x7f9   :  { %12266 = vmatpush3.bf16.msra.mxu0 %v13111_v58  ;;  %v13129_v58 = vld [vmem:[%s15741_s11 + $0x38] sm:$0xff]  }
 0x7fa   :  { %v12252_v25 = vpop.f32.mrf.mxu1  ;;  %12267 = vmatprep.subr.bf16.mxu0 %v13112_v23 }
 0x7fb   :  { %v6113_v59 = vpack.c.bf16 %v12252_v25, %v12251_v20  ;;  %v13132_v25 = vld [vmem:[%s15741_s11 + $0x28] sm:$0xff]  }
 0x7fc   :  { %v6100_v48 = vpop.f32.mrf.mxu1 }
 0x7fd   :  { %v6112_v44 = vpack.c.bf16 %v6100_v48, %v6097_v38  ;;  %12268 = vmatpush3.bf16.msra.mxu0 %v13112_v23  ;;  %v13130_v23 = vld [vmem:[%s15741_s11 + $0x30] sm:$0xff]   ;;  %v13134_v48 = vld [vmem:[%s15741_s11 + $0x20] sm:$0xff]  }
 0x7fe   :  { %12293 = vmatprep.subr.bf16.mxu0 %v13113_v60 }
 0x7ff   :  { %12269 = vmatprep.mubr.bf16.mxu0 %v6112_v44 }
 0x800   :  { %12270 = vmatmul.mubr.bf16.vlgmr.msra.gmra.mxu0 %v6113_v59  ;;  %v14966_v31 = vpop.f32.mrf.mxu0  ;;  %v13136_v59 = vld [vmem:[%s15741_s11 + $0x18] sm:$0xff]  }
 0x801   :  { %12294 = vmatpush3.bf16.msra.mxu0 %v13113_v60 }
 0x802   :  { %12295 = vmatprep.subr.bf16.mxu0 %v13114_v56  ;;  %v5097_v19 = vpop.f32.mrf.mxu0 }
 0x804   :  { %v14968_v47 = vpop.f32.mrf.mxu0 }
 0x805   :  { %12296 = vmatpush3.bf16.msra.mxu0 %v13114_v56 }
 0x806   :  { %12297 = vmatprep.subr.bf16.mxu0 %v13115_v18  ;;  %v5100_v15 = vpop.f32.mrf.mxu0 }
 0x809   :  { %12298 = vmatpush3.bf16.msra.mxu0 %v13115_v18  ;;  %v13138_v18 = vld [vmem:[%s15741_s11 + $0x10] sm:$0xff]  }
 0x80a   :  { %12299 = vmatprep.subr.bf16.mxu0 %v13116_v32 }
 0x80d   :  { %12300 = vmatpush3.bf16.msra.mxu0 %v13116_v32 }
 0x80e   :  { %12301 = vmatprep.subr.bf16.mxu0 %v13117_v41 }
 0x811   :  { %12302 = vmatpush3.bf16.msra.mxu0 %v13117_v41 }
 0x812   :  { %12303 = vmatprep.subr.bf16.mxu0 %v13118_v3 }
 0x815   :  { %12304 = vmatpush3.bf16.msra.mxu0 %v13118_v3  ;;  %v13140_v3 = vld [vmem:[%s15741_s11 + $0x8] sm:$0xff]  }
 0x816   :  { %v12291_v6 = vpop.f32.mrf.mxu1  ;;  %12305 = vmatprep.subr.bf16.mxu0 %v13119_v39 }
 0x818   :  { %v6283_v1 = vpop.f32.mrf.mxu1 }
 0x819   :  { %12306 = vmatpush3.bf16.msra.mxu0 %v13119_v39 }
 0x81a   :  { %v12292_v9 = vpop.f32.mrf.mxu1  ;;  %12307 = vmatprep.subr.bf16.mxu0 %v13120_v62 }
 0x81b   :  { %v6299_v26 = vpack.c.bf16 %v12292_v9, %v12291_v6  ;;  %v4741_v9 = vadd.f32 %v4728_v16, %v14848_v29 }
 0x81c   :  { %v6286_v0 = vpop.f32.mrf.mxu1 }
 0x81d   :  { %v6298_v8 = vpack.c.bf16 %v6286_v0, %v6283_v1  ;;  %12308 = vmatpush3.bf16.msra.mxu0 %v13120_v62  ;;  %v4928_v0 = vadd.f32 %v11991_v61, %v14868_v35 }
 0x81e   :  { %12333 = vmatprep.subr.bf16.mxu0 %v13121_v28 }
 0x81f   :  { %12309 = vmatprep.mubr.bf16.mxu0 %v6298_v8  ;;  %v4927_v8 = vadd.f32 %v4914_v11, %v4741_v9 }
 0x820   :  { %12310 = vmatmul.mubr.bf16.vlgmr.msra.gmra.mxu0 %v6299_v26  ;;  %v14970_v17 = vpop.f32.mrf.mxu0 }
 0x821   :  { %12334 = vmatpush3.bf16.msra.mxu0 %v13121_v28  ;;  %v4926_v28 = vadd.f32 %v4911_v24, %v14873_v54 }
 0x822   :  { %12335 = vmatprep.subr.bf16.mxu0 %v13122_v27  ;;  %v5283_v14 = vpop.f32.mrf.mxu0 }
 0x823   :  { %v5112_v26 = vadd.f32 %v5097_v19, %v4926_v28 }
 0x824   :  { %v14972_v21 = vpop.f32.mrf.mxu0 }
 0x825   :  { %12336 = vmatpush3.bf16.msra.mxu0 %v13122_v27 }
 0x826   :  { %12337 = vmatprep.subr.bf16.mxu0 %v13123_v5  ;;  %v5286_v53 = vpop.f32.mrf.mxu0 }
 0x829   :  { %12338 = vmatpush3.bf16.msra.mxu0 %v13123_v5  ;;  %v4929_v5 = vadd.f32 %v14964_v10, %v14875_v22 }
 0x82a   :  { %12339 = vmatprep.subr.bf16.mxu0 %v13124_v33 }
 0x82d   :  { %12340 = vmatpush3.bf16.msra.mxu0 %v13124_v33  ;;  %v5114_v33 = vadd.f32 %v14966_v31, %v4928_v0 }
 0x82e   :  { %12341 = vmatprep.subr.bf16.mxu0 %v13125_v49 }
 0x831   :  { %12342 = vmatpush3.bf16.msra.mxu0 %v13125_v49  ;;  %v5113_v49 = vadd.f32 %v5100_v15, %v4927_v8 }
 0x832   :  { %12343 = vmatprep.subr.bf16.mxu0 %v13126_v7 }
 0x835   :  { %12344 = vmatpush3.bf16.msra.mxu0 %v13126_v7  ;;  %v5298_v7 = vadd.f32 %v5283_v14, %v5112_v26 }
 0x836   :  { %v12331_v50 = vpop.f32.mrf.mxu1  ;;  %12345 = vmatprep.subr.bf16.mxu0 %v13127_v63 }
 0x838   :  { %v6469_v42 = vpop.f32.mrf.mxu1 }
 0x839   :  { %12346 = vmatpush3.bf16.msra.mxu0 %v13127_v63  ;;  %v5115_v63 = vadd.f32 %v14968_v47, %v4929_v5 }
 0x83a   :  { %v12332_v45 = vpop.f32.mrf.mxu1  ;;  %12347 = vmatprep.subr.bf16.mxu0 %v13128_v12 }
 0x83b   :  { %v6485_v55 = vpack.c.bf16 %v12332_v45, %v12331_v50  ;;  %v5300_v50 = vadd.f32 %v14970_v17, %v5114_v33  ;;  %v5301_v54 = vadd.f32 %v14972_v21, %v5115_v63 }
 0x83c   :  { %v6472_v40 = vpop.f32.mrf.mxu1 }
 0x83d   :  { %v6484_v57 = vpack.c.bf16 %v6472_v40, %v6469_v42  ;;  %12348 = vmatpush3.bf16.msra.mxu0 %v13128_v12  ;;  %v5299_v12 = vadd.f32 %v5286_v53, %v5113_v49 }
 0x83e   :  { %12389 = vmatprep.subr.bf16.mxu0 %v13312_v13 }
 0x83f   :  { %12349 = vmatprep.mubr.bf16.mxu0 %v6484_v57 }
 0x840   :  { %12350 = vmatmul.mubr.bf16.vlgmr.msra.gmra.mxu0 %v6485_v55  ;;  %v14974_v4 = vpop.f32.mrf.mxu0 }
 0x841   :  { %12405 = vmatprep.mubr.msk.bf16.mxu0 %vm13313_vm0, %v13312_v13  ;;  %12390 = vmatpush3.bf16.msra.mxu0 %v13129_v58  ;;  %v5486_v35 = vadd.f32 %v14974_v4, %v5300_v50 }
 0x842   :  { %v5469_v36 = vpop.f32.mrf.mxu0  ;;  %12391 = vmatprep.subr.bf16.mxu0 %v13312_v13 }
 0x843   :  { %v5484_v29 = vadd.f32 %v5469_v36, %v5298_v7 }
 0x844   :  { %v14976_v52 = vpop.f32.mrf.mxu0 }
 0x845   :  { %12392 = vmatpush3.bf16.msra.mxu0 %v13130_v23  ;;  %v5487_v57 = vadd.f32 %v14976_v52, %v5301_v54 }
 0x846   :  { %v5472_v46 = vpop.f32.mrf.mxu0  ;;  %12393 = vmatprep.subr.bf16.mxu0 %v13312_v13 }
 0x847   :  { %v5485_v45 = vadd.f32 %v5472_v46, %v5299_v12 }
 0x849   :  { %12394 = vmatpush3.bf16.msra.mxu0 %v13132_v25 }
 0x84a   :  { %12395 = vmatprep.subr.bf16.mxu0 %v13312_v13 }
 0x84d   :  { %12396 = vmatpush3.bf16.msra.mxu0 %v13134_v48 }
 0x84e   :  { %12397 = vmatprep.subr.bf16.mxu0 %v13312_v13 }
 0x851   :  { %12398 = vmatpush3.bf16.msra.mxu0 %v13136_v59 }
 0x852   :  { %12399 = vmatprep.subr.bf16.mxu0 %v13312_v13 }
 0x855   :  { %12400 = vmatpush3.bf16.msra.mxu0 %v13138_v18 }
 0x856   :  { %12401 = vmatprep.subr.bf16.mxu0 %v13312_v13 }
 0x859   :  { %12402 = vmatpush3.bf16.msra.mxu0 %v13140_v3 }
 0x85a   :  { %12403 = vmatprep.subr.bf16.mxu0 %v13312_v13 }
 0x860   :  { %v14978_v37 = vpop.f32.mrf.mxu0 }
 0x861   :  { %v5672_v22 = vadd.f32 %v14978_v37, %v5486_v35 }
 0x862   :  { %v5655_v2 = vpop.f32.mrf.mxu0 }
 0x863   :  { %v5670_v40 = vadd.f32 %v5655_v2, %v5484_v29 }
 0x864   :  { %v14982_v51 = vpop.f32.mrf.mxu0 }
 0x865   :  { %v5673_v24 = vadd.f32 %v14982_v51, %v5487_v57 }
 0x866   :  { %v5658_v30 = vpop.f32.mrf.mxu0 }
 0x867   :  { %v5671_v55 = vadd.f32 %v5658_v30, %v5485_v45 }
 0x880   :  { %v12191_v34 = vpop.f32.mrf.mxu0 }
 0x881   :  { %v5858_v10 = vadd.f32 %v12191_v34, %v5672_v22 }
 0x882   :  { %v5841_v43 = vpop.f32.mrf.mxu0 }
 0x883   :  { %v5856_v16 = vadd.f32 %v5841_v43, %v5670_v40  ;;  %v9888_v40 = vld [vmem:[%s15738_s8] ss:$0 sm:$0xff] }
 0x884   :  { %v12192_v20 = vpop.f32.mrf.mxu0 }
 0x885   :  { %v5859_v47 = vadd.f32 %v12192_v20, %v5673_v24 }
 0x886   :  { %v5844_v38 = vpop.f32.mrf.mxu0 }
 0x887   :  { %v5857_v11 = vadd.f32 %v5844_v38, %v5671_v55 }
 0x8a0   :  { %v12231_v60 = vpop.f32.mrf.mxu0 }
 0x8a1   :  { %v6044_v15 = vadd.f32 %v12231_v60, %v5858_v10 }
 0x8a2   :  { %v6027_v44 = vpop.f32.mrf.mxu0 }
 0x8a3   :  { %v6042_v31 = vadd.f32 %v6027_v44, %v5856_v16 }
 0x8a4   :  { %v12232_v56 = vpop.f32.mrf.mxu0 }
 0x8a5   :  { %v6045_v53 = vadd.f32 %v12232_v56, %v5859_v47 }
 0x8a6   :  { %v6030_v32 = vpop.f32.mrf.mxu0 }
 0x8a7   :  { %v6043_v17 = vadd.f32 %v6030_v32, %v5857_v11 }
 0x8c0   :  { %v12271_v41 = vpop.f32.mrf.mxu0 }
 0x8c1   :  { %v6230_v4 = vadd.f32 %v12271_v41, %v6044_v15 }
 0x8c2   :  { %v6213_v39 = vpop.f32.mrf.mxu0 }
 0x8c3   :  { %v6228_v14 = vadd.f32 %v6213_v39, %v6042_v31 }
 0x8c4   :  { %v12272_v6 = vpop.f32.mrf.mxu0 }
 0x8c5   :  { %v6231_v37 = vadd.f32 %v12272_v6, %v6045_v53 }
 0x8c6   :  { %v6216_v62 = vpop.f32.mrf.mxu0 }
 0x8c7   :  { %v6229_v36 = vadd.f32 %v6216_v62, %v6043_v17 }
 0x8e0   :  { %v12311_v1 = vpop.f32.mrf.mxu0 }
 0x8e1   :  { %v6416_v2 = vadd.f32 %v12311_v1, %v6230_v4 }
 0x8e2   :  { %v6399_v27 = vpop.f32.mrf.mxu0 }
 0x8e3   :  { %v6414_v52 = vadd.f32 %v6399_v27, %v6228_v14 }
 0x8e4   :  { %v12312_v42 = vpop.f32.mrf.mxu0 }
 0x8e5   :  { %v6417_v51 = vadd.f32 %v12312_v42, %v6231_v37 }
 0x8e6   :  { %v6402_v61 = vpop.f32.mrf.mxu0 }
 0x8e7   :  { %v6415_v30 = vadd.f32 %v6402_v61, %v6229_v36  ;;  %v9889_v61 = vld [vmem:[%s15739_s9] ss:$0 sm:$0xff] }
 0x900   :  { %v12351_v19 = vpop.f32.mrf.mxu0 }
 0x901   :  { %v6602_v34 = vadd.f32 %v12351_v19, %v6416_v2 }
 0x902   :  { %v6585_v21 = vpop.f32.mrf.mxu0 }
 0x903   :  { %v6600_v43 = vadd.f32 %v6585_v21, %v6414_v52  ;;  %v6617_v48 = vmul.f32 %v6602_v34, %v6602_v34 }
 0x904   :  { %v12352_v46 = vpop.f32.mrf.mxu0 }
 0x905   :  { %v6615_v38 = vmul.f32 %v6600_v43, %v6600_v43  ;;  %v6603_v25 = vadd.f32 %v12352_v46, %v6417_v51  ;;  %v13131_v51 = vld [vmem:[%s15741_s11 + $0x78] sm:$0xff]  }
 0x906   :  { %v6588_v58 = vpop.f32.mrf.mxu0 }
 0x907   :  { %v6601_v23 = vadd.f32 %v6588_v58, %v6415_v30  ;;  %v6618_v56 = vmul.f32 %v6603_v25, %v6603_v25  ;;  %v9891_v58 = vld [vmem:[%s15740_s10 + $0x4] sm:$0xf] }
 0x909   :  { %v6604_v20 = vadd.f32 %v6601_v23, %v6600_v43  ;;  %v6616_v60 = vmul.f32 %v6601_v23, %v6601_v23 }
 0x90b   :  { %v6605_v44 = vadd.f32 %v6604_v20, %v6602_v34  ;;  %v6619_v59 = vadd.f32 %v6616_v60, %v6615_v38  ;;  %v13137_v38 = vld [vmem:[%s15741_s11 + $0x60] sm:$0xff]   ;;  %v13141_v20 = vld [vmem:[%s15741_s11 + $0x50] sm:$0xff]  }
 0x90c   :  { %v13142_v60 = vld [vmem:[%s15741_s11] sm:$0xff]  }
 0x90d   :  { %v6606_v18 = vadd.f32 %v6605_v44, %v6603_v25  ;;  %v6620_v32 = vadd.f32 %v6619_v59, %v6617_v48  ;;  %12404 = vmatpush3.bf16.msra.mxu0 %v13142_v60  ;;  %v13143_v48 = vld [vmem:[%s15741_s11 + $0x48] sm:$0xff]   ;;  %v13144_v44 = vld [vmem:[%s15741_s11 + $0x40] sm:$0xff]  }
 0x90e   :  { %12445 = vmatprep.subr.bf16.mxu0 %v13312_v13 }
 0x90f   :  { %v6607_v41 = vrot.slane %v6606_v18, 4  ;;  %v6621_v3 = vadd.f32 %v6620_v32, %v6618_v56 }
 0x911   :  { %v6608_v39 = vadd.f32 %v6607_v41, %v6606_v18  ;;  %v6622_v6 = vrot.slane %v6621_v3, 4 }
 0x913   :  { %v6609_v62 = vrot.slane %v6608_v39, 2  ;;  %v6623_v1 = vadd.f32 %v6622_v6, %v6621_v3 }
 0x915   :  { %v6610_v9 = vadd.f32 %v6609_v62, %v6608_v39  ;;  %v6624_v28 = vrot.slane %v6623_v1, 2 }
 0x917   :  { %v6611_v0 = vrot.slane %v6610_v9, 1  ;;  %v6625_v8 = vadd.f32 %v6624_v28, %v6623_v1  ;;  %v13145_v28 = vld [vmem:[%s15741_s11 + $0xb8] sm:$0xff]  }
 0x919   :  { %v6612_v26 = vadd.f32 %v6611_v0, %v6610_v9  ;;  %v6626_v27 = vrot.slane %v6625_v8, 1  ;;  %v9925_v9 = vld [vmem:[%s15740_s10 + $0x8] sm:$0xf]  ;;  %v13146_v0 = vld [vmem:[%s15741_s11 + $0xb0] sm:$0xff]  }
 0x91b   :  { %v6614_v5 = vmul.f32 0.03125, %v6612_v26  ;;  %v6627_v33 = vadd.f32 %v6626_v27, %v6625_v8  ;;  %v13147_v8 = vld [vmem:[%s15741_s11 + $0xa8] sm:$0xff]   ;;  %v13148_v26 = vld [vmem:[%s15741_s11 + $0xa0] sm:$0xff]   ;;  %v13149_v27 = vld [vmem:[%s15741_s11 + $0x98] sm:$0xff]  }
 0x91d   :  { %v6628_v49 = vmul.f32 0.03125, %v6627_v33  ;;  %v6629_v7 = vmul.f32 %v6614_v5, %v6614_v5  ;;  %v6632_v63 = vsub.f32 %v6600_v43, %v6614_v5  ;;  %v6633_v50 = vsub.f32 %v6601_v23, %v6614_v5  ;;  %v6682_v43 = vld [vmem:[%s15740_s10] sm:$0xf]  ;;  %v13135_v23 = vld [vmem:[%s15741_s11 + $0x68] sm:$0xff]  }
 0x91e   :  { %v6634_v12 = vsub.f32 %v6602_v34, %v6614_v5  ;;  %v6635_v29 = vsub.f32 %v6603_v25, %v6614_v5  ;;  %v13133_v34 = vld [vmem:[%s15741_s11 + $0x70] sm:$0xff]   ;;  %v13139_v25 = vld [vmem:[%s15741_s11 + $0x58] sm:$0xff]   ;;  %v13151_v33 = vld [vmem:[%s15741_s11 + $0x88] sm:$0xff]  }
 0x91f   :  { %v6630_v42 = vsub.f32 %v6628_v49, %v6629_v7  ;;  %v13150_v5 = vld [vmem:[%s15741_s11 + $0x90] sm:$0xff]   ;;  %v13152_v49 = vld [vmem:[%s15741_s11 + $0x80] sm:$0xff]   ;;  %v13153_v7 = vld [vmem:[%s15741_s11 + $0xf8] sm:$0xff]  }
 0x921   :  { %v6631_v54 = vmax.f32 %v6630_v42, 0.0  ;;  %v13161_v42 = vld [vmem:[%s15741_s11 + $0xd0] sm:$0xff]  }
 0x923   :  { %v6636_v35 = vadd.f32 1e-05, %v6631_v54 }
 0x925   :  { %13259 = vrsqrt.f32 %v6636_v35 }
 0x932   :  { %v13260_v45 = vpop.eup %13259 }
 0x933   :  { %v6638_v57 = vmul.f32 %v13260_v45, %v6632_v63  ;;  %v6639_v22 = vmul.f32 %v13260_v45, %v6633_v50  ;;  %v6640_v55 = vmul.f32 %v13260_v45, %v6634_v12  ;;  %v6641_v16 = vmul.f32 %v13260_v45, %v6635_v29  ;;  %v13154_v63 = vld [vmem:[%s15741_s11 + $0xf0] sm:$0xff]   ;;  %v13155_v50 = vld [vmem:[%s15741_s11 + $0xe8] sm:$0xff]   ;;  %v13157_v12 = vld [vmem:[%s15741_s11 + $0xe0] sm:$0xff]  }
 0x934   :  { %v13159_v29 = vld [vmem:[%s15741_s11 + $0xd8] sm:$0xff]  }
 0x935   :  { %v6649_v24 = vmul.f32 %v9888_v40, %v6638_v57  ;;  %v6650_v10 = vmul.f32 %v9888_v40, %v6639_v22  ;;  %v6651_v11 = vmul.f32 %v9888_v40, %v6640_v55  ;;  %v6652_v31 = vmul.f32 %v9888_v40, %v6641_v16 }
 0x937   :  { %v6660_v19 = vadd.f32 %v9889_v61, %v6649_v24  ;;  %v6661_v47 = vadd.f32 %v9889_v61, %v6650_v10  ;;  %v6662_v15 = vadd.f32 %v9889_v61, %v6651_v11  ;;  %v6663_v17 = vadd.f32 %v9889_v61, %v6652_v31 }
 0x939   :  { %vm6664_vm1 = vcmp.gt.f32.partialorder %v6660_v19, 0.0  ;;  %vm6665_vm2 = vcmp.gt.f32.partialorder %v6661_v47, 0.0  ;;  %vm6666_vm3 = vcmp.gt.f32.partialorder %v6662_v15, 0.0  ;;  %vm6667_vm4 = vcmp.gt.f32.partialorder %v6663_v17, 0.0 }
 0x93a   :  { %v6668_v14 = vmul.f32 0.2, %v6660_v19  ;;  %v6669_v21 = vmul.f32 0.2, %v6661_v47  ;;  %v6670_v53 = vmul.f32 0.2, %v6662_v15 }
 0x93b   :  { %v6671_v4 = vmul.f32 0.2, %v6663_v17 }
 0x93c   :  { %v6672_v36 = vsel %vm6664_vm1, %v6660_v19, %v6668_v14  ;;  %v6673_v52 = vsel %vm6665_vm2, %v6661_v47, %v6669_v21  ;;  %v6674_v46 = vsel %vm6666_vm3, %v6662_v15, %v6670_v53  ;;  %v9951_v47 = vld [vmem:[%s15740_s10 + $0xc] sm:$0xf]  ;;  %v9977_v15 = vld [vmem:[%s15740_s10 + $0x10] sm:$0xf]  ;;  %v13162_v53 = vld [vmem:[%s15741_s11 + $0x120] sm:$0xff]  }
 0x93d   :  { %v6675_v37 = vsel %vm6667_vm4, %v6663_v17, %v6671_v4  ;;  %v15035_v2 = vpack.c.bf16 %v6673_v52, %v6672_v36  ;;  %6678 = vst [vmem:[#allocation5] sm:$0xff] %v6672_v36  ;;  %6679 = vst [vmem:[#allocation5 + $0x8] sm:$0xff] %v6673_v52  ;;  %v13156_v17 = vld [vmem:[%s15741_s11 + $0x138] sm:$0xff]   ;;  %v13158_v14 = vld [vmem:[%s15741_s11 + $0x130] sm:$0xff]  }
 0x93e   :  { %6680 = vst [vmem:[#allocation5 + $0x10] sm:$0xff] %v6674_v46  ;;  %v15037_v30 = vpack.c.bf16 %v6675_v37, %v6674_v46  ;;  %6681 = vst [vmem:[#allocation5 + $0x18] sm:$0xff] %v6675_v37  ;;  %v13160_v21 = vld [vmem:[%s15741_s11 + $0x128] sm:$0xff]   ;;  %v13164_v36 = vld [vmem:[%s15741_s11 + $0x118] sm:$0xff]  }
 0x93f   :  { %v13163_v4 = vld [vmem:[%s15741_s11 + $0xc8] sm:$0xff]   ;;  %v13165_v52 = vld [vmem:[%s15741_s11 + $0xc0] sm:$0xff]   ;;  %v13166_v46 = vld [vmem:[%s15741_s11 + $0x110] sm:$0xff]  }
 0x940   :  { %12354 = vmatpush3.bf16.msra.mxu1 %v15037_v30  ;;  %v13167_v37 = vld [vmem:[%s15741_s11 + $0x108] sm:$0xff]  }
 0x941   :  { %12355 = vmatprep.subr.bf16.mxu1 %v13312_v13 }
 0x944   :  { %12356 = vmatpush3.bf16.msra.mxu1 %v15035_v2 }
 0x945   :  { %12361 = vmatprep.subr.bf16.mxu1 %v13312_v13 }
 0x947   :  { %12358 = vmatmul.mubr.msk.bf16.vlgmr.msra.gmra.mxu1 %vm6683_vm5, %v6682_v43  ;;  %v13168_v43 = vld [vmem:[%s15741_s11 + $0x100] sm:$0xff]  }
 0x948   :  { %12362 = vmatpush3.bf16.msra.mxu1 %v15037_v30  ;;  %12365 = vmatprep.mubr.msk.bf16.mxu1 %vm13313_vm0, %v13312_v13 }
 0x949   :  { %12363 = vmatprep.subr.bf16.mxu1 %v13312_v13 }
 0x94c   :  { %12364 = vmatpush3.bf16.msra.mxu1 %v15035_v2 }
 0x94d   :  { %12369 = vmatprep.subr.bf16.mxu1 %v13312_v13 }
 0x94f   :  { %12366 = vmatmul.mubr.msk.bf16.vlgmr.msra.gmra.mxu1 %vm6683_vm5, %v9891_v58 }
 0x950   :  { %12370 = vmatpush3.bf16.msra.mxu1 %v13131_v51  ;;  %12385 = vmatprep.mubr.msk.bf16.mxu1 %vm13313_vm0, %v13312_v13 }
 0x951   :  { %12371 = vmatprep.subr.bf16.mxu1 %v13312_v13 }
 0x954   :  { %12372 = vmatpush3.bf16.msra.mxu1 %v13133_v34 }
 0x955   :  { %12373 = vmatprep.subr.bf16.mxu1 %v13312_v13 }
 0x958   :  { %12374 = vmatpush3.bf16.msra.mxu1 %v13135_v23 }
 0x959   :  { %12375 = vmatprep.subr.bf16.mxu1 %v13312_v13 }
 0x95c   :  { %12376 = vmatpush3.bf16.msra.mxu1 %v13137_v38 }
 0x95d   :  { %12377 = vmatprep.subr.bf16.mxu1 %v13312_v13 }
 0x960   :  { %12378 = vmatpush3.bf16.msra.mxu1 %v13139_v25 }
 0x961   :  { %12379 = vmatprep.subr.bf16.mxu1 %v13312_v13 }
 0x964   :  { %12380 = vmatpush3.bf16.msra.mxu1 %v13141_v20 }
 0x965   :  { %12381 = vmatprep.subr.bf16.mxu1 %v13312_v13 }
 0x968   :  { %12382 = vmatpush3.bf16.msra.mxu1 %v13143_v48 }
 0x969   :  { %12383 = vmatprep.subr.bf16.mxu1 %v13312_v13 }
 0x96c   :  { %12384 = vmatpush3.bf16.msra.mxu1 %v13144_v44 }
 0x96d   :  { %12409 = vmatprep.subr.bf16.mxu1 %v13312_v13 }
 0xa07   :  { %v6721_v59 = vpop.f32.mrf.mxu1 }
 0xa08   :  { %v6727_v56 = vpack.c.bf16 %v6721_v59, %v6721_v59 }
 0xa09   :  { %v12359_v18 = vpop.f32.mrf.mxu1 }
 0xa0a   :  { %12406 = vmatmul.mubr.bf16.vlgmr.msra.gmra.mxu0 %v6727_v56  ;;  %v10003_v56 = vld [vmem:[%s15740_s10 + $0x14] sm:$0xf] }
 0xa0b   :  { %v6724_v32 = vpop.f32.mrf.mxu1  ;;  %12461 = vmatprep.mubr.msk.bf16.mxu0 %vm13313_vm0, %v13312_v13  ;;  %12446 = vmatpush3.bf16.msra.mxu0 %v13153_v7  ;;  %v13181_v7 = vld [vmem:[%s15741_s11 + $0x140] sm:$0xff]  }
 0xa0c   :  { %12447 = vmatprep.subr.bf16.mxu0 %v13312_v13  ;;  %v13169_v32 = vld [vmem:[%s15741_s11 + $0x178] sm:$0xff]  }
 0xa0d   :  { %v12360_v41 = vpop.f32.mrf.mxu1 }
 0xa0f   :  { %v6783_v3 = vpop.f32.mrf.mxu1  ;;  %12448 = vmatpush3.bf16.msra.mxu0 %v13154_v63  ;;  %v13182_v63 = vld [vmem:[%s15741_s11 + $0x190] sm:$0xff]  }
 0xa10   :  { %v6789_v39 = vpack.c.bf16 %v6783_v3, %v6783_v3  ;;  %12449 = vmatprep.subr.bf16.mxu0 %v13312_v13 }
 0xa11   :  { %v12367_v6 = vpop.f32.mrf.mxu1 }
 0xa12   :  { %12386 = vmatmul.mubr.bf16.vlgmr.msra.gmra.mxu1 %v6789_v39  ;;  %v13170_v39 = vld [vmem:[%s15741_s11 + $0x170] sm:$0xff]  }
 0xa13   :  { %12410 = vmatpush3.bf16.msra.mxu1 %v15037_v30  ;;  %v6786_v62 = vpop.f32.mrf.mxu1  ;;  %12413 = vmatprep.mubr.msk.bf16.mxu1 %vm13313_vm0, %v13312_v13 }
 0xa14   :  { %12411 = vmatprep.subr.bf16.mxu1 %v13312_v13  ;;  %12450 = vmatpush3.bf16.msra.mxu0 %v13155_v50  ;;  %v10029_v62 = vld [vmem:[%s15740_s10 + $0x18] sm:$0xf]  ;;  %v13183_v50 = vld [vmem:[%s15741_s11 + $0x188] sm:$0xff]  }
 0xa15   :  { %v12368_v1 = vpop.f32.mrf.mxu1  ;;  %12451 = vmatprep.subr.bf16.mxu0 %v13312_v13 }
 0xa16   :  { %v13172_v1 = vld [vmem:[%s15741_s11 + $0x1b8] sm:$0xff]  }
 0xa17   :  { %12412 = vmatpush3.bf16.msra.mxu1 %v15035_v2 }
 0xa18   :  { %12417 = vmatprep.subr.bf16.mxu1 %v13312_v13  ;;  %12452 = vmatpush3.bf16.msra.mxu0 %v13157_v12  ;;  %v13184_v12 = vld [vmem:[%s15741_s11 + $0x180] sm:$0xff]  }
 0xa19   :  { %12453 = vmatprep.subr.bf16.mxu0 %v13312_v13 }
 0xa1a   :  { %12414 = vmatmul.mubr.msk.bf16.vlgmr.msra.gmra.mxu1 %vm6683_vm5, %v9925_v9  ;;  %v13171_v9 = vld [vmem:[%s15741_s11 + $0x168] sm:$0xff]  }
 0xa1b   :  { %12418 = vmatpush3.bf16.msra.mxu1 %v13145_v28  ;;  %12433 = vmatprep.mubr.msk.bf16.mxu1 %vm13313_vm0, %v13312_v13  ;;  %v13174_v28 = vld [vmem:[%s15741_s11 + $0x1b0] sm:$0xff]  }
 0xa1c   :  { %12419 = vmatprep.subr.bf16.mxu1 %v13312_v13  ;;  %12454 = vmatpush3.bf16.msra.mxu0 %v13159_v29 }
 0xa1d   :  { %12455 = vmatprep.subr.bf16.mxu0 %v13312_v13 }
 0xa1f   :  { %12420 = vmatpush3.bf16.msra.mxu1 %v13146_v0  ;;  %v13173_v0 = vld [vmem:[%s15741_s11 + $0x160] sm:$0xff]  }
 0xa20   :  { %12421 = vmatprep.subr.bf16.mxu1 %v13312_v13  ;;  %12456 = vmatpush3.bf16.msra.mxu0 %v13161_v42 }
 0xa21   :  { %12457 = vmatprep.subr.bf16.mxu0 %v13312_v13 }
 0xa23   :  { %12422 = vmatpush3.bf16.msra.mxu1 %v13147_v8  ;;  %v13176_v8 = vld [vmem:[%s15741_s11 + $0x1a8] sm:$0xff]  }
 0xa24   :  { %12423 = vmatprep.subr.bf16.mxu1 %v13312_v13  ;;  %12458 = vmatpush3.bf16.msra.mxu0 %v13163_v4 }
 0xa25   :  { %12459 = vmatprep.subr.bf16.mxu0 %v13312_v13 }
 0xa27   :  { %12424 = vmatpush3.bf16.msra.mxu1 %v13148_v26  ;;  %v13175_v26 = vld [vmem:[%s15741_s11 + $0x158] sm:$0xff]  }
 0xa28   :  { %12425 = vmatprep.subr.bf16.mxu1 %v13312_v13  ;;  %12460 = vmatpush3.bf16.msra.mxu0 %v13165_v52  ;;  %v13188_v52 = vld [vmem:[%s15741_s11 + $0x238] sm:$0xff]  }
 0xa29   :  { %12493 = vmatprep.subr.bf16.mxu0 %v13312_v13 }
 0xa2b   :  { %12426 = vmatpush3.bf16.msra.mxu1 %v13149_v27  ;;  %v13178_v27 = vld [vmem:[%s15741_s11 + $0x1a0] sm:$0xff]  }
 0xa2c   :  { %12427 = vmatprep.subr.bf16.mxu1 %v13312_v13 }
 0xa2f   :  { %12428 = vmatpush3.bf16.msra.mxu1 %v13150_v5  ;;  %v13177_v5 = vld [vmem:[%s15741_s11 + $0x150] sm:$0xff]  }
 0xa30   :  { %12429 = vmatprep.subr.bf16.mxu1 %v13312_v13 }
 0xa33   :  { %12430 = vmatpush3.bf16.msra.mxu1 %v13151_v33  ;;  %v13179_v33 = vld [vmem:[%s15741_s11 + $0x148] sm:$0xff]  }
 0xa34   :  { %12431 = vmatprep.subr.bf16.mxu1 %v13312_v13 }
 0xa37   :  { %12432 = vmatpush3.bf16.msra.mxu1 %v13152_v49  ;;  %v13180_v49 = vld [vmem:[%s15741_s11 + $0x198] sm:$0xff]  }
 0xa38   :  { %12437 = vmatprep.subr.bf16.mxu1 %v13312_v13 }
 0xaca   :  { %v6977_v54 = vpop.f32.mrf.mxu0 }
 0xacc   :  { %v12407_v35 = vpop.f32.mrf.mxu0 }
 0xace   :  { %v6980_v45 = vpop.f32.mrf.mxu0 }
 0xad0   :  { %v12408_v40 = vpop.f32.mrf.mxu0 }
 0xad2   :  { %v6889_v57 = vpop.f32.mrf.mxu1 }
 0xad3   :  { %v6978_v22 = vadd.f32 %v6977_v54, %v6889_v57 }
 0xad4   :  { %v12387_v55 = vpop.f32.mrf.mxu1 }
 0xad6   :  { %v6892_v16 = vpop.f32.mrf.mxu1 }
 0xad8   :  { %v12388_v61 = vpop.f32.mrf.mxu1 }
 0xada   :  { %v7022_v24 = vpop.f32.mrf.mxu1 }
 0xadb   :  { %v7028_v10 = vpack.c.bf16 %v7022_v24, %v7022_v24 }
 0xadc   :  { %v12415_v11 = vpop.f32.mrf.mxu1 }
 0xadd   :  { %12434 = vmatmul.mubr.bf16.vlgmr.msra.gmra.mxu1 %v7028_v10 }
 0xade   :  { %12438 = vmatpush3.bf16.msra.mxu1 %v15037_v30  ;;  %v7025_v31 = vpop.f32.mrf.mxu1  ;;  %12441 = vmatprep.mubr.msk.bf16.mxu1 %vm13313_vm0, %v13312_v13 }
 0xadf   :  { %12439 = vmatprep.subr.bf16.mxu1 %v13312_v13 }
 0xae0   :  { %v12416_v19 = vpop.f32.mrf.mxu1 }
 0xae2   :  { %12440 = vmatpush3.bf16.msra.mxu1 %v15035_v2 }
 0xae3   :  { %12465 = vmatprep.subr.bf16.mxu1 %v13312_v13 }
 0xae5   :  { %12442 = vmatmul.mubr.msk.bf16.vlgmr.msra.gmra.mxu1 %vm6683_vm5, %v9951_v47  ;;  %v10055_v47 = vld [vmem:[%s15740_s10 + $0x1c] sm:$0xf] }
 0xae6   :  { %12466 = vmatpush3.bf16.msra.mxu1 %v15037_v30  ;;  %12469 = vmatprep.mubr.msk.bf16.mxu1 %vm13313_vm0, %v13312_v13 }
 0xae7   :  { %12467 = vmatprep.subr.bf16.mxu1 %v13312_v13 }
 0xaea   :  { %12468 = vmatpush3.bf16.msra.mxu1 %v15035_v2 }
 0xaeb   :  { %12473 = vmatprep.subr.bf16.mxu1 %v13312_v13 }
 0xaed   :  { %12470 = vmatmul.mubr.msk.bf16.vlgmr.msra.gmra.mxu1 %vm6683_vm5, %v9977_v15 }
 0xaee   :  { %12474 = vmatpush3.bf16.msra.mxu1 %v13156_v17  ;;  %12489 = vmatprep.mubr.msk.bf16.mxu1 %vm13313_vm0, %v13312_v13  ;;  %v13185_v17 = vld [vmem:[%s15741_s11 + $0x1f8] sm:$0xff]  }
 0xaef   :  { %12475 = vmatprep.subr.bf16.mxu1 %v13312_v13 }
 0xaf2   :  { %12476 = vmatpush3.bf16.msra.mxu1 %v13158_v14 }
 0xaf3   :  { %12477 = vmatprep.subr.bf16.mxu1 %v13312_v13 }
 0xaf6   :  { %12478 = vmatpush3.bf16.msra.mxu1 %v13160_v21 }
 0xaf7   :  { %12479 = vmatprep.subr.bf16.mxu1 %v13312_v13 }
 0xafa   :  { %12480 = vmatpush3.bf16.msra.mxu1 %v13162_v53  ;;  %v13186_v53 = vld [vmem:[%s15741_s11 + $0x1f0] sm:$0xff]  }
 0xafb   :  { %12481 = vmatprep.subr.bf16.mxu1 %v13312_v13 }
 0xafe   :  { %12482 = vmatpush3.bf16.msra.mxu1 %v13164_v36  ;;  %v10081_v36 = vld [vmem:[%s15740_s10 + $0x20] sm:$0xf] }
 0xaff   :  { %12483 = vmatprep.subr.bf16.mxu1 %v13312_v13 }
 0xb02   :  { %12484 = vmatpush3.bf16.msra.mxu1 %v13166_v46  ;;  %v13187_v46 = vld [vmem:[%s15741_s11 + $0x1e8] sm:$0xff]  }
 0xb03   :  { %12485 = vmatprep.subr.bf16.mxu1 %v13312_v13 }
 0xb06   :  { %12486 = vmatpush3.bf16.msra.mxu1 %v13167_v37  ;;  %v13190_v37 = vld [vmem:[%s15741_s11 + $0x230] sm:$0xff]  }
 0xb07   :  { %12487 = vmatprep.subr.bf16.mxu1 %v13312_v13 }
 0xb0a   :  { %12488 = vmatpush3.bf16.msra.mxu1 %v13168_v43  ;;  %v13189_v43 = vld [vmem:[%s15741_s11 + $0x1e0] sm:$0xff]  }
 0xb0b   :  { %12521 = vmatprep.subr.bf16.mxu1 %v13312_v13 }
 0xb9d   :  { %v7128_v58 = vpop.f32.mrf.mxu1 }
 0xb9e   :  { %v15227_v51 = vadd.f32 %v7128_v58, %v6978_v22  ;;  %v13192_v58 = vld [vmem:[%s15741_s11 + $0x228] sm:$0xff]  }
 0xb9f   :  { %v12435_v34 = vpop.f32.mrf.mxu1 }
 0xba0   :  { %v13194_v34 = vld [vmem:[%s15741_s11 + $0x220] sm:$0xff]  }
 0xba1   :  { %v7131_v23 = vpop.f32.mrf.mxu1 }
 0xba2   :  { %v13193_v23 = vld [vmem:[%s15741_s11 + $0x1d0] sm:$0xff]  }
 0xba3   :  { %v12436_v38 = vpop.f32.mrf.mxu1 }
 0xba4   :  { %v13195_v38 = vld [vmem:[%s15741_s11 + $0x1c8] sm:$0xff]  }
 0xba5   :  { %v7174_v25 = vpop.f32.mrf.mxu1 }
 0xba6   :  { %v7180_v20 = vpack.c.bf16 %v7174_v25, %v7174_v25  ;;  %v13196_v25 = vld [vmem:[%s15741_s11 + $0x218] sm:$0xff]  }
 0xba7   :  { %v12443_v60 = vpop.f32.mrf.mxu1 }
 0xba8   :  { %12462 = vmatmul.mubr.bf16.vlgmr.msra.gmra.mxu0 %v7180_v20  ;;  %v13197_v20 = vld [vmem:[%s15741_s11 + $0x1c0] sm:$0xff]   ;;  %v13198_v60 = vld [vmem:[%s15741_s11 + $0x210] sm:$0xff]  }
 0xba9   :  { %12494 = vmatpush3.bf16.msra.mxu0 %v15037_v30  ;;  %v7177_v48 = vpop.f32.mrf.mxu1  ;;  %12497 = vmatprep.mubr.msk.bf16.mxu0 %vm13313_vm0, %v13312_v13 }
 0xbaa   :  { %12495 = vmatprep.subr.bf16.mxu0 %v13312_v13  ;;  %v13199_v48 = vld [vmem:[%s15741_s11 + $0x208] sm:$0xff]  }
 0xbab   :  { %v12444_v44 = vpop.f32.mrf.mxu1 }
 0xbac   :  { %v13200_v44 = vld [vmem:[%s15741_s11 + $0x200] sm:$0xff]  }
 0xbad   :  { %12496 = vmatpush3.bf16.msra.mxu0 %v15035_v2  ;;  %v7326_v59 = vpop.f32.mrf.mxu1 }
 0xbae   :  { %v7332_v18 = vpack.c.bf16 %v7326_v59, %v7326_v59  ;;  %12501 = vmatprep.subr.bf16.mxu0 %v13312_v13 }
 0xbaf   :  { %v12471_v41 = vpop.f32.mrf.mxu1 }
 0xbb0   :  { %12490 = vmatmul.mubr.bf16.vlgmr.msra.gmra.mxu1 %v7332_v18  ;;  %12498 = vmatmul.mubr.msk.bf16.vlgmr.msra.gmra.mxu0 %vm6683_vm5, %v10003_v56 }
 0xbb1   :  { %12522 = vmatpush3.bf16.msra.mxu1 %v15037_v30  ;;  %12525 = vmatprep.mubr.msk.bf16.mxu1 %vm13313_vm0, %v13312_v13  ;;  %v7329_v3 = vpop.f32.mrf.mxu1 }
 0xbb2   :  { %12523 = vmatprep.subr.bf16.mxu1 %v13312_v13  ;;  %12502 = vmatpush3.bf16.msra.mxu0 %v13169_v32 }
 0xbb3   :  { %12503 = vmatprep.subr.bf16.mxu0 %v13312_v13  ;;  %v12472_v6 = vpop.f32.mrf.mxu1  ;;  %12517 = vmatprep.mubr.msk.bf16.mxu0 %vm13313_vm0, %v13312_v13 }
 0xbb5   :  { %12524 = vmatpush3.bf16.msra.mxu1 %v15035_v2 }
 0xbb6   :  { %12504 = vmatpush3.bf16.msra.mxu0 %v13170_v39  ;;  %12529 = vmatprep.subr.bf16.mxu1 %v13312_v13 }
 0xbb7   :  { %12505 = vmatprep.subr.bf16.mxu0 %v13312_v13 }
 0xbb8   :  { %12526 = vmatmul.mubr.msk.bf16.vlgmr.msra.gmra.mxu1 %vm6683_vm5, %v10029_v62 }
 0xbb9   :  { %12530 = vmatpush3.bf16.msra.mxu1 %v13172_v1  ;;  %12545 = vmatprep.mubr.msk.bf16.mxu1 %vm13313_vm0, %v13312_v13 }
 0xbba   :  { %12506 = vmatpush3.bf16.msra.mxu0 %v13171_v9  ;;  %12531 = vmatprep.subr.bf16.mxu1 %v13312_v13 }
 0xbbb   :  { %12507 = vmatprep.subr.bf16.mxu0 %v13312_v13 }
 0xbbd   :  { %12532 = vmatpush3.bf16.msra.mxu1 %v13174_v28 }
 0xbbe   :  { %12508 = vmatpush3.bf16.msra.mxu0 %v13173_v0  ;;  %12533 = vmatprep.subr.bf16.mxu1 %v13312_v13 }
 0xbbf   :  { %12509 = vmatprep.subr.bf16.mxu0 %v13312_v13 }
 0xbc1   :  { %12534 = vmatpush3.bf16.msra.mxu1 %v13176_v8 }
 0xbc2   :  { %12510 = vmatpush3.bf16.msra.mxu0 %v13175_v26  ;;  %12535 = vmatprep.subr.bf16.mxu1 %v13312_v13 }
 0xbc3   :  { %12511 = vmatprep.subr.bf16.mxu0 %v13312_v13 }
 0xbc5   :  { %12536 = vmatpush3.bf16.msra.mxu1 %v13178_v27 }
 0xbc6   :  { %12512 = vmatpush3.bf16.msra.mxu0 %v13177_v5  ;;  %12537 = vmatprep.subr.bf16.mxu1 %v13312_v13  ;;  %v10107_v5 = vld [vmem:[%s15740_s10 + $0x24] sm:$0xf] }
 0xbc7   :  { %12513 = vmatprep.subr.bf16.mxu0 %v13312_v13 }
 0xbc9   :  { %12538 = vmatpush3.bf16.msra.mxu1 %v13180_v49  ;;  %v13201_v49 = vld [vmem:[%s15741_s11 + $0x278] sm:$0xff]  }
 0xbca   :  { %12514 = vmatpush3.bf16.msra.mxu0 %v13179_v33  ;;  %12539 = vmatprep.subr.bf16.mxu1 %v13312_v13 }
 0xbcb   :  { %12515 = vmatprep.subr.bf16.mxu0 %v13312_v13 }
 0xbcd   :  { %12540 = vmatpush3.bf16.msra.mxu1 %v13182_v63 }
 0xbce   :  { %12516 = vmatpush3.bf16.msra.mxu0 %v13181_v7  ;;  %12541 = vmatprep.subr.bf16.mxu1 %v13312_v13 }
 0xbcf   :  { %12549 = vmatprep.subr.bf16.mxu0 %v13312_v13 }
 0xbd1   :  { %12542 = vmatpush3.bf16.msra.mxu1 %v13183_v50  ;;  %v13202_v50 = vld [vmem:[%s15741_s11 + $0x270] sm:$0xff]  }
 0xbd2   :  { %12543 = vmatprep.subr.bf16.mxu1 %v13312_v13 }
 0xbd5   :  { %12544 = vmatpush3.bf16.msra.mxu1 %v13184_v12 }
 0xbd6   :  { %12577 = vmatprep.subr.bf16.mxu1 %v13312_v13 }
 0xc68   :  { %v7280_v29 = vpop.f32.mrf.mxu0 }
 0xc69   :  { %v7286_v42 = vadd.f32 %v7280_v29, %v15227_v51  ;;  %v13191_v51 = vld [vmem:[%s15741_s11 + $0x1d8] sm:$0xff]   ;;  %v10133_v29 = vld [vmem:[%s15740_s10 + $0x28] sm:$0xf] }
 0xc6a   :  { %v12463_v54 = vpop.f32.mrf.mxu0 }
 0xc6b   :  { %v13203_v54 = vld [vmem:[%s15741_s11 + $0x268] sm:$0xff]  }
 0xc6c   :  { %v7283_v35 = vpop.f32.mrf.mxu0 }
 0xc6d   :  { %v13206_v35 = vld [vmem:[%s15741_s11 + $0x2b0] sm:$0xff]  }
 0xc6e   :  { %v12464_v45 = vpop.f32.mrf.mxu0 }
 0xc6f   :  { %v13205_v45 = vld [vmem:[%s15741_s11 + $0x260] sm:$0xff]  }
 0xc70   :  { %v7432_v40 = vpop.f32.mrf.mxu1  ;;  %v7478_v57 = vpop.f32.mrf.mxu0 }
 0xc71   :  { %v15318_v22 = vadd.f32 %v7432_v40, %v7286_v42  ;;  %v7484_v55 = vpack.c.bf16 %v7478_v57, %v7478_v57  ;;  %v13204_v42 = vld [vmem:[%s15741_s11 + $0x2b8] sm:$0xff]   ;;  %v13208_v40 = vld [vmem:[%s15741_s11 + $0x2a8] sm:$0xff]  }
 0xc72   :  { %v12491_v16 = vpop.f32.mrf.mxu1  ;;  %v12499_v61 = vpop.f32.mrf.mxu0  ;;  %v13207_v57 = vld [vmem:[%s15741_s11 + $0x258] sm:$0xff]  }
 0xc73   :  { %12518 = vmatmul.mubr.bf16.vlgmr.msra.gmra.mxu0 %v7484_v55  ;;  %v13209_v55 = vld [vmem:[%s15741_s11 + $0x250] sm:$0xff]   ;;  %v13211_v16 = vld [vmem:[%s15741_s11 + $0x248] sm:$0xff]   ;;  %v13212_v61 = vld [vmem:[%s15741_s11 + $0x298] sm:$0xff]  }
 0xc74   :  { %12550 = vmatpush3.bf16.msra.mxu0 %v15037_v30  ;;  %v7435_v24 = vpop.f32.mrf.mxu1  ;;  %v7481_v10 = vpop.f32.mrf.mxu0  ;;  %12553 = vmatprep.mubr.msk.bf16.mxu0 %vm13313_vm0, %v13312_v13 }
 0xc75   :  { %12551 = vmatprep.subr.bf16.mxu0 %v13312_v13  ;;  %v13213_v24 = vld [vmem:[%s15741_s11 + $0x240] sm:$0xff]   ;;  %v13214_v10 = vld [vmem:[%s15741_s11 + $0x290] sm:$0xff]  }
 0xc76   :  { %v12492_v11 = vpop.f32.mrf.mxu1  ;;  %v12500_v31 = vpop.f32.mrf.mxu0 }
 0xc77   :  { %v13215_v11 = vld [vmem:[%s15741_s11 + $0x288] sm:$0xff]   ;;  %v13216_v31 = vld [vmem:[%s15741_s11 + $0x280] sm:$0xff]  }
 0xc78   :  { %12552 = vmatpush3.bf16.msra.mxu0 %v15035_v2  ;;  %v7630_v19 = vpop.f32.mrf.mxu1 }
 0xc79   :  { %v7636_v15 = vpack.c.bf16 %v7630_v19, %v7630_v19  ;;  %12557 = vmatprep.subr.bf16.mxu0 %v13312_v13 }
 0xc7a   :  { %v12527_v14 = vpop.f32.mrf.mxu1 }
 0xc7b   :  { %12546 = vmatmul.mubr.bf16.vlgmr.msra.gmra.mxu1 %v7636_v15  ;;  %12554 = vmatmul.mubr.msk.bf16.vlgmr.msra.gmra.mxu0 %vm6683_vm5, %v10055_v47 }
 0xc7c   :  { %12578 = vmatpush3.bf16.msra.mxu1 %v15037_v30  ;;  %12581 = vmatprep.mubr.msk.bf16.mxu1 %vm13313_vm0, %v13312_v13  ;;  %v7633_v21 = vpop.f32.mrf.mxu1 }
 0xc7d   :  { %12579 = vmatprep.subr.bf16.mxu1 %v13312_v13  ;;  %12558 = vmatpush3.bf16.msra.mxu0 %v13185_v17 }
 0xc7e   :  { %12559 = vmatprep.subr.bf16.mxu0 %v13312_v13  ;;  %v12528_v4 = vpop.f32.mrf.mxu1  ;;  %12573 = vmatprep.mubr.msk.bf16.mxu0 %vm13313_vm0, %v13312_v13 }
 0xc80   :  { %12580 = vmatpush3.bf16.msra.mxu1 %v15035_v2 }
 0xc81   :  { %12560 = vmatpush3.bf16.msra.mxu0 %v13186_v53  ;;  %12585 = vmatprep.subr.bf16.mxu1 %v13312_v13 }
 0xc82   :  { %12561 = vmatprep.subr.bf16.mxu0 %v13312_v13 }
 0xc83   :  { %12582 = vmatmul.mubr.msk.bf16.vlgmr.msra.gmra.mxu1 %vm6683_vm5, %v10081_v36 }
 0xc84   :  { %12586 = vmatpush3.bf16.msra.mxu1 %v13188_v52  ;;  %12601 = vmatprep.mubr.msk.bf16.mxu1 %vm13313_vm0, %v13312_v13 }
 0xc85   :  { %12562 = vmatpush3.bf16.msra.mxu0 %v13187_v46  ;;  %12587 = vmatprep.subr.bf16.mxu1 %v13312_v13 }
 0xc86   :  { %12563 = vmatprep.subr.bf16.mxu0 %v13312_v13 }
 0xc88   :  { %12588 = vmatpush3.bf16.msra.mxu1 %v13190_v37 }
 0xc89   :  { %12564 = vmatpush3.bf16.msra.mxu0 %v13189_v43  ;;  %12589 = vmatprep.subr.bf16.mxu1 %v13312_v13 }
 0xc8a   :  { %12565 = vmatprep.subr.bf16.mxu0 %v13312_v13 }
 0xc8c   :  { %12590 = vmatpush3.bf16.msra.mxu1 %v13192_v58 }
 0xc8d   :  { %12566 = vmatpush3.bf16.msra.mxu0 %v13191_v51  ;;  %12591 = vmatprep.subr.bf16.mxu1 %v13312_v13 }
 0xc8e   :  { %12567 = vmatprep.subr.bf16.mxu0 %v13312_v13 }
 0xc90   :  { %12592 = vmatpush3.bf16.msra.mxu1 %v13194_v34 }
 0xc91   :  { %12568 = vmatpush3.bf16.msra.mxu0 %v13193_v23  ;;  %12593 = vmatprep.subr.bf16.mxu1 %v13312_v13  ;;  %v10159_v23 = vld [vmem:[%s15740_s10 + $0x2c] sm:$0xf] }
 0xc92   :  { %12569 = vmatprep.subr.bf16.mxu0 %v13312_v13 }
 0xc94   :  { %12594 = vmatpush3.bf16.msra.mxu1 %v13196_v25  ;;  %v13217_v25 = vld [vmem:[%s15741_s11 + $0x2f8] sm:$0xff]  }
 0xc95   :  { %12570 = vmatpush3.bf16.msra.mxu0 %v13195_v38  ;;  %12595 = vmatprep.subr.bf16.mxu1 %v13312_v13 }
 0xc96   :  { %12571 = vmatprep.subr.bf16.mxu0 %v13312_v13 }
 0xc98   :  { %12596 = vmatpush3.bf16.msra.mxu1 %v13198_v60 }
 0xc99   :  { %12572 = vmatpush3.bf16.msra.mxu0 %v13197_v20  ;;  %12597 = vmatprep.subr.bf16.mxu1 %v13312_v13 }
 0xc9a   :  { %12605 = vmatprep.subr.bf16.mxu0 %v13312_v13 }
 0xc9c   :  { %12598 = vmatpush3.bf16.msra.mxu1 %v13199_v48  ;;  %v13218_v48 = vld [vmem:[%s15741_s11 + $0x2f0] sm:$0xff]  }
 0xc9d   :  { %12599 = vmatprep.subr.bf16.mxu1 %v13312_v13 }
 0xca0   :  { %12600 = vmatpush3.bf16.msra.mxu1 %v13200_v44 }
 0xca1   :  { %12633 = vmatprep.subr.bf16.mxu1 %v13312_v13 }
 0xd33   :  { %v7584_v59 = vpop.f32.mrf.mxu0 }
 0xd34   :  { %v7590_v56 = vadd.f32 %v7584_v59, %v15318_v22  ;;  %v13210_v22 = vld [vmem:[%s15741_s11 + $0x2a0] sm:$0xff]   ;;  %v10185_v59 = vld [vmem:[%s15740_s10 + $0x30] sm:$0xf] }
 0xd35   :  { %v12519_v18 = vpop.f32.mrf.mxu0 }
 0xd36   :  { %v13219_v18 = vld [vmem:[%s15741_s11 + $0x2e8] sm:$0xff]  }
 0xd37   :  { %v7587_v32 = vpop.f32.mrf.mxu0 }
 0xd38   :  { %v13222_v32 = vld [vmem:[%s15741_s11 + $0x330] sm:$0xff]  }
 0xd39   :  { %v12520_v41 = vpop.f32.mrf.mxu0 }
 0xd3a   :  { %v13221_v41 = vld [vmem:[%s15741_s11 + $0x2e0] sm:$0xff]  }
 0xd3b   :  { %v7736_v3 = vpop.f32.mrf.mxu1  ;;  %v7782_v39 = vpop.f32.mrf.mxu0 }
 0xd3c   :  { %v15409_v6 = vadd.f32 %v7736_v3, %v7590_v56  ;;  %v7788_v62 = vpack.c.bf16 %v7782_v39, %v7782_v39  ;;  %v13220_v56 = vld [vmem:[%s15741_s11 + $0x338] sm:$0xff]   ;;  %v13224_v3 = vld [vmem:[%s15741_s11 + $0x328] sm:$0xff]  }
 0xd3d   :  { %v12547_v1 = vpop.f32.mrf.mxu1  ;;  %v12555_v9 = vpop.f32.mrf.mxu0  ;;  %v13223_v39 = vld [vmem:[%s15741_s11 + $0x2d8] sm:$0xff]  }
 0xd3e   :  { %12574 = vmatmul.mubr.bf16.vlgmr.msra.gmra.mxu0 %v7788_v62  ;;  %v13225_v62 = vld [vmem:[%s15741_s11 + $0x2d0] sm:$0xff]   ;;  %v13227_v1 = vld [vmem:[%s15741_s11 + $0x2c8] sm:$0xff]   ;;  %v13228_v9 = vld [vmem:[%s15741_s11 + $0x318] sm:$0xff]  }
 0xd3f   :  { %12606 = vmatpush3.bf16.msra.mxu0 %v15037_v30  ;;  %v7739_v28 = vpop.f32.mrf.mxu1  ;;  %v7785_v0 = vpop.f32.mrf.mxu0  ;;  %12609 = vmatprep.mubr.msk.bf16.mxu0 %vm13313_vm0, %v13312_v13 }
 0xd40   :  { %12607 = vmatprep.subr.bf16.mxu0 %v13312_v13  ;;  %v13229_v28 = vld [vmem:[%s15741_s11 + $0x2c0] sm:$0xff]   ;;  %v13230_v0 = vld [vmem:[%s15741_s11 + $0x310] sm:$0xff]  }
 0xd41   :  { %v12548_v8 = vpop.f32.mrf.mxu1  ;;  %v12556_v26 = vpop.f32.mrf.mxu0 }
 0xd42   :  { %v13231_v8 = vld [vmem:[%s15741_s11 + $0x308] sm:$0xff]   ;;  %v13232_v26 = vld [vmem:[%s15741_s11 + $0x300] sm:$0xff]  }
 0xd43   :  { %12608 = vmatpush3.bf16.msra.mxu0 %v15035_v2  ;;  %v7934_v27 = vpop.f32.mrf.mxu1 }
 0xd44   :  { %v7940_v33 = vpack.c.bf16 %v7934_v27, %v7934_v27  ;;  %12613 = vmatprep.subr.bf16.mxu0 %v13312_v13 }
 0xd45   :  { %v12583_v7 = vpop.f32.mrf.mxu1 }
 0xd46   :  { %12602 = vmatmul.mubr.bf16.vlgmr.msra.gmra.mxu1 %v7940_v33  ;;  %12610 = vmatmul.mubr.msk.bf16.vlgmr.msra.gmra.mxu0 %vm6683_vm5, %v10107_v5 }
 0xd47   :  { %12634 = vmatpush3.bf16.msra.mxu1 %v15037_v30  ;;  %12637 = vmatprep.mubr.msk.bf16.mxu1 %vm13313_vm0, %v13312_v13  ;;  %v7937_v63 = vpop.f32.mrf.mxu1 }
 0xd48   :  { %12635 = vmatprep.subr.bf16.mxu1 %v13312_v13  ;;  %12614 = vmatpush3.bf16.msra.mxu0 %v13201_v49 }
 0xd49   :  { %12615 = vmatprep.subr.bf16.mxu0 %v13312_v13  ;;  %v12584_v12 = vpop.f32.mrf.mxu1  ;;  %12629 = vmatprep.mubr.msk.bf16.mxu0 %vm13313_vm0, %v13312_v13 }
 0xd4b   :  { %12636 = vmatpush3.bf16.msra.mxu1 %v15035_v2 }
 0xd4c   :  { %12616 = vmatpush3.bf16.msra.mxu0 %v13202_v50  ;;  %12641 = vmatprep.subr.bf16.mxu1 %v13312_v13 }
 0xd4d   :  { %12617 = vmatprep.subr.bf16.mxu0 %v13312_v13 }
 0xd4e   :  { %12638 = vmatmul.mubr.msk.bf16.vlgmr.msra.gmra.mxu1 %vm6683_vm5, %v10133_v29 }
 0xd4f   :  { %12642 = vmatpush3.bf16.msra.mxu1 %v13204_v42  ;;  %12657 = vmatprep.mubr.msk.bf16.mxu1 %vm13313_vm0, %v13312_v13 }
 0xd50   :  { %12618 = vmatpush3.bf16.msra.mxu0 %v13203_v54  ;;  %12643 = vmatprep.subr.bf16.mxu1 %v13312_v13 }
 0xd51   :  { %12619 = vmatprep.subr.bf16.mxu0 %v13312_v13 }
 0xd53   :  { %12644 = vmatpush3.bf16.msra.mxu1 %v13206_v35 }
 0xd54   :  { %12620 = vmatpush3.bf16.msra.mxu0 %v13205_v45  ;;  %12645 = vmatprep.subr.bf16.mxu1 %v13312_v13 }
 0xd55   :  { %12621 = vmatprep.subr.bf16.mxu0 %v13312_v13 }
 0xd57   :  { %12646 = vmatpush3.bf16.msra.mxu1 %v13208_v40 }
 0xd58   :  { %12622 = vmatpush3.bf16.msra.mxu0 %v13207_v57  ;;  %12647 = vmatprep.subr.bf16.mxu1 %v13312_v13 }
 0xd59   :  { %12623 = vmatprep.subr.bf16.mxu0 %v13312_v13 }
 0xd5b   :  { %12648 = vmatpush3.bf16.msra.mxu1 %v13210_v22 }
 0xd5c   :  { %12624 = vmatpush3.bf16.msra.mxu0 %v13209_v55  ;;  %12649 = vmatprep.subr.bf16.mxu1 %v13312_v13  ;;  %v10211_v55 = vld [vmem:[%s15740_s10 + $0x34] sm:$0xf] }
 0xd5d   :  { %12625 = vmatprep.subr.bf16.mxu0 %v13312_v13 }
 0xd5f   :  { %12650 = vmatpush3.bf16.msra.mxu1 %v13212_v61  ;;  %v13233_v61 = vld [vmem:[%s15741_s11 + $0x378] sm:$0xff]  }
 0xd60   :  { %12626 = vmatpush3.bf16.msra.mxu0 %v13211_v16  ;;  %12651 = vmatprep.subr.bf16.mxu1 %v13312_v13 }
 0xd61   :  { %12627 = vmatprep.subr.bf16.mxu0 %v13312_v13 }
 0xd63   :  { %12652 = vmatpush3.bf16.msra.mxu1 %v13214_v10 }
 0xd64   :  { %12628 = vmatpush3.bf16.msra.mxu0 %v13213_v24  ;;  %12653 = vmatprep.subr.bf16.mxu1 %v13312_v13 }
 0xd65   :  { %12661 = vmatprep.subr.bf16.mxu0 %v13312_v13 }
 0xd67   :  { %12654 = vmatpush3.bf16.msra.mxu1 %v13215_v11  ;;  %v13234_v11 = vld [vmem:[%s15741_s11 + $0x370] sm:$0xff]  }
 0xd68   :  { %12655 = vmatprep.subr.bf16.mxu1 %v13312_v13 }
 0xd6b   :  { %12656 = vmatpush3.bf16.msra.mxu1 %v13216_v31 }
 0xd6c   :  { %12689 = vmatprep.subr.bf16.mxu1 %v13312_v13 }
 0xdfe   :  { %v7888_v19 = vpop.f32.mrf.mxu0 }
 0xdff   :  { %v7894_v47 = vadd.f32 %v7888_v19, %v15409_v6  ;;  %v13226_v6 = vld [vmem:[%s15741_s11 + $0x320] sm:$0xff]   ;;  %v10237_v19 = vld [vmem:[%s15740_s10 + $0x38] sm:$0xf] }
 0xe00   :  { %v12575_v15 = vpop.f32.mrf.mxu0 }
 0xe01   :  { %v13235_v15 = vld [vmem:[%s15741_s11 + $0x368] sm:$0xff]  }
 0xe02   :  { %v7891_v17 = vpop.f32.mrf.mxu0 }
 0xe03   :  { %v13238_v17 = vld [vmem:[%s15741_s11 + $0x3b0] sm:$0xff]  }
 0xe04   :  { %v12576_v14 = vpop.f32.mrf.mxu0 }
 0xe05   :  { %v13237_v14 = vld [vmem:[%s15741_s11 + $0x360] sm:$0xff]  }
 0xe06   :  { %v8040_v21 = vpop.f32.mrf.mxu1  ;;  %v8086_v53 = vpop.f32.mrf.mxu0 }
 0xe07   :  { %v15500_v4 = vadd.f32 %v8040_v21, %v7894_v47  ;;  %v8092_v36 = vpack.c.bf16 %v8086_v53, %v8086_v53  ;;  %v13236_v47 = vld [vmem:[%s15741_s11 + $0x3b8] sm:$0xff]   ;;  %v13240_v21 = vld [vmem:[%s15741_s11 + $0x3a8] sm:$0xff]  }
 0xe08   :  { %v12603_v52 = vpop.f32.mrf.mxu1  ;;  %v12611_v46 = vpop.f32.mrf.mxu0  ;;  %v13239_v53 = vld [vmem:[%s15741_s11 + $0x358] sm:$0xff]  }
 0xe09   :  { %12630 = vmatmul.mubr.bf16.vlgmr.msra.gmra.mxu0 %v8092_v36  ;;  %v13242_v36 = vld [vmem:[%s15741_s11 + $0x3a0] sm:$0xff]   ;;  %v13243_v52 = vld [vmem:[%s15741_s11 + $0x348] sm:$0xff]   ;;  %v13244_v46 = vld [vmem:[%s15741_s11 + $0x398] sm:$0xff]  }
 0xe0a   :  { %12662 = vmatpush3.bf16.msra.mxu0 %v15037_v30  ;;  %v8043_v37 = vpop.f32.mrf.mxu1  ;;  %v8089_v43 = vpop.f32.mrf.mxu0  ;;  %12665 = vmatprep.mubr.msk.bf16.mxu0 %vm13313_vm0, %v13312_v13 }
 0xe0b   :  { %12663 = vmatprep.subr.bf16.mxu0 %v13312_v13  ;;  %v13245_v37 = vld [vmem:[%s15741_s11 + $0x340] sm:$0xff]   ;;  %v13246_v43 = vld [vmem:[%s15741_s11 + $0x390] sm:$0xff]  }
 0xe0c   :  { %v12604_v58 = vpop.f32.mrf.mxu1  ;;  %v12612_v51 = vpop.f32.mrf.mxu0 }
 0xe0d   :  { %v13247_v58 = vld [vmem:[%s15741_s11 + $0x388] sm:$0xff]   ;;  %v13248_v51 = vld [vmem:[%s15741_s11 + $0x380] sm:$0xff]  }
 0xe0e   :  { %12664 = vmatpush3.bf16.msra.mxu0 %v15035_v2  ;;  %v8238_v34 = vpop.f32.mrf.mxu1 }
 0xe0f   :  { %v8244_v38 = vpack.c.bf16 %v8238_v34, %v8238_v34  ;;  %12669 = vmatprep.subr.bf16.mxu0 %v13312_v13 }
 0xe10   :  { %v12639_v20 = vpop.f32.mrf.mxu1 }
 0xe11   :  { %12658 = vmatmul.mubr.bf16.vlgmr.msra.gmra.mxu1 %v8244_v38  ;;  %12666 = vmatmul.mubr.msk.bf16.vlgmr.msra.gmra.mxu0 %vm6683_vm5, %v10159_v23 }
 0xe12   :  { %12690 = vmatpush3.bf16.msra.mxu1 %v15037_v30  ;;  %12693 = vmatprep.mubr.msk.bf16.mxu1 %vm13313_vm0, %v13312_v13  ;;  %v8241_v60 = vpop.f32.mrf.mxu1 }
 0xe13   :  { %12691 = vmatprep.subr.bf16.mxu1 %v13312_v13  ;;  %12670 = vmatpush3.bf16.msra.mxu0 %v13217_v25 }
 0xe14   :  { %12671 = vmatprep.subr.bf16.mxu0 %v13312_v13  ;;  %v12640_v44 = vpop.f32.mrf.mxu1  ;;  %12685 = vmatprep.mubr.msk.bf16.mxu0 %vm13313_vm0, %v13312_v13 }
 0xe16   :  { %12692 = vmatpush3.bf16.msra.mxu1 %v15035_v2 }
 0xe17   :  { %12672 = vmatpush3.bf16.msra.mxu0 %v13218_v48  ;;  %12697 = vmatprep.subr.bf16.mxu1 %v13312_v13 }
 0xe18   :  { %12673 = vmatprep.subr.bf16.mxu0 %v13312_v13 }
 0xe19   :  { %12694 = vmatmul.mubr.msk.bf16.vlgmr.msra.gmra.mxu1 %vm6683_vm5, %v10185_v59 }
 0xe1a   :  { %12698 = vmatpush3.bf16.msra.mxu1 %v13220_v56  ;;  %12713 = vmatprep.mubr.msk.bf16.mxu1 %vm13313_vm0, %v13312_v13 }
 0xe1b   :  { %12674 = vmatpush3.bf16.msra.mxu0 %v13219_v18  ;;  %12699 = vmatprep.subr.bf16.mxu1 %v13312_v13 }
 0xe1c   :  { %12675 = vmatprep.subr.bf16.mxu0 %v13312_v13 }
 0xe1e   :  { %12700 = vmatpush3.bf16.msra.mxu1 %v13222_v32 }
 0xe1f   :  { %12676 = vmatpush3.bf16.msra.mxu0 %v13221_v41  ;;  %12701 = vmatprep.subr.bf16.mxu1 %v13312_v13 }
 0xe20   :  { %12677 = vmatprep.subr.bf16.mxu0 %v13312_v13 }
 0xe22   :  { %12702 = vmatpush3.bf16.msra.mxu1 %v13224_v3 }
 0xe23   :  { %12678 = vmatpush3.bf16.msra.mxu0 %v13223_v39  ;;  %12703 = vmatprep.subr.bf16.mxu1 %v13312_v13 }
 0xe24   :  { %12679 = vmatprep.subr.bf16.mxu0 %v13312_v13 }
 0xe26   :  { %12704 = vmatpush3.bf16.msra.mxu1 %v13226_v6 }
 0xe27   :  { %12680 = vmatpush3.bf16.msra.mxu0 %v13225_v62  ;;  %12705 = vmatprep.subr.bf16.mxu1 %v13312_v13  ;;  %v10263_v62 = vld [vmem:[%s15740_s10 + $0x3c] sm:$0xf] }
 0xe28   :  { %12681 = vmatprep.subr.bf16.mxu0 %v13312_v13 }
 0xe2a   :  { %12706 = vmatpush3.bf16.msra.mxu1 %v13228_v9 }
 0xe2b   :  { %12682 = vmatpush3.bf16.msra.mxu0 %v13227_v1  ;;  %12707 = vmatprep.subr.bf16.mxu1 %v13312_v13 }
 0xe2c   :  { %12683 = vmatprep.subr.bf16.mxu0 %v13312_v13 }
 0xe2e   :  { %12708 = vmatpush3.bf16.msra.mxu1 %v13230_v0 }
 0xe2f   :  { %12684 = vmatpush3.bf16.msra.mxu0 %v13229_v28  ;;  %12709 = vmatprep.subr.bf16.mxu1 %v13312_v13 }
 0xe30   :  { %12717 = vmatprep.subr.bf16.mxu0 %v13312_v13 }
 0xe32   :  { %12710 = vmatpush3.bf16.msra.mxu1 %v13231_v8  ;;  %v13251_v8 = vld [vmem:[%s15741_s11 + $0x3e8] sm:$0xff]  }
 0xe33   :  { %12711 = vmatprep.subr.bf16.mxu1 %v13312_v13 }
 0xe36   :  { %12712 = vmatpush3.bf16.msra.mxu1 %v13232_v26  ;;  %v13252_v26 = vld [vmem:[%s15741_s11 + $0x3e0] sm:$0xff]  }
 0xe37   :  { %12745 = vmatprep.subr.bf16.mxu1 %v13312_v13 }
 0xec9   :  { %v8192_v27 = vpop.f32.mrf.mxu0 }
 0xeca   :  { %v8198_v5 = vadd.f32 %v8192_v27, %v15500_v4  ;;  %v13241_v4 = vld [vmem:[%s15741_s11 + $0x350] sm:$0xff]   ;;  %v13253_v27 = vld [vmem:[%s15741_s11 + $0x3d8] sm:$0xff]  }
 0xecb   :  { %v12631_v33 = vpop.f32.mrf.mxu0 }
 0xecc   :  { %v13255_v33 = vld [vmem:[%s15741_s11 + $0x3c8] sm:$0xff]  }
 0xecd   :  { %v8195_v49 = vpop.f32.mrf.mxu0 }
 0xece   :  { %v13256_v49 = vld [vmem:[%s15741_s11 + $0x3c0] sm:$0xff]  }
 0xecf   :  { %v12632_v7 = vpop.f32.mrf.mxu0 }
 0xed1   :  { %v8344_v63 = vpop.f32.mrf.mxu1  ;;  %v8390_v50 = vpop.f32.mrf.mxu0 }
 0xed2   :  { %v15591_v12 = vadd.f32 %v8344_v63, %v8198_v5  ;;  %v8396_v29 = vpack.c.bf16 %v8390_v50, %v8390_v50  ;;  %v13254_v5 = vld [vmem:[%s15741_s11 + $0x3d0] sm:$0xff]  }
 0xed3   :  { %v12659_v42 = vpop.f32.mrf.mxu1  ;;  %v12667_v54 = vpop.f32.mrf.mxu0 }
 0xed4   :  { %12686 = vmatmul.mubr.bf16.vlgmr.msra.gmra.mxu0 %v8396_v29 }
 0xed5   :  { %12718 = vmatpush3.bf16.msra.mxu0 %v15037_v30  ;;  %v8347_v35 = vpop.f32.mrf.mxu1  ;;  %v8393_v45 = vpop.f32.mrf.mxu0  ;;  %12721 = vmatprep.mubr.msk.bf16.mxu0 %vm13313_vm0, %v13312_v13 }
 0xed6   :  { %12719 = vmatprep.subr.bf16.mxu0 %v13312_v13 }
 0xed7   :  { %v12660_v40 = vpop.f32.mrf.mxu1  ;;  %v12668_v57 = vpop.f32.mrf.mxu0 }
 0xed9   :  { %12720 = vmatpush3.bf16.msra.mxu0 %v15035_v2  ;;  %v8542_v22 = vpop.f32.mrf.mxu1 }
 0xeda   :  { %v8548_v16 = vpack.c.bf16 %v8542_v22, %v8542_v22  ;;  %12725 = vmatprep.subr.bf16.mxu0 %v13312_v13 }
 0xedb   :  { %v12695_v24 = vpop.f32.mrf.mxu1 }
 0xedc   :  { %12714 = vmatmul.mubr.bf16.vlgmr.msra.gmra.mxu1 %v8548_v16  ;;  %12722 = vmatmul.mubr.msk.bf16.vlgmr.msra.gmra.mxu0 %vm6683_vm5, %v10211_v55 }
 0xedd   :  { %12746 = vmatpush3.bf16.msra.mxu1 %v15037_v30  ;;  %12749 = vmatprep.mubr.msk.bf16.mxu1 %vm13313_vm0, %v13312_v13  ;;  %v8545_v10 = vpop.f32.mrf.mxu1 }
 0xede   :  { %12747 = vmatprep.subr.bf16.mxu1 %v13312_v13  ;;  %12726 = vmatpush3.bf16.msra.mxu0 %v13233_v61 }
 0xedf   :  { %12727 = vmatprep.subr.bf16.mxu0 %v13312_v13  ;;  %v12696_v31 = vpop.f32.mrf.mxu1  ;;  %12741 = vmatprep.mubr.msk.bf16.mxu0 %vm13313_vm0, %v13312_v13 }
 0xee1   :  { %12748 = vmatpush3.bf16.msra.mxu1 %v15035_v2 }
 0xee2   :  { %12728 = vmatpush3.bf16.msra.mxu0 %v13234_v11  ;;  %12753 = vmatprep.subr.bf16.mxu1 %v13312_v13 }
 0xee3   :  { %12729 = vmatprep.subr.bf16.mxu0 %v13312_v13 }
 0xee4   :  { %12750 = vmatmul.mubr.msk.bf16.vlgmr.msra.gmra.mxu1 %vm6683_vm5, %v10237_v19 }
 0xee5   :  { %12754 = vmatpush3.bf16.msra.mxu1 %v13236_v47  ;;  %12769 = vmatprep.mubr.msk.bf16.mxu1 %vm13313_vm0, %v13312_v13 }
 0xee6   :  { %12730 = vmatpush3.bf16.msra.mxu0 %v13235_v15  ;;  %12755 = vmatprep.subr.bf16.mxu1 %v13312_v13 }
 0xee7   :  { %12731 = vmatprep.subr.bf16.mxu0 %v13312_v13 }
 0xee9   :  { %12756 = vmatpush3.bf16.msra.mxu1 %v13238_v17 }
 0xeea   :  { %12732 = vmatpush3.bf16.msra.mxu0 %v13237_v14  ;;  %12757 = vmatprep.subr.bf16.mxu1 %v13312_v13 }
 0xeeb   :  { %12733 = vmatprep.subr.bf16.mxu0 %v13312_v13 }
 0xeed   :  { %12758 = vmatpush3.bf16.msra.mxu1 %v13240_v21 }
 0xeee   :  { %12734 = vmatpush3.bf16.msra.mxu0 %v13239_v53  ;;  %12759 = vmatprep.subr.bf16.mxu1 %v13312_v13 }
 0xeef   :  { %12735 = vmatprep.subr.bf16.mxu0 %v13312_v13 }
 0xef1   :  { %12760 = vmatpush3.bf16.msra.mxu1 %v13242_v36 }
 0xef2   :  { %12736 = vmatpush3.bf16.msra.mxu0 %v13241_v4  ;;  %12761 = vmatprep.subr.bf16.mxu1 %v13312_v13 }
 0xef3   :  { %12737 = vmatprep.subr.bf16.mxu0 %v13312_v13 }
 0xef5   :  { %12762 = vmatpush3.bf16.msra.mxu1 %v13244_v46 }
 0xef6   :  { %12738 = vmatpush3.bf16.msra.mxu0 %v13243_v52  ;;  %12763 = vmatprep.subr.bf16.mxu1 %v13312_v13 }
 0xef7   :  { %12739 = vmatprep.subr.bf16.mxu0 %v13312_v13 }
 0xef9   :  { %12764 = vmatpush3.bf16.msra.mxu1 %v13246_v43 }
 0xefa   :  { %12740 = vmatpush3.bf16.msra.mxu0 %v13245_v37  ;;  %12765 = vmatprep.subr.bf16.mxu1 %v13312_v13 }
 0xefb   :  { %12773 = vmatprep.subr.bf16.mxu0 %v13312_v13 }
 0xefd   :  { %12766 = vmatpush3.bf16.msra.mxu1 %v13247_v58 }
 0xefe   :  { %12767 = vmatprep.subr.bf16.mxu1 %v13312_v13 }
 0xf01   :  { %12768 = vmatpush3.bf16.msra.mxu1 %v13248_v51 }
 0xf94   :  { %v8496_v34 = vpop.f32.mrf.mxu0 }
 0xf95   :  { %v8502_v23 = vadd.f32 %v8496_v34, %v15591_v12 }
 0xf96   :  { %v12687_v38 = vpop.f32.mrf.mxu0 }
 0xf98   :  { %v8499_v25 = vpop.f32.mrf.mxu0 }
 0xf9a   :  { %v12688_v20 = vpop.f32.mrf.mxu0 }
 0xf9c   :  { %v8648_v60 = vpop.f32.mrf.mxu1  ;;  %v8694_v48 = vpop.f32.mrf.mxu0 }
 0xf9d   :  { %v8654_v44 = vadd.f32 %v8648_v60, %v8502_v23  ;;  %v8700_v59 = vpack.c.bf16 %v8694_v48, %v8694_v48 }
 0xf9e   :  { %v12715_v56 = vpop.f32.mrf.mxu1  ;;  %v12723_v18 = vpop.f32.mrf.mxu0 }
 0xf9f   :  { %12742 = vmatmul.mubr.bf16.vlgmr.msra.gmra.mxu0 %v8700_v59 }
 0xfa0   :  { %12774 = vmatpush3.bf16.msra.mxu0 %v15037_v30  ;;  %v8651_v32 = vpop.f32.mrf.mxu1  ;;  %v8697_v41 = vpop.f32.mrf.mxu0  ;;  %12777 = vmatprep.mubr.msk.bf16.mxu0 %vm13313_vm0, %v13312_v13  ;;  %v13249_v30 = vld [vmem:[%s15741_s11 + $0x3f8] sm:$0xff]  }
 0xfa1   :  { %12775 = vmatprep.subr.bf16.mxu0 %v13312_v13 }
 0xfa2   :  { %v12716_v3 = vpop.f32.mrf.mxu1  ;;  %v12724_v39 = vpop.f32.mrf.mxu0 }
 0xfa4   :  { %12776 = vmatpush3.bf16.msra.mxu0 %v15035_v2  ;;  %v8846_v6 = vpop.f32.mrf.mxu1  ;;  %v13250_v2 = vld [vmem:[%s15741_s11 + $0x3f0] sm:$0xff]   ;;  %s13285_s11 = scalar_lea.vmem %s9123_s24, 512 }
 0xfa5   :  { %v8852_v1 = vpack.c.bf16 %v8846_v6, %v8846_v6  ;;  %12781 = vmatprep.subr.bf16.mxu0 %v13312_v13  ;;  %p13286_p5 = scmp.ne.s32.totalorder %s9123_s24, %s13285_s11  ;;  %p13291_p7 = scmp.lt.s32.totalorder %s13285_s11, %s13285_s11 }
 0xfa6   :  { %v12751_v9 = vpop.f32.mrf.mxu1 }
 0xfa7   :  { %12770 = vmatmul.mubr.bf16.vlgmr.msra.gmra.mxu1 %v8852_v1  ;;  %12778 = vmatmul.mubr.msk.bf16.vlgmr.msra.gmra.mxu0 %vm6683_vm5, %v10263_v62  ;;  %p13292_p8 = por %p13291_p7, %p13290_p6 }
 0xfa8   :  { %12782 = vmatpush3.bf16.msra.mxu0 %v13249_v30  ;;  %v8849_v28 = vpop.f32.mrf.mxu1  ;;  %12797 = vmatprep.mubr.msk.bf16.mxu0 %vm13313_vm0, %v13312_v13 }
 0xfa9   :  { %12783 = vmatprep.subr.bf16.mxu0 %v13312_v13  ;;  %p13293_p9 = pnand %p13292_p8, %p13286_p5 }
 0xfaa   :  { %v12752_v0 = vpop.f32.mrf.mxu1 }
 0xfac   :  { %12784 = vmatpush3.bf16.msra.mxu0 %v13250_v2 }
 0xfad   :  { %12785 = vmatprep.subr.bf16.mxu0 %v13312_v13 }
 0xfb0   :  { %12786 = vmatpush3.bf16.msra.mxu0 %v13251_v8 }
 0xfb1   :  { %12787 = vmatprep.subr.bf16.mxu0 %v13312_v13 }
 0xfb4   :  { %12788 = vmatpush3.bf16.msra.mxu0 %v13252_v26 }
 0xfb5   :  { %12789 = vmatprep.subr.bf16.mxu0 %v13312_v13 }
 0xfb8   :  { %12790 = vmatpush3.bf16.msra.mxu0 %v13253_v27 }
 0xfb9   :  { %12791 = vmatprep.subr.bf16.mxu0 %v13312_v13 }
 0xfbc   :  { %12792 = vmatpush3.bf16.msra.mxu0 %v13254_v5 }
 0xfbd   :  { %12793 = vmatprep.subr.bf16.mxu0 %v13312_v13 }
 0xfc0   :  { %12794 = vmatpush3.bf16.msra.mxu0 %v13255_v33 }
 0xfc1   :  { %12795 = vmatprep.subr.bf16.mxu0 %v13312_v13 }
 0xfc4   :  { %12796 = vmatpush3.bf16.msra.mxu0 %v13256_v49 }
0x105f   :  { %v8800_v7 = vpop.f32.mrf.mxu0 }
0x1060   :  { %v8806_v63 = vadd.f32 %v8800_v7, %v8654_v44 }
0x1061   :  { %v12743_v50 = vpop.f32.mrf.mxu0 }
0x1063   :  { %v8803_v12 = vpop.f32.mrf.mxu0 }
0x1065   :  { %v12744_v29 = vpop.f32.mrf.mxu0 }
0x1067   :  { %v8952_v42 = vpop.f32.mrf.mxu1  ;;  %v8998_v54 = vpop.f32.mrf.mxu0 }
0x1068   :  { %v8958_v35 = vadd.f32 %v8952_v42, %v8806_v63  ;;  %v9004_v45 = vpack.c.bf16 %v8998_v54, %v8998_v54 }
0x1069   :  { %v12779_v40 = vpop.f32.mrf.mxu0  ;;  %v12771_v57 = vpop.f32.mrf.mxu1 }
0x106a   :  { %12798 = vmatmul.mubr.bf16.vlgmr.msra.gmra.mxu0 %v9004_v45 }
0x106b   :  { %v9001_v22 = vpop.f32.mrf.mxu0  ;;  %v8955_v55 = vpop.f32.mrf.mxu1 }
0x106d   :  { %v12780_v13 = vpop.f32.mrf.mxu0  ;;  %v12772_v16 = vpop.f32.mrf.mxu1 }
0x106e   :  { %13296 = shalt.err (!%p13293_p9)
}
0x106f   :  { %s13315_s25 = smov 128   ;;  %s13316_s26 = smov 8  }
0x1070   :  { %9128 = dma.vmem_to_hbm [thread:$0]  %s9123_s24, 512, %s15742_s12, [#allocation4], %s13315_s25, %s13315_s25, %s13316_s26  }
0x112a   :  { %v9104_v61 = vpop.f32.mrf.mxu0 }
0x112b   :  { %v9110_v24 = vadd.f32 %v9104_v61, %v8958_v35 }
0x112c   :  { %v12799_v10 = vpop.f32.mrf.mxu0 }
0x112d   :  { %v9111_v11 = vsub.f32 0.0, %v9110_v24 }
0x112e   :  { %v9107_v31 = vpop.f32.mrf.mxu0 }
0x112f   :  { %v9112_v19 = vmul.f32 1.442695, %v9111_v11 }
0x1130   :  { %v12800_v47 = vpop.f32.mrf.mxu0 }
0x1131   :  { %13261 = vpow2.f32 %v9112_v19 }
0x113e   :  { %v13262_v15 = vpop.eup %13261 }
0x113f   :  { %v9114_v17 = vadd.f32 1.0, %v13262_v15 }
0x1141   :  { %13263 = vrcp.f32 %v9114_v17 }
0x114e   :  { %v13264_v14 = vpop.eup %13263 }
0x114f   :  { %9116 = vst [vmem:[%s15743_s13] sm:$0xff] %v13264_v14 }
0x1150   :  { %13307 = dma.done.wait [#allocation4], 512  }
0x1151   :  { %13308 = vsyncadd [#allocation4], 4294966784 }
0x1152   :  { %9136 = vsyncpa [#allocation3], 1 }
0x1153   :  { %9137 = vsyncpa [#allocation4], 1 }

</bundles_post_ra>
